<compile_context>
chip_gen: v5e
topology: v5e:2x2
jax: 0.10.0
libtpu: 0.0.40
codegen_flags: <defaults>
</compile_context>

<pallas_src>
import jax
import jax.numpy as jnp
from jax.experimental import pallas as pl
from jax.experimental.pallas import tpu as pltpu

# ------------------------- small config (module-consistent) -------------------------
B     = 4            # batch
BP    = 8            # padded batch -> fills the f32 (8,128) vreg sublane tile
F     = 8            # feat_dim == LSTM sequence length
CDF   = 16           # cdf_dim (features seen by PiecewiseLinearEmbeddings)
NB    = 8            # bins per feature
E     = 128          # embed_dim == LSTM hidden_dim
PLE_D = E // CDF     # d_embedding of the PLE (= 8)
PAD   = E - PLE_D * CDF   # pad_dim (0 here since embed_dim % cdf_dim == 0)
OUT   = 1            # output_dim

assert PAD == 0  # TODO(synk): add in-kernel column pad if embed_dim % cdf_dim != 0


# ------------------------------------ fused kernel -----------------------------------
def fused_kernel(x_ref, expand_ref, left_ref, width_ref, fmask_ref, lmask_ref,
                 wb_ref, bb_ref, wih_ref, whh_ref, b_ref,
                 w1_ref, b1_ref, w2_ref, b2_ref, out_ref, gx_ref):
    """PLE embedding + LSTM recurrence + fc head, all in one kernel invocation."""
    # ---- PiecewiseLinearEmbeddings (version 'A') + block-diag NLinear + ReLU ----
    x2d = x_ref[...]                                                   # (F*BP, CDF), time-major
    # in-kernel "repeat each feature value NB times" via a 0/1 expansion matmul (MXU)
    xrep = jnp.dot(x2d, expand_ref[...],
                   preferred_element_type=jnp.float32)                 # (F*BP, CDF*NB)
    ratio = (xrep - left_ref[...]) / width_ref[...]
    enc_first = jnp.minimum(ratio, 1.0)                                # first bin: no lower clamp
    enc_last  = jnp.maximum(ratio, 0.0)                                # last bin : no upper clamp
    enc_mid   = jnp.clip(ratio, 0.0, 1.0)
    ple = jnp.where(fmask_ref[...] > 0.5, enc_first,
          jnp.where(lmask_ref[...] > 0.5, enc_last, enc_mid))
    emb = jnp.maximum(jnp.dot(ple, wb_ref[...],
                              preferred_element_type=jnp.float32) + bb_ref[...],
                      0.0)                                             # (F*BP, E)

    # ---- hoisted LSTM input projection (all timesteps at once, no serial dep) ----
    gx_ref[...] = (jnp.dot(emb, wih_ref[...],
                           preferred_element_type=jnp.float32) + b_ref[...])  # (F*BP, 4E)

    # ---- recurrence, fully unrolled (F = 8); per step only h @ W_hh^T + gates ----
    h = jnp.zeros((BP, E), jnp.float32)
    c = jnp.zeros((BP, E), jnp.float32)
    for t in range(F):
        gx_t = gx_ref[t * BP:(t + 1) * BP, :]                          # aligned (8, 4E) block
        gates = gx_t + jnp.dot(h, whh_ref[...],
                               preferred_element_type=jnp.float32)
        i = jax.nn.sigmoid(gates[:, 0 * E:1 * E])
        f = jax.nn.sigmoid(gates[:, 1 * E:2 * E])
        g = jnp.tanh(gates[:, 2 * E:3 * E])
        o = jax.nn.sigmoid(gates[:, 3 * E:4 * E])
        c = f * c + i * g
        h = o * jnp.tanh(c)

    # ---- fc head: Linear -> ReLU -> Linear ----------------------------------------
    hid = jnp.maximum(jnp.dot(h, w1_ref[...],
                              preferred_element_type=jnp.float32) + b1_ref[...], 0.0)
    out_ref[...] = (jnp.dot(hid, w2_ref[...],
                            preferred_element_type=jnp.float32) + b2_ref[...])


# ------------------------------------ wrapper ----------------------------------------
def forward(x, p):
    """x: (B, F, CDF) float32 -> (B, OUT) float32."""
    Bb, Ff, Cd = x.shape
    # Pad batch to BP once and lay the sequence out time-major so each timestep is a
    # contiguous, sublane-aligned 8-row block inside the kernel.
    xp = jnp.pad(x, ((0, BP - Bb), (0, 0), (0, 0)))
    x2d = jnp.transpose(xp, (1, 0, 2)).reshape(Ff * BP, Cd)

    vmem = pl.BlockSpec(memory_space=pltpu.MemorySpace.VMEM)
    out = pl.pallas_call(
        fused_kernel,
        out_shape=jax.ShapeDtypeStruct((BP, OUT), jnp.float32),
        in_specs=[vmem] * 15,
        out_specs=vmem,
        scratch_shapes=[pltpu.VMEM((Ff * BP, 4 * E), jnp.float32)],    # hoisted gate inputs
    )(x2d, p["expand"], p["left_flat"], p["width_flat"], p["fmask"], p["lmask"],
      p["wb"], p["bb"], p["wih_t"], p["whh_t"], p["b_lstm"],
      p["w1_t"], p["b1"], p["w2_t"], p["b2"])
    return out[:Bb]


# -------------------------- deterministic parameter init -----------------------------
def init_params(key):
    ks = jax.random.split(key, 10)
    # bins: NB+1 monotone edges per embedded feature (deterministic)
    base = jnp.linspace(-2.0, 2.0, NB + 1, dtype=jnp.float32)
    edges = base[None, :] + jnp.linspace(-0.1, 0.1, CDF, dtype=jnp.float32)[:, None]
    left = edges[:, :-1]                                               # (CDF, NB)
    width = edges[:, 1:] - edges[:, :-1]                               # (CDF, NB)

    bin_idx = jnp.tile(jnp.arange(NB), (CDF,)).reshape(1, CDF * NB)
    fmask = (bin_idx == 0).astype(jnp.float32)
    lmask = (bin_idx == NB - 1).astype(jnp.float32)

    # 0/1 expansion matrix implementing "repeat each feature value NB times" in-kernel
    col_feat = jnp.arange(CDF * NB) // NB
    expand = (col_feat[None, :] == jnp.arange(CDF)[:, None]).astype(jnp.float32)  # (CDF, CDF*NB)

    # per-feature NLinear of the PLE  ->  block-diagonal (CDF*NB, CDF*PLE_D) matrix
    w_ple = 0.2 * jax.random.normal(ks[0], (CDF, NB, PLE_D), jnp.float32)
    b_ple = 0.05 * jax.random.normal(ks[1], (CDF, PLE_D), jnp.float32)
    wb = jnp.zeros((CDF * NB, CDF * PLE_D), jnp.float32)
    for j in range(CDF):
        wb = wb.at[j * NB:(j + 1) * NB, j * PLE_D:(j + 1) * PLE_D].set(w_ple[j])
    bb = b_ple.reshape(1, CDF * PLE_D)

    s = 1.0 / jnp.sqrt(E)
    wih = s * jax.random.normal(ks[2], (4 * E, E), jnp.float32)        # torch gate order i,f,g,o
    whh = s * jax.random.normal(ks[3], (4 * E, E), jnp.float32)
    bih = s * jax.random.normal(ks[4], (4 * E,), jnp.float32)
    bhh = s * jax.random.normal(ks[5], (4 * E,), jnp.float32)

    w1 = s * jax.random.normal(ks[6], (E, E), jnp.float32)
    b1 = s * jax.random.normal(ks[7], (E,), jnp.float32)
    w2 = s * jax.random.normal(ks[8], (OUT, E), jnp.float32)
    b2 = s * jax.random.normal(ks[9], (OUT,), jnp.float32)

    return dict(
        left=left, width=width,
        left_flat=left.reshape(1, CDF * NB), width_flat=width.reshape(1, CDF * NB),
        fmask=fmask, lmask=lmask, expand=expand,
        w_ple=w_ple, b_ple=b_ple, wb=wb, bb=bb,
        wih=wih, whh=whh, bih=bih, bhh=bhh,
        wih_t=wih.T, whh_t=whh.T, b_lstm=(bih + bhh).reshape(1, 4 * E),
        w1=w1, b1_vec=b1, w2=w2, b2_vec=b2,
        w1_t=w1.T, b1=b1.reshape(1, E), w2_t=w2.T, b2=b2.reshape(1, OUT),
    )


# --------------------------------- pure-JAX reference --------------------------------
def reference(x, p):
    r = (x[..., None] - p["left"]) / p["width"]                        # (B,F,CDF,NB)
    idx = jnp.arange(NB)
    ple = jnp.where(idx == 0, jnp.minimum(r, 1.0),
          jnp.where(idx == NB - 1, jnp.maximum(r, 0.0), jnp.clip(r, 0.0, 1.0)))
    emb = jnp.maximum(jnp.einsum('bfct,ctd->bfcd', ple, p["w_ple"]) + p["b_ple"], 0.0)
    seq = emb.reshape(x.shape[0], x.shape[1], CDF * PLE_D)
    if PAD:
        seq = jnp.pad(seq, ((0, 0), (0, 0), (0, PAD)))
    h = jnp.zeros((x.shape[0], E), jnp.float32)
    c = jnp.zeros((x.shape[0], E), jnp.float32)
    for t in range(x.shape[1]):
        g = seq[:, t] @ p["wih"].T + h @ p["whh"].T + p["bih"] + p["bhh"]
        i = jax.nn.sigmoid(g[:, :E]); f = jax.nn.sigmoid(g[:, E:2 * E])
        gg = jnp.tanh(g[:, 2 * E:3 * E]); o = jax.nn.sigmoid(g[:, 3 * E:])
        c = f * c + i * gg
        h = o * jnp.tanh(c)
    hid = jnp.maximum(h @ p["w1"].T + p["b1_vec"], 0.0)
    return hid @ p["w2"].T + p["b2_vec"]


# --------------------------------------- main -----------------------------------------
if __name__ == "__main__":
    # dropout=0.0 and num_layers=1 in the module defaults -> no-op / single layer.
    params = init_params(jax.random.PRNGKey(0))
    x = jax.random.normal(jax.random.PRNGKey(0), (B, F, CDF), jnp.float32)

    out = forward(x, params)
    out = jax.block_until_ready(out)

    ref = reference(x, params)
    assert out.shape == (B, OUT)
    assert jnp.allclose(out, ref, atol=2e-3, rtol=2e-3), (out, ref)
    print("KERNEL_OK")
</pallas_src>

<mosaic_0001>
module attributes {stable_mosaic.version = 11 : i64} {
  func.func @fused_kernel(%arg0: memref<64x16xf32, #tpu.memory_space<vmem>>, %arg1: memref<16x128xf32, #tpu.memory_space<vmem>>, %arg2: memref<1x128xf32, #tpu.memory_space<vmem>>, %arg3: memref<1x128xf32, #tpu.memory_space<vmem>>, %arg4: memref<1x128xf32, #tpu.memory_space<vmem>>, %arg5: memref<1x128xf32, #tpu.memory_space<vmem>>, %arg6: memref<128x128xf32, #tpu.memory_space<vmem>>, %arg7: memref<1x128xf32, #tpu.memory_space<vmem>>, %arg8: memref<128x512xf32, #tpu.memory_space<vmem>>, %arg9: memref<128x512xf32, #tpu.memory_space<vmem>>, %arg10: memref<1x512xf32, #tpu.memory_space<vmem>>, %arg11: memref<128x128xf32, #tpu.memory_space<vmem>>, %arg12: memref<1x128xf32, #tpu.memory_space<vmem>>, %arg13: memref<128x1xf32, #tpu.memory_space<vmem>>, %arg14: memref<1x1xf32, #tpu.memory_space<vmem>>, %arg15: memref<8x1xf32, #tpu.memory_space<vmem>>, %arg16: memref<64x512xf32, #tpu.memory_space<vmem>>) attributes {dimension_semantics = [], scalar_prefetch = 0 : i64, scratch_operands = 1 : i64, tpu.core_type = #tpu.core_type<tc>} {
    %c0 = arith.constant 0 : index
    %c0_0 = arith.constant 0 : index
    %0 = vector.load %arg0[%c0, %c0_0] : memref<64x16xf32, #tpu.memory_space<vmem>>, vector<64x16xf32>
    %c0_1 = arith.constant 0 : index
    %c0_2 = arith.constant 0 : index
    %1 = vector.load %arg1[%c0_1, %c0_2] : memref<16x128xf32, #tpu.memory_space<vmem>>, vector<16x128xf32>
    %cst = arith.constant dense<0.000000e+00> : vector<64x128xf32>
    %2 = tpu.matmul %0, %1, %cst {dimension_numbers = #tpu.dot_dimension_numbers<[1], [0], [0], [1], [0, 0, 1, 1], [], []>} : vector<64x16xf32>, vector<16x128xf32>, vector<64x128xf32> -> vector<64x128xf32>
    %c0_3 = arith.constant 0 : index
    %c0_4 = arith.constant 0 : index
    %3 = vector.load %arg2[%c0_3, %c0_4] : memref<1x128xf32, #tpu.memory_space<vmem>>, vector<1x128xf32>
    %4 = vector.broadcast %3 : vector<1x128xf32> to vector<64x128xf32>
    %5 = arith.subf %2, %4 : vector<64x128xf32>
    %c0_5 = arith.constant 0 : index
    %c0_6 = arith.constant 0 : index
    %6 = vector.load %arg3[%c0_5, %c0_6] : memref<1x128xf32, #tpu.memory_space<vmem>>, vector<1x128xf32>
    %7 = vector.broadcast %6 : vector<1x128xf32> to vector<64x128xf32>
    %8 = arith.divf %5, %7 : vector<64x128xf32>
    %cst_7 = arith.constant 1.000000e+00 : f32
    %9 = vector.broadcast %cst_7 : f32 to vector<64x128xf32>
    %10 = arith.minimumf %8, %9 : vector<64x128xf32>
    %cst_8 = arith.constant 0.000000e+00 : f32
    %11 = vector.broadcast %cst_8 : f32 to vector<64x128xf32>
    %12 = arith.maximumf %8, %11 : vector<64x128xf32>
    %cst_9 = arith.constant 0.000000e+00 : f32
    %cst_10 = arith.constant 1.000000e+00 : f32
    %13 = vector.broadcast %cst_9 : f32 to vector<64x128xf32>
    %14 = arith.maximumf %13, %8 : vector<64x128xf32>
    %15 = vector.broadcast %cst_10 : f32 to vector<64x128xf32>
    %16 = arith.minimumf %15, %14 : vector<64x128xf32>
    %c0_11 = arith.constant 0 : index
    %c0_12 = arith.constant 0 : index
    %17 = vector.load %arg4[%c0_11, %c0_12] : memref<1x128xf32, #tpu.memory_space<vmem>>, vector<1x128xf32>
    %cst_13 = arith.constant 5.000000e-01 : f32
    %18 = vector.broadcast %cst_13 : f32 to vector<1x128xf32>
    %19 = arith.cmpf ogt, %17, %18 : vector<1x128xf32>
    %c0_14 = arith.constant 0 : index
    %c0_15 = arith.constant 0 : index
    %20 = vector.load %arg5[%c0_14, %c0_15] : memref<1x128xf32, #tpu.memory_space<vmem>>, vector<1x128xf32>
    %cst_16 = arith.constant 5.000000e-01 : f32
    %21 = vector.broadcast %cst_16 : f32 to vector<1x128xf32>
    %22 = arith.cmpf ogt, %20, %21 : vector<1x128xf32>
    %23 = vector.shape_cast %22 : vector<1x128xi1> to vector<1x128xi1>
    %24 = vector.broadcast %23 : vector<1x128xi1> to vector<64x128xi1>
    %25 = arith.select %24, %12, %16 : vector<64x128xi1>, vector<64x128xf32>
    %26 = vector.shape_cast %19 : vector<1x128xi1> to vector<1x128xi1>
    %27 = vector.broadcast %26 : vector<1x128xi1> to vector<64x128xi1>
    %28 = arith.select %27, %10, %25 : vector<64x128xi1>, vector<64x128xf32>
    %c0_17 = arith.constant 0 : index
    %c0_18 = arith.constant 0 : index
    %29 = vector.load %arg6[%c0_17, %c0_18] : memref<128x128xf32, #tpu.memory_space<vmem>>, vector<128x128xf32>
    %cst_19 = arith.constant dense<0.000000e+00> : vector<64x128xf32>
    %30 = tpu.matmul %28, %29, %cst_19 {dimension_numbers = #tpu.dot_dimension_numbers<[1], [0], [0], [1], [0, 0, 1, 1], [], []>} : vector<64x128xf32>, vector<128x128xf32>, vector<64x128xf32> -> vector<64x128xf32>
    %c0_20 = arith.constant 0 : index
    %c0_21 = arith.constant 0 : index
    %31 = vector.load %arg7[%c0_20, %c0_21] : memref<1x128xf32, #tpu.memory_space<vmem>>, vector<1x128xf32>
    %32 = vector.broadcast %31 : vector<1x128xf32> to vector<64x128xf32>
    %33 = arith.addf %30, %32 : vector<64x128xf32>
    %cst_22 = arith.constant 0.000000e+00 : f32
    %34 = vector.broadcast %cst_22 : f32 to vector<64x128xf32>
    %35 = arith.maximumf %33, %34 : vector<64x128xf32>
    %c0_23 = arith.constant 0 : index
    %c0_24 = arith.constant 0 : index
    %36 = vector.load %arg8[%c0_23, %c0_24] : memref<128x512xf32, #tpu.memory_space<vmem>>, vector<128x512xf32>
    %cst_25 = arith.constant dense<0.000000e+00> : vector<64x512xf32>
    %37 = tpu.matmul %35, %36, %cst_25 {dimension_numbers = #tpu.dot_dimension_numbers<[1], [0], [0], [1], [0, 0, 1, 1], [], []>} : vector<64x128xf32>, vector<128x512xf32>, vector<64x512xf32> -> vector<64x512xf32>
    %c0_26 = arith.constant 0 : index
    %c0_27 = arith.constant 0 : index
    %38 = vector.load %arg10[%c0_26, %c0_27] : memref<1x512xf32, #tpu.memory_space<vmem>>, vector<1x512xf32>
    %39 = vector.broadcast %38 : vector<1x512xf32> to vector<64x512xf32>
    %40 = arith.addf %37, %39 : vector<64x512xf32>
    %c0_28 = arith.constant 0 : index
    %c0_29 = arith.constant 0 : index
    %41 = vector.load %arg16[%c0_28, %c0_29] : memref<64x512xf32, #tpu.memory_space<vmem>>, vector<64x512xf32>
    tpu.vector_store %arg16[%c0_28, %c0_29], %40 {strides = array<i32>} : memref<64x512xf32, #tpu.memory_space<vmem>>, vector<64x512xf32>,
    %cst_30 = arith.constant 0.000000e+00 : f32
    %42 = vector.broadcast %cst_30 : f32 to vector<8x128xf32>
    %cst_31 = arith.constant 0.000000e+00 : f32
    %43 = vector.broadcast %cst_31 : f32 to vector<8x128xf32>
    %c0_32 = arith.constant 0 : index
    %c0_33 = arith.constant 0 : index
    %44 = vector.load %arg16[%c0_32, %c0_33] : memref<64x512xf32, #tpu.memory_space<vmem>>, vector<8x512xf32>
    %c0_34 = arith.constant 0 : index
    %c0_35 = arith.constant 0 : index
    %45 = vector.load %arg9[%c0_34, %c0_35] : memref<128x512xf32, #tpu.memory_space<vmem>>, vector<128x512xf32>
    %cst_36 = arith.constant dense<0.000000e+00> : vector<8x512xf32>
    %46 = tpu.matmul %42, %45, %cst_36 {dimension_numbers = #tpu.dot_dimension_numbers<[1], [0], [0], [1], [0, 0, 1, 1], [], []>} : vector<8x128xf32>, vector<128x512xf32>, vector<8x512xf32> -> vector<8x512xf32>
    %47 = arith.addf %44, %46 : vector<8x512xf32>
    %48 = vector.extract_strided_slice %47 {offsets = [0, 0], sizes = [8, 128], strides = [1, 1]} : vector<8x512xf32> to vector<8x128xf32>
    %49 = arith.negf %48 : vector<8x128xf32>
    %50 = math.exp %49 : vector<8x128xf32>
    %cst_37 = arith.constant 1.000000e+00 : f32
    %51 = vector.broadcast %cst_37 : f32 to vector<8x128xf32>
    %52 = arith.addf %51, %50 : vector<8x128xf32>
    %53 = arith.divf %51, %52 : vector<8x128xf32>
    %54 = vector.extract_strided_slice %47 {offsets = [0, 128], sizes = [8, 128], strides = [1, 1]} : vector<8x512xf32> to vector<8x128xf32>
    %55 = arith.negf %54 : vector<8x128xf32>
    %56 = math.exp %55 : vector<8x128xf32>
    %cst_38 = arith.constant 1.000000e+00 : f32
    %57 = vector.broadcast %cst_38 : f32 to vector<8x128xf32>
    %58 = arith.addf %57, %56 : vector<8x128xf32>
    %59 = arith.divf %57, %58 : vector<8x128xf32>
    %60 = vector.extract_strided_slice %47 {offsets = [0, 256], sizes = [8, 128], strides = [1, 1]} : vector<8x512xf32> to vector<8x128xf32>
    %61 = math.tanh %60 : vector<8x128xf32>
    %62 = vector.extract_strided_slice %47 {offsets = [0, 384], sizes = [8, 128], strides = [1, 1]} : vector<8x512xf32> to vector<8x128xf32>
    %63 = arith.negf %62 : vector<8x128xf32>
    %64 = math.exp %63 : vector<8x128xf32>
    %cst_39 = arith.constant 1.000000e+00 : f32
    %65 = vector.broadcast %cst_39 : f32 to vector<8x128xf32>
    %66 = arith.addf %65, %64 : vector<8x128xf32>
    %67 = arith.divf %65, %66 : vector<8x128xf32>
    %68 = arith.mulf %59, %43 : vector<8x128xf32>
    %69 = arith.mulf %53, %61 : vector<8x128xf32>
    %70 = arith.addf %68, %69 : vector<8x128xf32>
    %71 = math.tanh %70 : vector<8x128xf32>
    %72 = arith.mulf %67, %71 : vector<8x128xf32>
    %c8 = arith.constant 8 : index
    %c0_40 = arith.constant 0 : index
    %73 = vector.load %arg16[%c8, %c0_40] : memref<64x512xf32, #tpu.memory_space<vmem>>, vector<8x512xf32>
    %c0_41 = arith.constant 0 : index
    %c0_42 = arith.constant 0 : index
    %74 = vector.load %arg9[%c0_41, %c0_42] : memref<128x512xf32, #tpu.memory_space<vmem>>, vector<128x512xf32>
    %cst_43 = arith.constant dense<0.000000e+00> : vector<8x512xf32>
    %75 = tpu.matmul %72, %74, %cst_43 {dimension_numbers = #tpu.dot_dimension_numbers<[1], [0], [0], [1], [0, 0, 1, 1], [], []>} : vector<8x128xf32>, vector<128x512xf32>, vector<8x512xf32> -> vector<8x512xf32>
    %76 = arith.addf %73, %75 : vector<8x512xf32>
    %77 = vector.extract_strided_slice %76 {offsets = [0, 0], sizes = [8, 128], strides = [1, 1]} : vector<8x512xf32> to vector<8x128xf32>
    %78 = arith.negf %77 : vector<8x128xf32>
    %79 = math.exp %78 : vector<8x128xf32>
    %cst_44 = arith.constant 1.000000e+00 : f32
    %80 = vector.broadcast %cst_44 : f32 to vector<8x128xf32>
    %81 = arith.addf %80, %79 : vector<8x128xf32>
    %82 = arith.divf %80, %81 : vector<8x128xf32>
    %83 = vector.extract_strided_slice %76 {offsets = [0, 128], sizes = [8, 128], strides = [1, 1]} : vector<8x512xf32> to vector<8x128xf32>
    %84 = arith.negf %83 : vector<8x128xf32>
    %85 = math.exp %84 : vector<8x128xf32>
    %cst_45 = arith.constant 1.000000e+00 : f32
    %86 = vector.broadcast %cst_45 : f32 to vector<8x128xf32>
    %87 = arith.addf %86, %85 : vector<8x128xf32>
    %88 = arith.divf %86, %87 : vector<8x128xf32>
    %89 = vector.extract_strided_slice %76 {offsets = [0, 256], sizes = [8, 128], strides = [1, 1]} : vector<8x512xf32> to vector<8x128xf32>
    %90 = math.tanh %89 : vector<8x128xf32>
    %91 = vector.extract_strided_slice %76 {offsets = [0, 384], sizes = [8, 128], strides = [1, 1]} : vector<8x512xf32> to vector<8x128xf32>
    %92 = arith.negf %91 : vector<8x128xf32>
    %93 = math.exp %92 : vector<8x128xf32>
    %cst_46 = arith.constant 1.000000e+00 : f32
    %94 = vector.broadcast %cst_46 : f32 to vector<8x128xf32>
    %95 = arith.addf %94, %93 : vector<8x128xf32>
    %96 = arith.divf %94, %95 : vector<8x128xf32>
    %97 = arith.mulf %88, %70 : vector<8x128xf32>
    %98 = arith.mulf %82, %90 : vector<8x128xf32>
    %99 = arith.addf %97, %98 : vector<8x128xf32>
    %100 = math.tanh %99 : vector<8x128xf32>
    %101 = arith.mulf %96, %100 : vector<8x128xf32>
    %c16 = arith.constant 16 : index
    %c0_47 = arith.constant 0 : index
    %102 = vector.load %arg16[%c16, %c0_47] : memref<64x512xf32, #tpu.memory_space<vmem>>, vector<8x512xf32>
    %c0_48 = arith.constant 0 : index
    %c0_49 = arith.constant 0 : index
    %103 = vector.load %arg9[%c0_48, %c0_49] : memref<128x512xf32, #tpu.memory_space<vmem>>, vector<128x512xf32>
    %cst_50 = arith.constant dense<0.000000e+00> : vector<8x512xf32>
    %104 = tpu.matmul %101, %103, %cst_50 {dimension_numbers = #tpu.dot_dimension_numbers<[1], [0], [0], [1], [0, 0, 1, 1], [], []>} : vector<8x128xf32>, vector<128x512xf32>, vector<8x512xf32> -> vector<8x512xf32>
    %105 = arith.addf %102, %104 : vector<8x512xf32>
    %106 = vector.extract_strided_slice %105 {offsets = [0, 0], sizes = [8, 128], strides = [1, 1]} : vector<8x512xf32> to vector<8x128xf32>
    %107 = arith.negf %106 : vector<8x128xf32>
    %108 = math.exp %107 : vector<8x128xf32>
    %cst_51 = arith.constant 1.000000e+00 : f32
    %109 = vector.broadcast %cst_51 : f32 to vector<8x128xf32>
    %110 = arith.addf %109, %108 : vector<8x128xf32>
    %111 = arith.divf %109, %110 : vector<8x128xf32>
    %112 = vector.extract_strided_slice %105 {offsets = [0, 128], sizes = [8, 128], strides = [1, 1]} : vector<8x512xf32> to vector<8x128xf32>
    %113 = arith.negf %112 : vector<8x128xf32>
    %114 = math.exp %113 : vector<8x128xf32>
    %cst_52 = arith.constant 1.000000e+00 : f32
    %115 = vector.broadcast %cst_52 : f32 to vector<8x128xf32>
    %116 = arith.addf %115, %114 : vector<8x128xf32>
    %117 = arith.divf %115, %116 : vector<8x128xf32>
    %118 = vector.extract_strided_slice %105 {offsets = [0, 256], sizes = [8, 128], strides = [1, 1]} : vector<8x512xf32> to vector<8x128xf32>
    %119 = math.tanh %118 : vector<8x128xf32>
    %120 = vector.extract_strided_slice %105 {offsets = [0, 384], sizes = [8, 128], strides = [1, 1]} : vector<8x512xf32> to vector<8x128xf32>
    %121 = arith.negf %120 : vector<8x128xf32>
    %122 = math.exp %121 : vector<8x128xf32>
    %cst_53 = arith.constant 1.000000e+00 : f32
    %123 = vector.broadcast %cst_53 : f32 to vector<8x128xf32>
    %124 = arith.addf %123, %122 : vector<8x128xf32>
    %125 = arith.divf %123, %124 : vector<8x128xf32>
    %126 = arith.mulf %117, %99 : vector<8x128xf32>
    %127 = arith.mulf %111, %119 : vector<8x128xf32>
    %128 = arith.addf %126, %127 : vector<8x128xf32>
    %129 = math.tanh %128 : vector<8x128xf32>
    %130 = arith.mulf %125, %129 : vector<8x128xf32>
    %c24 = arith.constant 24 : index
    %c0_54 = arith.constant 0 : index
    %131 = vector.load %arg16[%c24, %c0_54] : memref<64x512xf32, #tpu.memory_space<vmem>>, vector<8x512xf32>
    %c0_55 = arith.constant 0 : index
    %c0_56 = arith.constant 0 : index
    %132 = vector.load %arg9[%c0_55, %c0_56] : memref<128x512xf32, #tpu.memory_space<vmem>>, vector<128x512xf32>
    %cst_57 = arith.constant dense<0.000000e+00> : vector<8x512xf32>
    %133 = tpu.matmul %130, %132, %cst_57 {dimension_numbers = #tpu.dot_dimension_numbers<[1], [0], [0], [1], [0, 0, 1, 1], [], []>} : vector<8x128xf32>, vector<128x512xf32>, vector<8x512xf32> -> vector<8x512xf32>
    %134 = arith.addf %131, %133 : vector<8x512xf32>
    %135 = vector.extract_strided_slice %134 {offsets = [0, 0], sizes = [8, 128], strides = [1, 1]} : vector<8x512xf32> to vector<8x128xf32>
    %136 = arith.negf %135 : vector<8x128xf32>
    %137 = math.exp %136 : vector<8x128xf32>
    %cst_58 = arith.constant 1.000000e+00 : f32
    %138 = vector.broadcast %cst_58 : f32 to vector<8x128xf32>
    %139 = arith.addf %138, %137 : vector<8x128xf32>
    %140 = arith.divf %138, %139 : vector<8x128xf32>
    %141 = vector.extract_strided_slice %134 {offsets = [0, 128], sizes = [8, 128], strides = [1, 1]} : vector<8x512xf32> to vector<8x128xf32>
    %142 = arith.negf %141 : vector<8x128xf32>
    %143 = math.exp %142 : vector<8x128xf32>
    %cst_59 = arith.constant 1.000000e+00 : f32
    %144 = vector.broadcast %cst_59 : f32 to vector<8x128xf32>
    %145 = arith.addf %144, %143 : vector<8x128xf32>
    %146 = arith.divf %144, %145 : vector<8x128xf32>
    %147 = vector.extract_strided_slice %134 {offsets = [0, 256], sizes = [8, 128], strides = [1, 1]} : vector<8x512xf32> to vector<8x128xf32>
    %148 = math.tanh %147 : vector<8x128xf32>
    %149 = vector.extract_strided_slice %134 {offsets = [0, 384], sizes = [8, 128], strides = [1, 1]} : vector<8x512xf32> to vector<8x128xf32>
    %150 = arith.negf %149 : vector<8x128xf32>
    %151 = math.exp %150 : vector<8x128xf32>
    %cst_60 = arith.constant 1.000000e+00 : f32
    %152 = vector.broadcast %cst_60 : f32 to vector<8x128xf32>
    %153 = arith.addf %152, %151 : vector<8x128xf32>
    %154 = arith.divf %152, %153 : vector<8x128xf32>
    %155 = arith.mulf %146, %128 : vector<8x128xf32>
    %156 = arith.mulf %140, %148 : vector<8x128xf32>
    %157 = arith.addf %155, %156 : vector<8x128xf32>
    %158 = math.tanh %157 : vector<8x128xf32>
    %159 = arith.mulf %154, %158 : vector<8x128xf32>
    %c32 = arith.constant 32 : index
    %c0_61 = arith.constant 0 : index
    %160 = vector.load %arg16[%c32, %c0_61] : memref<64x512xf32, #tpu.memory_space<vmem>>, vector<8x512xf32>
    %c0_62 = arith.constant 0 : index
    %c0_63 = arith.constant 0 : index
    %161 = vector.load %arg9[%c0_62, %c0_63] : memref<128x512xf32, #tpu.memory_space<vmem>>, vector<128x512xf32>
    %cst_64 = arith.constant dense<0.000000e+00> : vector<8x512xf32>
    %162 = tpu.matmul %159, %161, %cst_64 {dimension_numbers = #tpu.dot_dimension_numbers<[1], [0], [0], [1], [0, 0, 1, 1], [], []>} : vector<8x128xf32>, vector<128x512xf32>, vector<8x512xf32> -> vector<8x512xf32>
    %163 = arith.addf %160, %162 : vector<8x512xf32>
    %164 = vector.extract_strided_slice %163 {offsets = [0, 0], sizes = [8, 128], strides = [1, 1]} : vector<8x512xf32> to vector<8x128xf32>
    %165 = arith.negf %164 : vector<8x128xf32>
    %166 = math.exp %165 : vector<8x128xf32>
    %cst_65 = arith.constant 1.000000e+00 : f32
    %167 = vector.broadcast %cst_65 : f32 to vector<8x128xf32>
    %168 = arith.addf %167, %166 : vector<8x128xf32>
    %169 = arith.divf %167, %168 : vector<8x128xf32>
    %170 = vector.extract_strided_slice %163 {offsets = [0, 128], sizes = [8, 128], strides = [1, 1]} : vector<8x512xf32> to vector<8x128xf32>
    %171 = arith.negf %170 : vector<8x128xf32>
    %172 = math.exp %171 : vector<8x128xf32>
    %cst_66 = arith.constant 1.000000e+00 : f32
    %173 = vector.broadcast %cst_66 : f32 to vector<8x128xf32>
    %174 = arith.addf %173, %172 : vector<8x128xf32>
    %175 = arith.divf %173, %174 : vector<8x128xf32>
    %176 = vector.extract_strided_slice %163 {offsets = [0, 256], sizes = [8, 128], strides = [1, 1]} : vector<8x512xf32> to vector<8x128xf32>
    %177 = math.tanh %176 : vector<8x128xf32>
    %178 = vector.extract_strided_slice %163 {offsets = [0, 384], sizes = [8, 128], strides = [1, 1]} : vector<8x512xf32> to vector<8x128xf32>
    %179 = arith.negf %178 : vector<8x128xf32>
    %180 = math.exp %179 : vector<8x128xf32>
    %cst_67 = arith.constant 1.000000e+00 : f32
    %181 = vector.broadcast %cst_67 : f32 to vector<8x128xf32>
    %182 = arith.addf %181, %180 : vector<8x128xf32>
    %183 = arith.divf %181, %182 : vector<8x128xf32>
    %184 = arith.mulf %175, %157 : vector<8x128xf32>
    %185 = arith.mulf %169, %177 : vector<8x128xf32>
    %186 = arith.addf %184, %185 : vector<8x128xf32>
    %187 = math.tanh %186 : vector<8x128xf32>
    %188 = arith.mulf %183, %187 : vector<8x128xf32>
    %c40 = arith.constant 40 : index
    %c0_68 = arith.constant 0 : index
    %189 = vector.load %arg16[%c40, %c0_68] : memref<64x512xf32, #tpu.memory_space<vmem>>, vector<8x512xf32>
    %c0_69 = arith.constant 0 : index
    %c0_70 = arith.constant 0 : index
    %190 = vector.load %arg9[%c0_69, %c0_70] : memref<128x512xf32, #tpu.memory_space<vmem>>, vector<128x512xf32>
    %cst_71 = arith.constant dense<0.000000e+00> : vector<8x512xf32>
    %191 = tpu.matmul %188, %190, %cst_71 {dimension_numbers = #tpu.dot_dimension_numbers<[1], [0], [0], [1], [0, 0, 1, 1], [], []>} : vector<8x128xf32>, vector<128x512xf32>, vector<8x512xf32> -> vector<8x512xf32>
    %192 = arith.addf %189, %191 : vector<8x512xf32>
    %193 = vector.extract_strided_slice %192 {offsets = [0, 0], sizes = [8, 128], strides = [1, 1]} : vector<8x512xf32> to vector<8x128xf32>
    %194 = arith.negf %193 : vector<8x128xf32>
    %195 = math.exp %194 : vector<8x128xf32>
    %cst_72 = arith.constant 1.000000e+00 : f32
    %196 = vector.broadcast %cst_72 : f32 to vector<8x128xf32>
    %197 = arith.addf %196, %195 : vector<8x128xf32>
    %198 = arith.divf %196, %197 : vector<8x128xf32>
    %199 = vector.extract_strided_slice %192 {offsets = [0, 128], sizes = [8, 128], strides = [1, 1]} : vector<8x512xf32> to vector<8x128xf32>
    %200 = arith.negf %199 : vector<8x128xf32>
    %201 = math.exp %200 : vector<8x128xf32>
    %cst_73 = arith.constant 1.000000e+00 : f32
    %202 = vector.broadcast %cst_73 : f32 to vector<8x128xf32>
    %203 = arith.addf %202, %201 : vector<8x128xf32>
    %204 = arith.divf %202, %203 : vector<8x128xf32>
    %205 = vector.extract_strided_slice %192 {offsets = [0, 256], sizes = [8, 128], strides = [1, 1]} : vector<8x512xf32> to vector<8x128xf32>
    %206 = math.tanh %205 : vector<8x128xf32>
    %207 = vector.extract_strided_slice %192 {offsets = [0, 384], sizes = [8, 128], strides = [1, 1]} : vector<8x512xf32> to vector<8x128xf32>
    %208 = arith.negf %207 : vector<8x128xf32>
    %209 = math.exp %208 : vector<8x128xf32>
    %cst_74 = arith.constant 1.000000e+00 : f32
    %210 = vector.broadcast %cst_74 : f32 to vector<8x128xf32>
    %211 = arith.addf %210, %209 : vector<8x128xf32>
    %212 = arith.divf %210, %211 : vector<8x128xf32>
    %213 = arith.mulf %204, %186 : vector<8x128xf32>
    %214 = arith.mulf %198, %206 : vector<8x128xf32>
    %215 = arith.addf %213, %214 : vector<8x128xf32>
    %216 = math.tanh %215 : vector<8x128xf32>
    %217 = arith.mulf %212, %216 : vector<8x128xf32>
    %c48 = arith.constant 48 : index
    %c0_75 = arith.constant 0 : index
    %218 = vector.load %arg16[%c48, %c0_75] : memref<64x512xf32, #tpu.memory_space<vmem>>, vector<8x512xf32>
    %c0_76 = arith.constant 0 : index
    %c0_77 = arith.constant 0 : index
    %219 = vector.load %arg9[%c0_76, %c0_77] : memref<128x512xf32, #tpu.memory_space<vmem>>, vector<128x512xf32>
    %cst_78 = arith.constant dense<0.000000e+00> : vector<8x512xf32>
    %220 = tpu.matmul %217, %219, %cst_78 {dimension_numbers = #tpu.dot_dimension_numbers<[1], [0], [0], [1], [0, 0, 1, 1], [], []>} : vector<8x128xf32>, vector<128x512xf32>, vector<8x512xf32> -> vector<8x512xf32>
    %221 = arith.addf %218, %220 : vector<8x512xf32>
    %222 = vector.extract_strided_slice %221 {offsets = [0, 0], sizes = [8, 128], strides = [1, 1]} : vector<8x512xf32> to vector<8x128xf32>
    %223 = arith.negf %222 : vector<8x128xf32>
    %224 = math.exp %223 : vector<8x128xf32>
    %cst_79 = arith.constant 1.000000e+00 : f32
    %225 = vector.broadcast %cst_79 : f32 to vector<8x128xf32>
    %226 = arith.addf %225, %224 : vector<8x128xf32>
    %227 = arith.divf %225, %226 : vector<8x128xf32>
    %228 = vector.extract_strided_slice %221 {offsets = [0, 128], sizes = [8, 128], strides = [1, 1]} : vector<8x512xf32> to vector<8x128xf32>
    %229 = arith.negf %228 : vector<8x128xf32>
    %230 = math.exp %229 : vector<8x128xf32>
    %cst_80 = arith.constant 1.000000e+00 : f32
    %231 = vector.broadcast %cst_80 : f32 to vector<8x128xf32>
    %232 = arith.addf %231, %230 : vector<8x128xf32>
    %233 = arith.divf %231, %232 : vector<8x128xf32>
    %234 = vector.extract_strided_slice %221 {offsets = [0, 256], sizes = [8, 128], strides = [1, 1]} : vector<8x512xf32> to vector<8x128xf32>
    %235 = math.tanh %234 : vector<8x128xf32>
    %236 = vector.extract_strided_slice %221 {offsets = [0, 384], sizes = [8, 128], strides = [1, 1]} : vector<8x512xf32> to vector<8x128xf32>
    %237 = arith.negf %236 : vector<8x128xf32>
    %238 = math.exp %237 : vector<8x128xf32>
    %cst_81 = arith.constant 1.000000e+00 : f32
    %239 = vector.broadcast %cst_81 : f32 to vector<8x128xf32>
    %240 = arith.addf %239, %238 : vector<8x128xf32>
    %241 = arith.divf %239, %240 : vector<8x128xf32>
    %242 = arith.mulf %233, %215 : vector<8x128xf32>
    %243 = arith.mulf %227, %235 : vector<8x128xf32>
    %244 = arith.addf %242, %243 : vector<8x128xf32>
    %245 = math.tanh %244 : vector<8x128xf32>
    %246 = arith.mulf %241, %245 : vector<8x128xf32>
    %c56 = arith.constant 56 : index
    %c0_82 = arith.constant 0 : index
    %247 = vector.load %arg16[%c56, %c0_82] : memref<64x512xf32, #tpu.memory_space<vmem>>, vector<8x512xf32>
    %c0_83 = arith.constant 0 : index
    %c0_84 = arith.constant 0 : index
    %248 = vector.load %arg9[%c0_83, %c0_84] : memref<128x512xf32, #tpu.memory_space<vmem>>, vector<128x512xf32>
    %cst_85 = arith.constant dense<0.000000e+00> : vector<8x512xf32>
    %249 = tpu.matmul %246, %248, %cst_85 {dimension_numbers = #tpu.dot_dimension_numbers<[1], [0], [0], [1], [0, 0, 1, 1], [], []>} : vector<8x128xf32>, vector<128x512xf32>, vector<8x512xf32> -> vector<8x512xf32>
    %250 = arith.addf %247, %249 : vector<8x512xf32>
    %251 = vector.extract_strided_slice %250 {offsets = [0, 0], sizes = [8, 128], strides = [1, 1]} : vector<8x512xf32> to vector<8x128xf32>
    %252 = arith.negf %251 : vector<8x128xf32>
    %253 = math.exp %252 : vector<8x128xf32>
    %cst_86 = arith.constant 1.000000e+00 : f32
    %254 = vector.broadcast %cst_86 : f32 to vector<8x128xf32>
    %255 = arith.addf %254, %253 : vector<8x128xf32>
    %256 = arith.divf %254, %255 : vector<8x128xf32>
    %257 = vector.extract_strided_slice %250 {offsets = [0, 128], sizes = [8, 128], strides = [1, 1]} : vector<8x512xf32> to vector<8x128xf32>
    %258 = arith.negf %257 : vector<8x128xf32>
    %259 = math.exp %258 : vector<8x128xf32>
    %cst_87 = arith.constant 1.000000e+00 : f32
    %260 = vector.broadcast %cst_87 : f32 to vector<8x128xf32>
    %261 = arith.addf %260, %259 : vector<8x128xf32>
    %262 = arith.divf %260, %261 : vector<8x128xf32>
    %263 = vector.extract_strided_slice %250 {offsets = [0, 256], sizes = [8, 128], strides = [1, 1]} : vector<8x512xf32> to vector<8x128xf32>
    %264 = math.tanh %263 : vector<8x128xf32>
    %265 = vector.extract_strided_slice %250 {offsets = [0, 384], sizes = [8, 128], strides = [1, 1]} : vector<8x512xf32> to vector<8x128xf32>
    %266 = arith.negf %265 : vector<8x128xf32>
    %267 = math.exp %266 : vector<8x128xf32>
    %cst_88 = arith.constant 1.000000e+00 : f32
    %268 = vector.broadcast %cst_88 : f32 to vector<8x128xf32>
    %269 = arith.addf %268, %267 : vector<8x128xf32>
    %270 = arith.divf %268, %269 : vector<8x128xf32>
    %271 = arith.mulf %262, %244 : vector<8x128xf32>
    %272 = arith.mulf %256, %264 : vector<8x128xf32>
    %273 = arith.addf %271, %272 : vector<8x128xf32>
    %274 = math.tanh %273 : vector<8x128xf32>
    %275 = arith.mulf %270, %274 : vector<8x128xf32>
    %c0_89 = arith.constant 0 : index
    %c0_90 = arith.constant 0 : index
    %276 = vector.load %arg11[%c0_89, %c0_90] : memref<128x128xf32, #tpu.memory_space<vmem>>, vector<128x128xf32>
    %cst_91 = arith.constant dense<0.000000e+00> : vector<8x128xf32>
    %277 = tpu.matmul %275, %276, %cst_91 {dimension_numbers = #tpu.dot_dimension_numbers<[1], [0], [0], [1], [0, 0, 1, 1], [], []>} : vector<8x128xf32>, vector<128x128xf32>, vector<8x128xf32> -> vector<8x128xf32>
    %c0_92 = arith.constant 0 : index
    %c0_93 = arith.constant 0 : index
    %278 = vector.load %arg12[%c0_92, %c0_93] : memref<1x128xf32, #tpu.memory_space<vmem>>, vector<1x128xf32>
    %279 = vector.broadcast %278 : vector<1x128xf32> to vector<8x128xf32>
    %280 = arith.addf %277, %279 : vector<8x128xf32>
    %cst_94 = arith.constant 0.000000e+00 : f32
    %281 = vector.broadcast %cst_94 : f32 to vector<8x128xf32>
    %282 = arith.maximumf %280, %281 : vector<8x128xf32>
    %c0_95 = arith.constant 0 : index
    %c0_96 = arith.constant 0 : index
    %283 = vector.load %arg13[%c0_95, %c0_96] : memref<128x1xf32, #tpu.memory_space<vmem>>, vector<128x1xf32>
    %cst_97 = arith.constant dense<0.000000e+00> : vector<8x1xf32>
    %284 = tpu.matmul %282, %283, %cst_97 {dimension_numbers = #tpu.dot_dimension_numbers<[1], [0], [0], [1], [0, 0, 1, 1], [], []>} : vector<8x128xf32>, vector<128x1xf32>, vector<8x1xf32> -> vector<8x1xf32>
    %c0_98 = arith.constant 0 : index
    %c0_99 = arith.constant 0 : index
    %285 = vector.load %arg14[%c0_98, %c0_99] : memref<1x1xf32, #tpu.memory_space<vmem>>, vector<1x1xf32>
    %286 = vector.broadcast %285 : vector<1x1xf32> to vector<8x1xf32>
    %287 = arith.addf %284, %286 : vector<8x1xf32>
    %c0_100 = arith.constant 0 : index
    %c0_101 = arith.constant 0 : index
    %288 = vector.load %arg15[%c0_100, %c0_101] : memref<8x1xf32, #tpu.memory_space<vmem>>, vector<8x1xf32>
    tpu.vector_store %arg15[%c0_100, %c0_101], %287 {strides = array<i32>} : memref<8x1xf32, #tpu.memory_space<vmem>>, vector<8x1xf32>,
    return
  }
}

</mosaic_0001>

<bundles_post_ra>
// kernel: tpu_custom_call.1
= control target key start
LH: loop header
LB: loop body
LE: loop exit
PB: predicated region body
PF: predicated region fallthrough
CT: control target
= control target key end

     0   :  { %s3521_s0 = inlined_call_operand.vmem [shape: f32[64,16], index: 0, kind: input, shape index: {}]   ;;  %s3522_s1 = inlined_call_operand.vmem [shape: f32[16,128], index: 1, kind: input, shape index: {}]   ;;  %s3523_s2 = inlined_call_operand.vmem [shape: f32[1,128], index: 2, kind: input, shape index: {}]   ;;  %s3524_s3 = inlined_call_operand.vmem [shape: f32[1,128], index: 3, kind: input, shape index: {}]   ;;  %s3525_s4 = inlined_call_operand.vmem [shape: f32[1,128], index: 4, kind: input, shape index: {}]   ;;  %s3526_s5 = inlined_call_operand.vmem [shape: f32[1,128], index: 5, kind: input, shape index: {}]   ;;  %s3527_s6 = inlined_call_operand.vmem [shape: f32[128,128], index: 6, kind: input, shape index: {}]   ;;  %s3528_s7 = inlined_call_operand.vmem [shape: f32[1,128], index: 7, kind: input, shape index: {}]   ;;  %s3529_s8 = inlined_call_operand.hbm [shape: f32[128,512], index: 8, kind: input, shape index: {}]   ;;  %s3530_s9 = inlined_call_operand.hbm [shape: f32[128,512], index: 9, kind: input, shape index: {}]   ;;  %s3531_s10 = inlined_call_operand.vmem [shape: f32[1,512], index: 10, kind: input, shape index: {}]   ;;  %s3532_s11 = inlined_call_operand.hbm [shape: f32[128,128], index: 11, kind: input, shape index: {}]   ;;  %s3533_s12 = inlined_call_operand.vmem [shape: f32[1,128], index: 12, kind: input, shape index: {}]   ;;  %s3534_s13 = inlined_call_operand.vmem [shape: f32[128,1], index: 13, kind: input, shape index: {}]   ;;  %s3535_s14 = inlined_call_operand.<no memory space> [shape: f32[1,1], index: 14, kind: input, shape index: {}]   ;;  %s3536_s15 = inlined_call_operand.vmem [shape: f32[8,1], index: 15, kind: output, shape index: {}]  }
   0x1   :  { %v20_v0 = vstv %s3535_s14 }
   0x2   :  { %21 = vst [vmem:[#allocation3] sm:$0x1] %v20_v0 }
   0x3   :  { %22 = vsyncpa [#allocation5], 0 }
   0x4   :  { %23 = vsyncpa [#allocation7], 0  ;;  %s57_s22 = sshll.u32 %s3530_s9, 4  ;;  %s2279_s23 = smov [#allocation6]   ;;  %s58_s22 = int_to_ptr.hbm [resolvable:$true] %s57_s22 }
   0x5   :  { %s59_s24 = sshll.u32 %s2279_s23, 4  ;;  %s44_s27 = sshll.u32 %s3529_s8, 4  ;;  %s60_s24 = int_to_ptr.vmem [resolvable:$true] %s59_s24  ;;  %s45_s27 = int_to_ptr.hbm [resolvable:$true] %s44_s27 }
   0x6   :  { %s2280_s28 = smov 512   ;;  %s2281_s29 = smov 32  }
   0x7   :  { %65 = dma.hbm_to_vmem [thread:$0]  %s58_s22, 8192, %s60_s24, [#allocation7], %s2280_s28, %s2280_s28, %s2281_s29  }
   0x8   :  { %s2282_s14 = smov [#allocation4]   ;;  %s72_s18 = sshll.u32 %s3532_s11, 4  ;;  %s73_s18 = int_to_ptr.hbm [resolvable:$true] %s72_s18 }
   0x9   :  { %s46_s30 = sshll.u32 %s2282_s14, 4  ;;  %s2283_s9 = smov [#allocation8]   ;;  %s47_s30 = int_to_ptr.vmem [resolvable:$true] %s46_s30 }
   0xa   :  { %52 = dma.hbm_to_vmem [thread:$0]  %s45_s27, 8192, %s47_s30, [#allocation5], %s2280_s28, %s2280_s28, %s2281_s29  }
   0xb   :  { %s74_s19 = sshll.u32 %s2283_s9, 4  ;;  %s2284_s20 = smov 128   ;;  %s75_s19 = int_to_ptr.vmem [resolvable:$true] %s74_s19 }
   0xc   :  { %s2285_s21 = smov 8  }
   0xd   :  { %80 = dma.hbm_to_vmem [thread:$0]  %s73_s18, 2048, %s75_s19, [#allocation7], %s2284_s20, %s2284_s20, %s2285_s21  }
   0xe   :  { %2275 = dma.done.wait [#allocation5], 8192  }
   0xf   :  { %2276 = vsyncadd [#allocation5], 4294959104 }
  0x10   :  { %2277 = dma.done.wait [#allocation7], 10240  }
  0x11   :  { %2278 = vsyncadd [#allocation7], 4294957056  ;;  %v108_v1 = vld [vmem:[%s3522_s1 + $0x8] sm:$0xff]  ;;  %v107_v2 = vld [vmem:[%s3522_s1] sm:$0xff]  ;;  %vm109_vm0 = vcmask 130048   ;;  %v2286_v40 = vmov 0  }
  0x12   :  { %148 = vmatpush.msra.mxu0 %v108_v1  ;;  %v99_v3 = vld [vmem:[%s3521_s0] sm:$0xff]  ;;  %v100_v4 = vld [vmem:[%s3521_s0 + $0x8] sm:$0xff]  ;;  %v101_v5 = vld [vmem:[%s3521_s0 + $0x10] sm:$0xff] }
  0x13   :  { %v102_v6 = vld [vmem:[%s3521_s0 + $0x18] sm:$0xff]  ;;  %v277_v8 = vld [vmem:[%s3527_s6 + $0x70] sm:$0xff]  ;;  %v276_v9 = vld [vmem:[%s3527_s6 + $0x68] sm:$0xff] }
  0x14   :  { %149 = vmatpush.msra.mxu0 %v107_v2  ;;  %v278_v7 = vld [vmem:[%s3527_s6 + $0x78] sm:$0xff]  ;;  %v275_v10 = vld [vmem:[%s3527_s6 + $0x60] sm:$0xff]  ;;  %v273_v13 = vld [vmem:[%s3527_s6 + $0x50] sm:$0xff] }
  0x15   :  { %1963 = vmatmul.msk.f32.vlgmr.msra.gmra.mxu0 %vm109_vm0, %v99_v3  ;;  %283 = vmatpush.msra.mxu1 %v278_v7  ;;  %v103_v11 = vld [vmem:[%s3521_s0 + $0x20] sm:$0xff]  ;;  %v274_v12 = vld [vmem:[%s3527_s6 + $0x58] sm:$0xff]  ;;  %v272_v14 = vld [vmem:[%s3527_s6 + $0x48] sm:$0xff] }
  0x16   :  { %v271_v15 = vld [vmem:[%s3527_s6 + $0x40] sm:$0xff]  ;;  %v104_v16 = vld [vmem:[%s3521_s0 + $0x28] sm:$0xff]  ;;  %v270_v17 = vld [vmem:[%s3527_s6 + $0x38] sm:$0xff] }
  0x17   :  { %284 = vmatpush.msra.mxu1 %v277_v8  ;;  %v269_v18 = vld [vmem:[%s3527_s6 + $0x30] sm:$0xff]  ;;  %v106_v20 = vld [vmem:[%s3521_s0 + $0x38] sm:$0xff]  ;;  %v268_v21 = vld [vmem:[%s3527_s6 + $0x28] sm:$0xff] }
  0x18   :  { %v105_v19 = vld [vmem:[%s3521_s0 + $0x30] sm:$0xff]  ;;  %v2005_v22 = vld [vmem:[%s3524_s3] ss:$0 sm:$0xff]  ;;  %v266_v24 = vld [vmem:[%s3527_s6 + $0x18] sm:$0xff] }
  0x19   :  { %285 = vmatpush.msra.mxu1 %v276_v9  ;;  %v267_v23 = vld [vmem:[%s3527_s6 + $0x20] sm:$0xff]  ;;  %2009 = vrcp.f32 %v2005_v22  ;;  %v265_v25 = vld [vmem:[%s3527_s6 + $0x10] sm:$0xff]  ;;  %v264_v26 = vld [vmem:[%s3527_s6 + $0x8] sm:$0xff]  ;;  %vm196_vm1 = vweird.f32 %v2005_v22  ;;  %v202_v32 = vand.u32 2147483648, %v2005_v22  ;;  %v200_v34 = vand.u32 2147483647, %v2005_v22 }
  0x1a   :  { %v263_v27 = vld [vmem:[%s3527_s6] sm:$0xff]  ;;  %v333_v52 = vld [vmem:[#allocation4 + $0x8] sm:$0xff] }
  0x1b   :  { %286 = vmatpush.msra.mxu1 %v275_v10  ;;  %v239_v35 = vld [vmem:[%s3526_s5] sm:$0x1]  ;;  %v203_v37 = vor.u32 1.1754944e-38, %v202_v32  ;;  %vm201_vm5 = vcmp.eq.f32.partialorder %v200_v34, 8.507059e+37  ;;  %v381_v34 = vld [vmem:[#allocation4 + $0x188] sm:$0xff]  ;;  %v332_v50 = vld [vmem:[#allocation4] sm:$0xff] }
  0x1c   :  { %v237_v36 = vld [vmem:[%s3525_s4] sm:$0x1]  ;;  %vm240_vm4 = vcmp.gt.f32.partialorder %v239_v35, 0.5 }
  0x1d   :  { %1964 = vmatmul.msk.f32.gmra.mxu0 %vm109_vm0, %v100_v4  ;;  %287 = vmatpush.msra.mxu1 %v274_v12  ;;  %v2478_v38 = vld [vmem:[%s3523_s2] ss:$0 sm:$0xff]  ;;  %vm238_vm6 = vcmp.gt.f32.partialorder %v237_v36, 0.5  ;;  %v241_v41 = vsel %vm240_vm4, 1, %v2286_v40 }
  0x1e   :  { %v252_v44 = vsel %vm238_vm6, 1, %v2286_v40  ;;  %v242_v46 = vperm.slane %v241_v41, 0  ;;  %v383_v41 = vld [vmem:[#allocation4 + $0x198] sm:$0xff] }
  0x1f   :  { %288 = vmatpush.msra.mxu1 %v273_v13  ;;  %v2010_v28 = vpop.eup %2009  ;;  %v253_v48 = vperm.slane %v252_v44, 0 }
  0x20   :  { %v192_v29 = vmul.f32 %v2010_v28, %v2005_v22  ;;  %vm197_vm2 = vweird.f32 %v2010_v28  ;;  %vm2484_vm7 = vcmp.eq.s32.totalorder %v242_v46, 1  ;;  %v395_v22 = vld [vmem:[#allocation4 + $0x1f8] sm:$0xff]  ;;  %v378_v46 = vld [vmem:[#allocation4 + $0x170] sm:$0xff] }
  0x21   :  { %289 = vmatpush.msra.mxu1 %v272_v14  ;;  %vm198_vm3 = vmor %vm196_vm1, %vm197_vm2  ;;  %vm2488_vm8 = vcmp.eq.s32.totalorder %v253_v48, 1  ;;  %v379_v48 = vld [vmem:[#allocation4 + $0x178] sm:$0xff] }
  0x22   :  { %v193_v30 = vsub.f32 1.0, %v192_v29  ;;  %v385_v29 = vld [vmem:[#allocation4 + $0x1a8] sm:$0xff] }
  0x23   :  { %290 = vmatpush.msra.mxu1 %v271_v15 }
  0x24   :  { %v194_v31 = vmul.f32 %v2010_v28, %v193_v30  ;;  %v386_v30 = vld [vmem:[#allocation4 + $0x1b0] sm:$0xff] }
  0x25   :  { %1965 = vmatmul.msk.f32.gmra.mxu0 %vm109_vm0, %v101_v5  ;;  %291 = vmatpush.msra.mxu1 %v270_v17 }
  0x26   :  { %v195_v33 = vadd.f32 %v2010_v28, %v194_v31  ;;  %v387_v31 = vld [vmem:[#allocation4 + $0x1b8] sm:$0xff] }
  0x27   :  { %292 = vmatpush.msra.mxu1 %v269_v18 }
  0x28   :  { %v199_v39 = vsel %vm198_vm3, %v2010_v28, %v195_v33  ;;  %v384_v28 = vld [vmem:[#allocation4 + $0x1a0] sm:$0xff] }
  0x29   :  { %293 = vmatpush.msra.mxu1 %v268_v21  ;;  %v2480_v43 = vsel %vm201_vm5, %v203_v37, %v199_v39  ;;  %v394_v21 = vld [vmem:[#allocation4 + $0x1f0] sm:$0xff]  ;;  %v380_v33 = vld [vmem:[#allocation4 + $0x180] sm:$0xff] }
  0x2a   :  { %488 = vmatpush.msrb.mxu0 %v394_v21  ;;  %v382_v37 = vld [vmem:[#allocation4 + $0x190] sm:$0xff] }
  0x2b   :  { %294 = vmatpush.msra.mxu1 %v267_v23  ;;  %v388_v23 = vld [vmem:[#allocation4 + $0x1c0] sm:$0xff] }
  0x2d   :  { %1966 = vmatmul.msk.f32.gmra.mxu0 %vm109_vm0, %v102_v6  ;;  %295 = vmatpush.msra.mxu1 %v266_v24  ;;  %v389_v24 = vld [vmem:[#allocation4 + $0x1c8] sm:$0xff] }
  0x2f   :  { %296 = vmatpush.msra.mxu1 %v265_v25 }
  0x31   :  { %297 = vmatpush.msra.mxu1 %v264_v26  ;;  %v390_v26 = vld [vmem:[#allocation4 + $0x1d0] sm:$0xff] }
  0x32   :  { %489 = vmatpush.msrb.mxu0 %v390_v26  ;;  %v349_v26 = vld [vmem:[#allocation4 + $0x88] sm:$0xff] }
  0x33   :  { %298 = vmatpush.msra.mxu1 %v263_v27  ;;  %v391_v27 = vld [vmem:[#allocation4 + $0x1d8] sm:$0xff] }
  0x34   :  { %490 = vmatpush.msrb.mxu0 %v386_v30  ;;  %v344_v30 = vld [vmem:[#allocation4 + $0x60] sm:$0xff] }
  0x35   :  { %1967 = vmatmul.msk.f32.gmra.mxu0 %vm109_vm0, %v103_v11  ;;  %529 = vmatpush.msrb.mxu1 %v395_v22 }
  0x36   :  { %491 = vmatpush.msrb.mxu0 %v382_v37 }
  0x37   :  { %530 = vmatpush.msrb.mxu1 %v391_v27  ;;  %v350_v27 = vld [vmem:[#allocation4 + $0x90] sm:$0xff] }
  0x38   :  { %492 = vmatpush.msrb.mxu0 %v378_v46  ;;  %v338_v46 = vld [vmem:[#allocation4 + $0x30] sm:$0xff] }
  0x39   :  { %531 = vmatpush.msrb.mxu1 %v387_v31 }
  0x3b   :  { %532 = vmatpush.msrb.mxu1 %v383_v41  ;;  %v342_v41 = vld [vmem:[#allocation4 + $0x50] sm:$0xff] }
  0x3d   :  { %1968 = vmatmul.msk.f32.gmra.mxu0 %vm109_vm0, %v104_v16  ;;  %533 = vmatpush.msrb.mxu1 %v379_v48  ;;  %v334_v48 = vld [vmem:[#allocation4 + $0x10] sm:$0xff] }
  0x45   :  { %1969 = vmatmul.msk.f32.gmra.mxu0 %vm109_vm0, %v105_v19  ;;  %v392_v19 = vld [vmem:[#allocation4 + $0x1e0] sm:$0xff] }
  0x46   :  { %406 = vmatpush.msra.mxu2 %v392_v19  ;;  %v354_v19 = vld [vmem:[#allocation4 + $0xb0] sm:$0xff] }
  0x48   :  { %407 = vmatpush.msra.mxu2 %v388_v23  ;;  %v348_v23 = vld [vmem:[#allocation4 + $0x80] sm:$0xff] }
  0x4a   :  { %408 = vmatpush.msra.mxu2 %v384_v28 }
  0x4c   :  { %409 = vmatpush.msra.mxu2 %v380_v33  ;;  %v347_v33 = vld [vmem:[#allocation4 + $0x78] sm:$0xff] }
  0x4d   :  { %1970 = vmatmul.msk.f32.gmra.mxu0 %vm109_vm0, %v106_v20  ;;  %v393_v20 = vld [vmem:[#allocation4 + $0x1e8] sm:$0xff] }
  0x4e   :  { %447 = vmatpush.msra.mxu3 %v393_v20  ;;  %v355_v20 = vld [vmem:[#allocation4 + $0xb8] sm:$0xff] }
  0x50   :  { %448 = vmatpush.msra.mxu3 %v389_v24 }
  0x52   :  { %449 = vmatpush.msra.mxu3 %v385_v29  ;;  %v351_v29 = vld [vmem:[#allocation4 + $0x98] sm:$0xff] }
  0x54   :  { %450 = vmatpush.msra.mxu3 %v381_v34 }
  0x92   :  { %v151_v42 = vpop.f32.mrf.mxu0 }
  0x93   :  { %v179_v45 = vsub.f32 %v151_v42, %v2478_v38  ;;  %v376_v42 = vld [vmem:[#allocation4 + $0x160] sm:$0xff] }
  0x94   :  { %410 = vmatpush.msra.mxu2 %v376_v42  ;;  %v343_v42 = vld [vmem:[#allocation4 + $0x58] sm:$0xff] }
  0x95   :  { %v205_v47 = vmul.f32 %v2480_v43, %v179_v45  ;;  %v377_v45 = vld [vmem:[#allocation4 + $0x168] sm:$0xff] }
  0x96   :  { %451 = vmatpush.msra.mxu3 %v377_v45  ;;  %v337_v45 = vld [vmem:[#allocation4 + $0x28] sm:$0xff] }
  0x97   :  { %v221_v49 = vmax.f32 %v205_v47, 0.0  ;;  %v213_v53 = vmin.f32 %v205_v47, 1.0 }
  0x99   :  { %v229_v51 = vmin.f32 %v221_v49, 1.0 }
  0x9a   :  { %v154_v54 = vpop.f32.mrf.mxu0 }
  0x9b   :  { %v180_v55 = vsub.f32 %v154_v54, %v2478_v38  ;;  %v244_v56 = vsel %vm2484_vm7, %v221_v49, %v229_v51  ;;  %v372_v49 = vld [vmem:[#allocation4 + $0x140] sm:$0xff]  ;;  %v373_v51 = vld [vmem:[#allocation4 + $0x148] sm:$0xff] }
  0x9c   :  { %v255_v57 = vsel %vm2488_vm8, %v213_v53, %v244_v56  ;;  %v374_v53 = vld [vmem:[#allocation4 + $0x150] sm:$0xff]  ;;  %v368_v56 = vld [vmem:[#allocation4 + $0x120] sm:$0xff]  ;;  %411 = vmatpush.msra.mxu2 %v372_v49  ;;  %452 = vmatpush.msra.mxu3 %v373_v51  ;;  %v335_v49 = vld [vmem:[#allocation4 + $0x18] sm:$0xff] }
  0x9d   :  { %v206_v58 = vmul.f32 %v2480_v43, %v180_v55  ;;  %299 = vmatmul.f32.vlgmr.msra.gmra.mxu1 %v255_v57  ;;  %v375_v55 = vld [vmem:[#allocation4 + $0x158] sm:$0xff]  ;;  %v369_v57 = vld [vmem:[#allocation4 + $0x128] sm:$0xff]  ;;  %493 = vmatpush.msrb.mxu0 %v374_v53  ;;  %v2538_v51 = vld [vmem:[#allocation6 + $0x1e0] sm:$0xff] }
  0x9e   :  { %534 = vmatpush.msrb.mxu1 %v375_v55  ;;  %412 = vmatpush.msra.mxu2 %v368_v56  ;;  %v2540_v53 = vld [vmem:[#allocation6 + $0x1e8] sm:$0xff]  ;;  %v2554_v56 = vld [vmem:[#allocation6 + $0x1a0] sm:$0xff] }
  0x9f   :  { %v222_v59 = vmax.f32 %v206_v58, 0.0  ;;  %v214_v61 = vmin.f32 %v206_v58, 1.0  ;;  %v370_v58 = vld [vmem:[#allocation4 + $0x130] sm:$0xff]  ;;  %453 = vmatpush.msra.mxu3 %v369_v57  ;;  %v2548_v55 = vld [vmem:[#allocation6 + $0x1c8] sm:$0xff] }
  0xa0   :  { %494 = vmatpush.msrb.mxu0 %v370_v58  ;;  %v2556_v57 = vld [vmem:[#allocation6 + $0x1a8] sm:$0xff]  ;;  %v2562_v58 = vld [vmem:[#allocation6 + $0x180] sm:$0xff] }
  0xa1   :  { %v230_v60 = vmin.f32 %v222_v59, 1.0 }
  0xa2   :  { %v157_v62 = vpop.f32.mrf.mxu0 }
  0xa3   :  { %v181_v63 = vsub.f32 %v157_v62, %v2478_v38  ;;  %v245_v0 = vsel %vm2484_vm7, %v222_v59, %v230_v60  ;;  %v371_v60 = vld [vmem:[#allocation4 + $0x138] sm:$0xff] }
  0xa4   :  { %v256_v1 = vsel %vm2488_vm8, %v214_v61, %v245_v0  ;;  %v364_v61 = vld [vmem:[#allocation4 + $0x100] sm:$0xff]  ;;  %v365_v0 = vld [vmem:[#allocation4 + $0x108] sm:$0xff]  ;;  %535 = vmatpush.msrb.mxu1 %v371_v60 }
  0xa5   :  { %v207_v2 = vmul.f32 %v2480_v43, %v181_v63  ;;  %302 = vmatmul.f32.gmra.mxu1 %v256_v1  ;;  %413 = vmatpush.msra.mxu2 %v364_v61  ;;  %v2570_v60 = vld [vmem:[#allocation6 + $0x160] sm:$0xff]  ;;  %v2572_v61 = vld [vmem:[#allocation6 + $0x168] sm:$0xff] }
  0xa6   :  { %454 = vmatpush.msra.mxu3 %v365_v0  ;;  %v2584_v0 = vld [vmem:[#allocation6 + $0x120] sm:$0xff] }
  0xa7   :  { %v223_v3 = vmax.f32 %v207_v2, 0.0  ;;  %v215_v5 = vmin.f32 %v207_v2, 1.0 }
  0xa9   :  { %v231_v4 = vmin.f32 %v223_v3, 1.0 }
  0xaa   :  { %v160_v6 = vpop.f32.mrf.mxu0 }
  0xab   :  { %v182_v7 = vsub.f32 %v160_v6, %v2478_v38  ;;  %v246_v8 = vsel %vm2484_vm7, %v223_v3, %v231_v4  ;;  %v366_v3 = vld [vmem:[#allocation4 + $0x110] sm:$0xff]  ;;  %v367_v4 = vld [vmem:[#allocation4 + $0x118] sm:$0xff]  ;;  %v360_v6 = vld [vmem:[#allocation4 + $0xe0] sm:$0xff] }
  0xac   :  { %v257_v9 = vsel %vm2488_vm8, %v215_v5, %v246_v8  ;;  %495 = vmatpush.msrb.mxu0 %v366_v3  ;;  %536 = vmatpush.msrb.mxu1 %v367_v4  ;;  %v2597_v3 = vld [vmem:[#allocation6 + $0x100] sm:$0xff]  ;;  %v2599_v4 = vld [vmem:[#allocation6 + $0x108] sm:$0xff] }
  0xad   :  { %v208_v10 = vmul.f32 %v2480_v43, %v182_v7  ;;  %305 = vmatmul.f32.gmra.mxu1 %v257_v9  ;;  %v361_v7 = vld [vmem:[#allocation4 + $0xe8] sm:$0xff]  ;;  %v362_v9 = vld [vmem:[#allocation4 + $0xf0] sm:$0xff]  ;;  %414 = vmatpush.msra.mxu2 %v360_v6  ;;  %3631 = vst [vmem:[#allocation11_spill] sm:$0xff] %v2599_v4 }
  0xae   :  { %455 = vmatpush.msra.mxu3 %v361_v7  ;;  %496 = vmatpush.msrb.mxu0 %v362_v9  ;;  %v2607_v6 = vld [vmem:[#allocation6 + $0xe8] sm:$0xff]  ;;  %v2614_v9 = vld [vmem:[#allocation6 + $0xc0] sm:$0xff] }
  0xaf   :  { %v224_v11 = vmax.f32 %v208_v10, 0.0  ;;  %v216_v13 = vmin.f32 %v208_v10, 1.0  ;;  %v363_v10 = vld [vmem:[#allocation4 + $0xf8] sm:$0xff] }
  0xb0   :  { %537 = vmatpush.msrb.mxu1 %v363_v10  ;;  %v2616_v10 = vld [vmem:[#allocation6 + $0xc8] sm:$0xff] }
  0xb1   :  { %v232_v12 = vmin.f32 %v224_v11, 1.0  ;;  %3633 = vst [vmem:[#allocation13_spill] sm:$0xff] %v2616_v10 }
  0xb2   :  { %v163_v14 = vpop.f32.mrf.mxu0 }
  0xb3   :  { %v183_v15 = vsub.f32 %v163_v14, %v2478_v38  ;;  %v247_v16 = vsel %vm2484_vm7, %v224_v11, %v232_v12  ;;  %v356_v11 = vld [vmem:[#allocation4 + $0xc0] sm:$0xff]  ;;  %v357_v12 = vld [vmem:[#allocation4 + $0xc8] sm:$0xff]  ;;  %v358_v14 = vld [vmem:[#allocation4 + $0xd0] sm:$0xff] }
  0xb4   :  { %v258_v17 = vsel %vm2488_vm8, %v216_v13, %v247_v16  ;;  %v352_v16 = vld [vmem:[#allocation4 + $0xa0] sm:$0xff]  ;;  %415 = vmatpush.msra.mxu2 %v356_v11  ;;  %456 = vmatpush.msra.mxu3 %v357_v12 }
  0xb5   :  { %v209_v18 = vmul.f32 %v2480_v43, %v183_v15  ;;  %308 = vmatmul.f32.gmra.mxu1 %v258_v17  ;;  %v359_v15 = vld [vmem:[#allocation4 + $0xd8] sm:$0xff]  ;;  %v353_v17 = vld [vmem:[#allocation4 + $0xa8] sm:$0xff]  ;;  %497 = vmatpush.msrb.mxu0 %v358_v14  ;;  %v2622_v12 = vld [vmem:[#allocation6 + $0xa0] sm:$0xff] }
  0xb6   :  { %538 = vmatpush.msrb.mxu1 %v359_v15  ;;  %416 = vmatpush.msra.mxu2 %v352_v16  ;;  %3634 = vst [vmem:[#allocation14_spill] sm:$0xff] %v2622_v12  ;;  %v2630_v14 = vld [vmem:[#allocation6 + $0x80] sm:$0xff]  ;;  %v2632_v15 = vld [vmem:[#allocation6 + $0x88] sm:$0xff] }
  0xb7   :  { %v225_v25 = vmax.f32 %v209_v18, 0.0  ;;  %v217_v35 = vmin.f32 %v209_v18, 1.0  ;;  %457 = vmatpush.msra.mxu3 %v353_v17  ;;  %498 = vmatpush.msrb.mxu0 %v354_v19  ;;  %3635 = vst [vmem:[#allocation15_spill] sm:$0xff] %v2630_v14  ;;  %v2634_v16 = vld [vmem:[#allocation6 + $0x60] sm:$0xff]  ;;  %v2636_v17 = vld [vmem:[#allocation6 + $0x68] sm:$0xff] }
  0xb8   :  { %539 = vmatpush.msrb.mxu1 %v355_v20  ;;  %417 = vmatpush.msra.mxu2 %v348_v23  ;;  %3636 = vst [vmem:[#allocation16_spill] sm:$0xff] %v2632_v15  ;;  %v2645_v20 = vld [vmem:[#allocation6 + $0x40] sm:$0xff] }
  0xb9   :  { %v233_v32 = vmin.f32 %v225_v25, 1.0  ;;  %458 = vmatpush.msra.mxu3 %v349_v26  ;;  %499 = vmatpush.msrb.mxu0 %v350_v27  ;;  %3637 = vst [vmem:[#allocation17_spill] sm:$0xff] %v2634_v16  ;;  %v2653_v23 = vld [vmem:[#allocation6 + $0x20] sm:$0xff]  ;;  %v2661_v26 = vld [vmem:[#allocation6 + $0x8] sm:$0xff]  ;;  %v2665_v27 = vld [vmem:[#allocation6 + $0x1f0] sm:$0xff] }
  0xba   :  { %v166_v36 = vpop.f32.mrf.mxu0  ;;  %540 = vmatpush.msrb.mxu1 %v351_v29  ;;  %418 = vmatpush.msra.mxu2 %v344_v30  ;;  %3638 = vst [vmem:[#allocation18_spill] sm:$0xff] %v2636_v17 }
  0xbb   :  { %v184_v39 = vsub.f32 %v166_v36, %v2478_v38  ;;  %v248_v40 = vsel %vm2484_vm7, %v225_v25, %v233_v32  ;;  %v345_v32 = vld [vmem:[#allocation4 + $0x68] sm:$0xff]  ;;  %3639 = vst [vmem:[#allocation19_spill] sm:$0xff] %v2645_v20 }
  0xbc   :  { %v259_v44 = vsel %vm2488_vm8, %v217_v35, %v248_v40  ;;  %459 = vmatpush.msra.mxu3 %v345_v32  ;;  %541 = vmatpush.msrb.mxu1 %v347_v33  ;;  %v341_v40 = vld [vmem:[#allocation4 + $0x48] sm:$0xff]  ;;  %3641 = vst [vmem:[#allocation21_spill] sm:$0xff] %v2653_v23  ;;  %v2676_v32 = vld [vmem:[#allocation6 + $0x1d8] sm:$0xff]  ;;  %v2684_v33 = vld [vmem:[#allocation6 + $0x1b0] sm:$0xff] }
  0xbd   :  { %v210_v47 = vmul.f32 %v2480_v43, %v184_v39  ;;  %311 = vmatmul.f32.gmra.mxu1 %v259_v44  ;;  %v340_v39 = vld [vmem:[#allocation4 + $0x40] sm:$0xff]  ;;  %3644 = vst [vmem:[#allocation24_spill] sm:$0xff] %v2661_v26 }
  0xbe   :  { %419 = vmatpush.msra.mxu2 %v340_v39  ;;  %460 = vmatpush.msra.mxu3 %v341_v40  ;;  %v336_v44 = vld [vmem:[#allocation4 + $0x20] sm:$0xff]  ;;  %v2696_v39 = vld [vmem:[#allocation6 + $0x178] sm:$0xff] }
  0xbf   :  { %v226_v54 = vmax.f32 %v210_v47, 0.0  ;;  %v218_v62 = vmin.f32 %v210_v47, 1.0  ;;  %542 = vmatpush.msrb.mxu1 %v343_v42  ;;  %v339_v47 = vld [vmem:[#allocation4 + $0x38] sm:$0xff]  ;;  %v2707_v42 = vld [vmem:[#allocation6 + $0x150] sm:$0xff] }
  0xc0   :  { %420 = vmatpush.msra.mxu2 %v336_v44  ;;  %461 = vmatpush.msra.mxu3 %v337_v45  ;;  %v2709_v44 = vld [vmem:[#allocation6 + $0x158] sm:$0xff]  ;;  %v2713_v45 = vld [vmem:[#allocation6 + $0x130] sm:$0xff] }
  0xc1   :  { %v234_v59 = vmin.f32 %v226_v54, 1.0  ;;  %543 = vmatpush.msrb.mxu1 %v339_v47 }
  0xc2   :  { %v169_v63 = vpop.f32.mrf.mxu0  ;;  %421 = vmatpush.msra.mxu2 %v332_v50  ;;  %462 = vmatpush.msra.mxu3 %v333_v52  ;;  %v2719_v50 = vld [vmem:[#allocation6 + $0x110] sm:$0xff]  ;;  %v2721_v52 = vld [vmem:[#allocation6 + $0x118] sm:$0xff] }
  0xc3   :  { %v185_v1 = vsub.f32 %v169_v63, %v2478_v38  ;;  %v249_v2 = vsel %vm2484_vm7, %v226_v54, %v234_v59  ;;  %544 = vmatpush.msrb.mxu1 %v335_v49  ;;  %v2546_v54 = vld [vmem:[#allocation6 + $0x1c0] sm:$0xff]  ;;  %v2564_v59 = vld [vmem:[#allocation6 + $0x188] sm:$0xff] }
  0xc4   :  { %v260_v5 = vsel %vm2488_vm8, %v218_v62, %v249_v2  ;;  %670 = vmatpush.msrb.mxu2 %v2538_v51  ;;  %690 = vmatpush.msrb.mxu3 %v2540_v53  ;;  %v2578_v62 = vld [vmem:[#allocation6 + $0x140] sm:$0xff]  ;;  %v2580_v63 = vld [vmem:[#allocation6 + $0x148] sm:$0xff]  ;;  %v2595_v2 = vld [vmem:[%s3528_s7] ss:$0 sm:$0xff] }
  0xc5   :  { %v211_v8 = vmul.f32 %v2480_v43, %v185_v1  ;;  %314 = vmatmul.f32.gmra.mxu1 %v260_v5  ;;  %v2586_v1 = vld [vmem:[#allocation6 + $0x128] sm:$0xff]  ;;  %v2605_v5 = vld [vmem:[#allocation6 + $0xe0] sm:$0xff] }
  0xc6   :  { %841 = vmatpush.msra.mxu1 %v2540_v53  ;;  %671 = vmatpush.msrb.mxu2 %v2546_v54  ;;  %3632 = vst [vmem:[#allocation12_spill] sm:$0xff] %v2605_v5 }
  0xc7   :  { %v227_v13 = vmax.f32 %v211_v8, 0.0  ;;  %v219_v21 = vmin.f32 %v211_v8, 1.0  ;;  %691 = vmatpush.msrb.mxu3 %v2548_v55 }
  0xc8   :  { %842 = vmatpush.msra.mxu1 %v2548_v55  ;;  %672 = vmatpush.msrb.mxu2 %v2554_v56 }
  0xc9   :  { %v235_v18 = vmin.f32 %v227_v13, 1.0  ;;  %692 = vmatpush.msrb.mxu3 %v2556_v57 }
  0xca   :  { %v172_v22 = vpop.f32.mrf.mxu0  ;;  %843 = vmatpush.msra.mxu1 %v2556_v57  ;;  %673 = vmatpush.msrb.mxu2 %v2562_v58 }
  0xcb   :  { %v186_v24 = vsub.f32 %v172_v22, %v2478_v38  ;;  %v250_v25 = vsel %vm2484_vm7, %v227_v13, %v235_v18  ;;  %v346_v38 = vld [vmem:[#allocation4 + $0x70] sm:$0xff]  ;;  %693 = vmatpush.msrb.mxu3 %v2564_v59  ;;  %v2624_v13 = vld [vmem:[#allocation6 + $0xa8] sm:$0xff] }
  0xcc   :  { %v261_v28 = vsel %vm2488_vm8, %v219_v21, %v250_v25  ;;  %500 = vmatpush.msrb.mxu0 %v346_v38  ;;  %844 = vmatpush.msra.mxu1 %v2564_v59  ;;  %v2647_v21 = vld [vmem:[#allocation6 + $0x48] sm:$0xff]  ;;  %v2659_v25 = vld [vmem:[#allocation6] sm:$0xff] }
  0xcd   :  { %v212_v31 = vmul.f32 %v2480_v43, %v186_v24  ;;  %317 = vmatmul.f32.gmra.mxu1 %v261_v28  ;;  %674 = vmatpush.msrb.mxu2 %v2570_v60  ;;  %3640 = vst [vmem:[#allocation20_spill] sm:$0xff] %v2647_v21  ;;  %v2655_v24 = vld [vmem:[#allocation6 + $0x28] sm:$0xff]  ;;  %v2667_v28 = vld [vmem:[#allocation6 + $0x1f8] sm:$0xff] }
  0xce   :  { %501 = vmatpush.msrb.mxu0 %v342_v41  ;;  %694 = vmatpush.msrb.mxu3 %v2572_v61  ;;  %3642 = vst [vmem:[#allocation22_spill] sm:$0xff] %v2655_v24 }
  0xcf   :  { %v228_v34 = vmax.f32 %v212_v31, 0.0  ;;  %v220_v36 = vmin.f32 %v212_v31, 1.0  ;;  %845 = vmatpush.msra.mxu1 %v2572_v61  ;;  %675 = vmatpush.msrb.mxu2 %v2578_v62  ;;  %3643 = vst [vmem:[#allocation23_spill] sm:$0xff] %v2659_v25  ;;  %v2674_v31 = vld [vmem:[#allocation6 + $0x1d0] sm:$0xff] }
  0xd0   :  { %502 = vmatpush.msrb.mxu0 %v338_v46  ;;  %695 = vmatpush.msrb.mxu3 %v2580_v63  ;;  %v2715_v46 = vld [vmem:[#allocation6 + $0x138] sm:$0xff] }
  0xd1   :  { %v236_v35 = vmin.f32 %v228_v34, 1.0  ;;  %846 = vmatpush.msra.mxu1 %v2580_v63  ;;  %676 = vmatpush.msrb.mxu2 %v2584_v0 }
  0xd2   :  { %503 = vmatpush.msrb.mxu0 %v334_v48  ;;  %696 = vmatpush.msrb.mxu3 %v2586_v1 }
  0xd3   :  { %v251_v37 = vsel %vm2484_vm7, %v228_v34, %v236_v35  ;;  %847 = vmatpush.msra.mxu1 %v2586_v1  ;;  %677 = vmatpush.msrb.mxu2 %v2597_v3  ;;  %v2686_v34 = vld [vmem:[#allocation6 + $0x1b8] sm:$0xff]  ;;  %v2688_v35 = vld [vmem:[#allocation6 + $0x190] sm:$0xff] }
  0xd4   :  { %v262_v43 = vsel %vm2488_vm8, %v220_v36, %v251_v37  ;;  %821 = vmatpush.msra.mxu0 %v2538_v51  ;;  %697 = vmatpush.msrb.mxu3 %v2599_v4  ;;  %v2690_v36 = vld [vmem:[#allocation6 + $0x198] sm:$0xff] }
  0xd5   :  { %320 = vmatmul.f32.gmra.mxu1 %v262_v43  ;;  %678 = vmatpush.msrb.mxu2 %v2605_v5  ;;  %v2694_v43 = vld [vmem:[#allocation6 + $0x170] sm:$0xff] }
  0xd6   :  { %822 = vmatpush.msra.mxu0 %v2546_v54  ;;  %848 = vmatpush.msra.mxu1 %v2599_v4 }
  0xd7   :  { %698 = vmatpush.msrb.mxu3 %v2607_v6  ;;  %679 = vmatpush.msrb.mxu2 %v2614_v9 }
  0xd8   :  { %823 = vmatpush.msra.mxu0 %v2554_v56  ;;  %849 = vmatpush.msra.mxu1 %v2607_v6 }
  0xd9   :  { %699 = vmatpush.msrb.mxu3 %v2616_v10  ;;  %680 = vmatpush.msrb.mxu2 %v2622_v12 }
  0xda   :  { %824 = vmatpush.msra.mxu0 %v2562_v58  ;;  %850 = vmatpush.msra.mxu1 %v2616_v10 }
  0xdb   :  { %700 = vmatpush.msrb.mxu3 %v2624_v13  ;;  %681 = vmatpush.msrb.mxu2 %v2630_v14 }
  0xdc   :  { %825 = vmatpush.msra.mxu0 %v2570_v60  ;;  %851 = vmatpush.msra.mxu1 %v2624_v13 }
  0xdd   :  { %701 = vmatpush.msrb.mxu3 %v2632_v15  ;;  %682 = vmatpush.msrb.mxu2 %v2634_v16 }
  0xde   :  { %826 = vmatpush.msra.mxu0 %v2578_v62  ;;  %852 = vmatpush.msra.mxu1 %v2632_v15 }
  0xdf   :  { %702 = vmatpush.msrb.mxu3 %v2636_v17  ;;  %683 = vmatpush.msrb.mxu2 %v2645_v20 }
  0xe0   :  { %827 = vmatpush.msra.mxu0 %v2584_v0  ;;  %853 = vmatpush.msra.mxu1 %v2636_v17 }
  0xe1   :  { %703 = vmatpush.msrb.mxu3 %v2647_v21  ;;  %684 = vmatpush.msrb.mxu2 %v2653_v23 }
  0xe2   :  { %828 = vmatpush.msra.mxu0 %v2597_v3  ;;  %854 = vmatpush.msra.mxu1 %v2647_v21 }
  0xe3   :  { %704 = vmatpush.msrb.mxu3 %v2655_v24  ;;  %685 = vmatpush.msrb.mxu2 %v2659_v25 }
  0xe4   :  { %829 = vmatpush.msra.mxu0 %v2605_v5  ;;  %855 = vmatpush.msra.mxu1 %v2655_v24 }
  0xe5   :  { %705 = vmatpush.msrb.mxu3 %v2661_v26 }
  0xe6   :  { %830 = vmatpush.msra.mxu0 %v2614_v9  ;;  %856 = vmatpush.msra.mxu1 %v2661_v26 }
  0xe8   :  { %831 = vmatpush.msra.mxu0 %v2622_v12 }
  0xea   :  { %832 = vmatpush.msra.mxu0 %v2630_v14 }
  0xec   :  { %833 = vmatpush.msra.mxu0 %v2634_v16 }
  0xee   :  { %834 = vmatpush.msra.mxu0 %v2645_v20 }
  0xf0   :  { %835 = vmatpush.msra.mxu0 %v2653_v23 }
  0xf2   :  { %836 = vmatpush.msra.mxu0 %v2659_v25 }
 0x11a   :  { %v300_v7 = vpop.f32.mrf.mxu1 }
 0x11b   :  { %v301_v8 = vadd.f32 %v2595_v2, %v300_v7  ;;  %v2732_v7 = vld [vmem:[#allocation6 + $0xf0] sm:$0xff] }
 0x11d   :  { %v324_v11 = vmax.f32 %v301_v8, 0.0  ;;  %v2734_v8 = vld [vmem:[#allocation6 + $0xf8] sm:$0xff] }
 0x11f   :  { %422 = vmatmul.f32.vlgmr.msra.gmra.mxu2 %v324_v11  ;;  %463 = vmatmul.f32.vlgmr.msra.gmra.mxu3 %v324_v11 }
 0x120   :  { %504 = vmatmul.f32.vlgmr.msrb.gmra.mxu0 %v324_v11  ;;  %545 = vmatmul.f32.vlgmr.msrb.gmra.mxu1 %v324_v11  ;;  %v2738_v11 = vld [vmem:[#allocation6 + $0xd0] sm:$0xff] }
 0x121   :  { %710 = vmatpush.msra.mxu2 %v2665_v27  ;;  %730 = vmatpush.msra.mxu3 %v2667_v28 }
 0x122   :  { %v303_v18 = vpop.f32.mrf.mxu1  ;;  %972 = vmatpush.msrb.mxu0 %v2538_v51  ;;  %992 = vmatpush.msrb.mxu1 %v2540_v53 }
 0x123   :  { %v304_v19 = vadd.f32 %v2595_v2, %v303_v18  ;;  %711 = vmatpush.msra.mxu2 %v2674_v31  ;;  %731 = vmatpush.msra.mxu3 %v2676_v32  ;;  %v2740_v18 = vld [vmem:[#allocation6 + $0xd8] sm:$0xff] }
 0x124   :  { %973 = vmatpush.msrb.mxu0 %v2546_v54  ;;  %993 = vmatpush.msrb.mxu1 %v2548_v55 }
 0x125   :  { %v325_v22 = vmax.f32 %v304_v19, 0.0  ;;  %712 = vmatpush.msra.mxu2 %v2684_v33  ;;  %732 = vmatpush.msra.mxu3 %v2686_v34 }
 0x126   :  { %974 = vmatpush.msrb.mxu0 %v2554_v56  ;;  %994 = vmatpush.msrb.mxu1 %v2556_v57 }
 0x127   :  { %425 = vmatmul.f32.gmra.mxu2 %v325_v22  ;;  %466 = vmatmul.f32.gmra.mxu3 %v325_v22 }
 0x128   :  { %507 = vmatmul.f32.gmra.mxu0 %v325_v22  ;;  %548 = vmatmul.f32.gmra.mxu1 %v325_v22  ;;  %v2744_v22 = vld [vmem:[#allocation6 + $0xb0] sm:$0xff] }
 0x129   :  { %713 = vmatpush.msra.mxu2 %v2688_v35  ;;  %733 = vmatpush.msra.mxu3 %v2690_v36 }
 0x12a   :  { %v306_v29 = vpop.f32.mrf.mxu1  ;;  %975 = vmatpush.msrb.mxu0 %v2562_v58  ;;  %995 = vmatpush.msrb.mxu1 %v2564_v59 }
 0x12b   :  { %v307_v30 = vadd.f32 %v2595_v2, %v306_v29  ;;  %714 = vmatpush.msra.mxu2 %v2694_v43  ;;  %734 = vmatpush.msra.mxu3 %v2696_v39  ;;  %v2746_v29 = vld [vmem:[#allocation6 + $0xb8] sm:$0xff] }
 0x12c   :  { %976 = vmatpush.msrb.mxu0 %v2570_v60  ;;  %996 = vmatpush.msrb.mxu1 %v2572_v61  ;;  %3645 = vst [vmem:[#allocation25_spill] sm:$0xff] %v2746_v29 }
 0x12d   :  { %v326_v38 = vmax.f32 %v307_v30, 0.0  ;;  %715 = vmatpush.msra.mxu2 %v2707_v42  ;;  %735 = vmatpush.msra.mxu3 %v2709_v44 }
 0x12e   :  { %977 = vmatpush.msrb.mxu0 %v2578_v62  ;;  %997 = vmatpush.msrb.mxu1 %v2580_v63 }
 0x12f   :  { %428 = vmatmul.f32.gmra.mxu2 %v326_v38  ;;  %469 = vmatmul.f32.gmra.mxu3 %v326_v38 }
 0x130   :  { %510 = vmatmul.f32.gmra.mxu0 %v326_v38  ;;  %551 = vmatmul.f32.gmra.mxu1 %v326_v38 }
 0x131   :  { %716 = vmatpush.msra.mxu2 %v2713_v45  ;;  %736 = vmatpush.msra.mxu3 %v2715_v46 }
 0x132   :  { %v309_v37 = vpop.f32.mrf.mxu1  ;;  %978 = vmatpush.msrb.mxu0 %v2584_v0  ;;  %998 = vmatpush.msrb.mxu1 %v2586_v1 }
 0x133   :  { %v310_v40 = vadd.f32 %v2595_v2, %v309_v37  ;;  %717 = vmatpush.msra.mxu2 %v2719_v50  ;;  %737 = vmatpush.msra.mxu3 %v2721_v52  ;;  %v2757_v37 = vld [vmem:[#allocation6 + $0x90] sm:$0xff] }
 0x134   :  { %3646 = vst [vmem:[#allocation26_spill] sm:$0xff] %v2757_v37  ;;  %979 = vmatpush.msrb.mxu0 %v2597_v3  ;;  %999 = vmatpush.msrb.mxu1 %v2599_v4  ;;  %v2782_v4 = vld [vmem:[#allocation6 + $0x30] sm:$0xff] }
 0x135   :  { %v327_v41 = vmax.f32 %v310_v40, 0.0  ;;  %718 = vmatpush.msra.mxu2 %v2732_v7  ;;  %738 = vmatpush.msra.mxu3 %v2734_v8  ;;  %v2759_v40 = vld [vmem:[#allocation6 + $0x98] sm:$0xff]  ;;  %3652 = vst [vmem:[#allocation32_spill] sm:$0xff] %v2782_v4 }
 0x136   :  { %3647 = vst [vmem:[#allocation27_spill] sm:$0xff] %v2759_v40  ;;  %980 = vmatpush.msrb.mxu0 %v2605_v5  ;;  %1000 = vmatpush.msrb.mxu1 %v2607_v6  ;;  %v2784_v5 = vld [vmem:[#allocation6 + $0x38] sm:$0xff] }
 0x137   :  { %431 = vmatmul.f32.gmra.mxu2 %v327_v41  ;;  %472 = vmatmul.f32.gmra.mxu3 %v327_v41  ;;  %3653 = vst [vmem:[#allocation33_spill] sm:$0xff] %v2784_v5 }
 0x138   :  { %513 = vmatmul.f32.gmra.mxu0 %v327_v41  ;;  %554 = vmatmul.f32.gmra.mxu1 %v327_v41  ;;  %v2763_v41 = vld [vmem:[#allocation6 + $0x70] sm:$0xff] }
 0x139   :  { %719 = vmatpush.msra.mxu2 %v2738_v11  ;;  %739 = vmatpush.msra.mxu3 %v2740_v18  ;;  %3648 = vst [vmem:[#allocation28_spill] sm:$0xff] %v2763_v41 }
 0x13a   :  { %v312_v47 = vpop.f32.mrf.mxu1  ;;  %981 = vmatpush.msrb.mxu0 %v2614_v9  ;;  %1001 = vmatpush.msrb.mxu1 %v2616_v10  ;;  %v2790_v10 = vld [vmem:[#allocation6 + $0x18] sm:$0xff] }
 0x13b   :  { %v313_v48 = vadd.f32 %v2595_v2, %v312_v47  ;;  %720 = vmatpush.msra.mxu2 %v2744_v22  ;;  %740 = vmatpush.msra.mxu3 %v2746_v29  ;;  %v2765_v47 = vld [vmem:[#allocation6 + $0x78] sm:$0xff]  ;;  %3655 = vst [vmem:[#allocation35_spill] sm:$0xff] %v2790_v10 }
 0x13c   :  { %3649 = vst [vmem:[#allocation29_spill] sm:$0xff] %v2765_v47  ;;  %982 = vmatpush.msrb.mxu0 %v2622_v12  ;;  %1002 = vmatpush.msrb.mxu1 %v2624_v13 }
 0x13d   :  { %v328_v49 = vmax.f32 %v313_v48, 0.0  ;;  %721 = vmatpush.msra.mxu2 %v2757_v37  ;;  %741 = vmatpush.msra.mxu3 %v2759_v40 }
 0x13e   :  { %983 = vmatpush.msrb.mxu0 %v2630_v14  ;;  %1003 = vmatpush.msrb.mxu1 %v2632_v15 }
 0x13f   :  { %434 = vmatmul.f32.gmra.mxu2 %v328_v49  ;;  %475 = vmatmul.f32.gmra.mxu3 %v328_v49 }
 0x140   :  { %516 = vmatmul.f32.gmra.mxu0 %v328_v49  ;;  %557 = vmatmul.f32.gmra.mxu1 %v328_v49  ;;  %v2769_v49 = vld [vmem:[#allocation6 + $0x50] sm:$0xff] }
 0x141   :  { %3650 = vst [vmem:[#allocation30_spill] sm:$0xff] %v2769_v49  ;;  %722 = vmatpush.msra.mxu2 %v2763_v41  ;;  %742 = vmatpush.msra.mxu3 %v2765_v47 }
 0x142   :  { %v315_v19 = vpop.f32.mrf.mxu1  ;;  %984 = vmatpush.msrb.mxu0 %v2634_v16  ;;  %1004 = vmatpush.msrb.mxu1 %v2636_v17 }
 0x143   :  { %v316_v30 = vadd.f32 %v2595_v2, %v315_v19  ;;  %v2771_v19 = vld [vmem:[#allocation6 + $0x58] sm:$0xff]  ;;  %723 = vmatpush.msra.mxu2 %v2769_v49 }
 0x144   :  { %3651 = vst [vmem:[#allocation31_spill] sm:$0xff] %v2771_v19  ;;  %743 = vmatpush.msra.mxu3 %v2771_v19  ;;  %985 = vmatpush.msrb.mxu0 %v2645_v20 }
 0x145   :  { %v329_v38 = vmax.f32 %v316_v30, 0.0  ;;  %724 = vmatpush.msra.mxu2 %v2782_v4  ;;  %1005 = vmatpush.msrb.mxu1 %v2647_v21 }
 0x146   :  { %744 = vmatpush.msra.mxu3 %v2784_v5  ;;  %986 = vmatpush.msrb.mxu0 %v2653_v23 }
 0x147   :  { %437 = vmatmul.f32.gmra.mxu2 %v329_v38  ;;  %478 = vmatmul.f32.gmra.mxu3 %v329_v38 }
 0x148   :  { %519 = vmatmul.f32.gmra.mxu0 %v329_v38  ;;  %560 = vmatmul.f32.gmra.mxu1 %v329_v38 }
 0x149   :  { %745 = vmatpush.msra.mxu3 %v2790_v10  ;;  %1006 = vmatpush.msrb.mxu1 %v2655_v24 }
 0x14a   :  { %v318_v48 = vpop.f32.mrf.mxu1  ;;  %987 = vmatpush.msrb.mxu0 %v2659_v25 }
 0x14b   :  { %v319_v30 = vadd.f32 %v2595_v2, %v318_v48  ;;  %v2788_v48 = vld [vmem:[#allocation6 + $0x10] sm:$0xff]  ;;  %1007 = vmatpush.msrb.mxu1 %v2661_v26 }
 0x14c   :  { %3654 = vst [vmem:[#allocation34_spill] sm:$0xff] %v2788_v48  ;;  %725 = vmatpush.msra.mxu2 %v2788_v48 }
 0x14d   :  { %v330_v38 = vmax.f32 %v319_v30, 0.0 }
 0x14f   :  { %440 = vmatmul.f32.gmra.mxu2 %v330_v38  ;;  %481 = vmatmul.f32.gmra.mxu3 %v330_v38 }
 0x150   :  { %522 = vmatmul.f32.gmra.mxu0 %v330_v38  ;;  %563 = vmatmul.f32.gmra.mxu1 %v330_v38 }
 0x152   :  { %v321_v30 = vpop.f32.mrf.mxu1 }
 0x153   :  { %v322_v12 = vadd.f32 %v2595_v2, %v321_v30  ;;  %v2287_v2 = vmov 0.0  }
 0x155   :  { %v331_v38 = vmax.f32 %v322_v12, 0.0 }
 0x157   :  { %443 = vmatmul.f32.gmra.mxu2 %v331_v38  ;;  %484 = vmatmul.f32.gmra.mxu3 %v331_v38 }
 0x158   :  { %525 = vmatmul.f32.gmra.mxu0 %v331_v38  ;;  %566 = vmatmul.f32.gmra.mxu1 %v331_v38  ;;  %v396_v38 = vld [vmem:[%s3531_s10] sm:$0xf] }
 0x159   :  { %v2878_v25 = vperm.slane %v396_v38, 2  ;;  %v2880_v24 = vperm.slane %v396_v38, 3 }
 0x15b   :  { %3656 = vst [vmem:[#allocation36_spill] sm:$0xff] %v2878_v25 }
 0x15c   :  { %3657 = vst [vmem:[#allocation37_spill] sm:$0xff] %v2880_v24 }
 0x15f   :  { %686 = vmatmul.f32.vlgmr.msrb.gmra.mxu2 %v2287_v2  ;;  %706 = vmatmul.f32.vlgmr.msrb.gmra.mxu3 %v2287_v2 }
 0x160   :  { %861 = vmatpush.msrb.mxu2 %v2665_v27  ;;  %881 = vmatpush.msrb.mxu3 %v2667_v28 }
 0x162   :  { %862 = vmatpush.msrb.mxu2 %v2674_v31  ;;  %882 = vmatpush.msrb.mxu3 %v2676_v32 }
 0x164   :  { %863 = vmatpush.msrb.mxu2 %v2684_v33  ;;  %883 = vmatpush.msrb.mxu3 %v2686_v34 }
 0x166   :  { %864 = vmatpush.msrb.mxu2 %v2688_v35  ;;  %884 = vmatpush.msrb.mxu3 %v2690_v36 }
 0x167   :  { %726 = vmatmul.f32.vlgmr.msra.gmra.mxu2 %v2287_v2  ;;  %746 = vmatmul.f32.vlgmr.msra.gmra.mxu3 %v2287_v2 }
 0x168   :  { %865 = vmatpush.msrb.mxu2 %v2694_v43  ;;  %885 = vmatpush.msrb.mxu3 %v2696_v39 }
 0x16a   :  { %866 = vmatpush.msrb.mxu2 %v2707_v42  ;;  %886 = vmatpush.msrb.mxu3 %v2709_v44 }
 0x16c   :  { %867 = vmatpush.msrb.mxu2 %v2713_v45  ;;  %887 = vmatpush.msrb.mxu3 %v2715_v46 }
 0x16e   :  { %868 = vmatpush.msrb.mxu2 %v2719_v50  ;;  %888 = vmatpush.msrb.mxu3 %v2721_v52 }
 0x170   :  { %869 = vmatpush.msrb.mxu2 %v2732_v7  ;;  %889 = vmatpush.msrb.mxu3 %v2734_v8 }
 0x172   :  { %870 = vmatpush.msrb.mxu2 %v2738_v11  ;;  %890 = vmatpush.msrb.mxu3 %v2740_v18 }
 0x174   :  { %871 = vmatpush.msrb.mxu2 %v2744_v22  ;;  %891 = vmatpush.msrb.mxu3 %v2746_v29 }
 0x176   :  { %872 = vmatpush.msrb.mxu2 %v2757_v37  ;;  %892 = vmatpush.msrb.mxu3 %v2759_v40 }
 0x178   :  { %873 = vmatpush.msrb.mxu2 %v2763_v41  ;;  %893 = vmatpush.msrb.mxu3 %v2765_v47 }
 0x17a   :  { %874 = vmatpush.msrb.mxu2 %v2769_v49  ;;  %894 = vmatpush.msrb.mxu3 %v2771_v19 }
 0x17c   :  { %875 = vmatpush.msrb.mxu2 %v2782_v4  ;;  %895 = vmatpush.msrb.mxu3 %v2784_v5 }
 0x17e   :  { %876 = vmatpush.msrb.mxu2 %v2788_v48  ;;  %896 = vmatpush.msrb.mxu3 %v2790_v10 }
 0x180   :  { %1012 = vmatpush.msra.mxu2 %v2665_v27  ;;  %1032 = vmatpush.msra.mxu3 %v2667_v28 }
 0x182   :  { %1013 = vmatpush.msra.mxu2 %v2674_v31  ;;  %1033 = vmatpush.msra.mxu3 %v2676_v32 }
 0x184   :  { %1014 = vmatpush.msra.mxu2 %v2684_v33  ;;  %1034 = vmatpush.msra.mxu3 %v2686_v34 }
 0x186   :  { %1015 = vmatpush.msra.mxu2 %v2688_v35  ;;  %1035 = vmatpush.msra.mxu3 %v2690_v36 }
 0x188   :  { %1016 = vmatpush.msra.mxu2 %v2694_v43  ;;  %1036 = vmatpush.msra.mxu3 %v2696_v39 }
 0x18a   :  { %1017 = vmatpush.msra.mxu2 %v2707_v42  ;;  %1037 = vmatpush.msra.mxu3 %v2709_v44 }
 0x18c   :  { %1018 = vmatpush.msra.mxu2 %v2713_v45  ;;  %1038 = vmatpush.msra.mxu3 %v2715_v46 }
 0x18e   :  { %1019 = vmatpush.msra.mxu2 %v2719_v50  ;;  %1039 = vmatpush.msra.mxu3 %v2721_v52 }
 0x190   :  { %1020 = vmatpush.msra.mxu2 %v2732_v7  ;;  %1040 = vmatpush.msra.mxu3 %v2734_v8 }
 0x192   :  { %1021 = vmatpush.msra.mxu2 %v2738_v11  ;;  %1041 = vmatpush.msra.mxu3 %v2740_v18 }
 0x194   :  { %1022 = vmatpush.msra.mxu2 %v2744_v22  ;;  %1042 = vmatpush.msra.mxu3 %v2746_v29 }
 0x196   :  { %1023 = vmatpush.msra.mxu2 %v2757_v37  ;;  %1043 = vmatpush.msra.mxu3 %v2759_v40 }
 0x198   :  { %1024 = vmatpush.msra.mxu2 %v2763_v41  ;;  %1044 = vmatpush.msra.mxu3 %v2765_v47 }
 0x19a   :  { %1025 = vmatpush.msra.mxu2 %v2769_v49  ;;  %1045 = vmatpush.msra.mxu3 %v2771_v19 }
 0x19c   :  { %1026 = vmatpush.msra.mxu2 %v2782_v4  ;;  %1046 = vmatpush.msra.mxu3 %v2784_v5 }
 0x19d   :  { %v2869_v12 = vpop.f32.mrf.mxu0  ;;  %v2871_v30 = vpop.f32.mrf.mxu1 }
 0x19e   :  { %1027 = vmatpush.msra.mxu2 %v2788_v48  ;;  %1047 = vmatpush.msra.mxu3 %v2790_v10  ;;  %v398_v48 = vperm.slane %v396_v38, 0  ;;  %v399_v10 = vperm.slane %v396_v38, 1 }
 0x1a2   :  { %v423_v2 = vpop.f32.mrf.mxu2  ;;  %v464_v26 = vpop.f32.mrf.mxu3 }
 0x1a5   :  { %v508_v4 = vpop.f32.mrf.mxu0  ;;  %v549_v5 = vpop.f32.mrf.mxu1 }
 0x1a6   :  { %v2883_v23 = vadd.f32 %v508_v4, %v2878_v25  ;;  %v2886_v19 = vadd.f32 %v549_v5, %v2880_v24 }
 0x1a8   :  { %3658 = vst [vmem:[#allocation38_spill] sm:$0xff] %v2883_v23 }
 0x1a9   :  { %3659 = vst [vmem:[#allocation39_spill] sm:$0xff] %v2886_v19 }
 0x1aa   :  { %v426_v49 = vpop.f32.mrf.mxu2  ;;  %v467_v21 = vpop.f32.mrf.mxu3 }
 0x1ab   :  { %v2888_v20 = vadd.f32 %v426_v49, %v398_v48  ;;  %v2890_v47 = vadd.f32 %v467_v21, %v399_v10 }
 0x1ad   :  { %3660 = vst [vmem:[#allocation40_spill] sm:$0xff] %v2888_v20  ;;  %v511_v41 = vpop.f32.mrf.mxu0  ;;  %v552_v17 = vpop.f32.mrf.mxu1 }
 0x1ae   :  { %3661 = vst [vmem:[#allocation41_spill] sm:$0xff] %v2890_v47  ;;  %v2893_v16 = vadd.f32 %v511_v41, %v2878_v25  ;;  %v2896_v40 = vadd.f32 %v552_v17, %v2880_v24 }
 0x1b0   :  { %3662 = vst [vmem:[#allocation42_spill] sm:$0xff] %v2893_v16 }
 0x1b1   :  { %3663 = vst [vmem:[#allocation43_spill] sm:$0xff] %v2896_v40 }
 0x1b2   :  { %v429_v4 = vpop.f32.mrf.mxu2  ;;  %v470_v23 = vpop.f32.mrf.mxu3 }
 0x1b3   :  { %v2898_v5 = vadd.f32 %v429_v4, %v398_v48  ;;  %v2900_v19 = vadd.f32 %v470_v23, %v399_v10 }
 0x1b5   :  { %3664 = vst [vmem:[#allocation44_spill] sm:$0xff] %v2898_v5  ;;  %v514_v38 = vpop.f32.mrf.mxu0  ;;  %v555_v37 = vpop.f32.mrf.mxu1 }
 0x1b6   :  { %3665 = vst [vmem:[#allocation45_spill] sm:$0xff] %v2900_v19  ;;  %v2903_v49 = vadd.f32 %v514_v38, %v2878_v25  ;;  %v2906_v21 = vadd.f32 %v555_v37, %v2880_v24 }
 0x1b8   :  { %3666 = vst [vmem:[#allocation46_spill] sm:$0xff] %v2903_v49 }
 0x1b9   :  { %3667 = vst [vmem:[#allocation47_spill] sm:$0xff] %v2906_v21 }
 0x1ba   :  { %v432_v47 = vpop.f32.mrf.mxu2  ;;  %v473_v41 = vpop.f32.mrf.mxu3 }
 0x1bb   :  { %v2908_v16 = vadd.f32 %v432_v47, %v398_v48  ;;  %v2910_v17 = vadd.f32 %v473_v41, %v399_v10 }
 0x1bd   :  { %3668 = vst [vmem:[#allocation48_spill] sm:$0xff] %v2908_v16  ;;  %v517_v40 = vpop.f32.mrf.mxu0  ;;  %v558_v20 = vpop.f32.mrf.mxu1 }
 0x1be   :  { %3669 = vst [vmem:[#allocation49_spill] sm:$0xff] %v2910_v17  ;;  %v2913_v4 = vadd.f32 %v517_v40, %v2878_v25  ;;  %v2916_v23 = vadd.f32 %v558_v20, %v2880_v24 }
 0x1c0   :  { %3670 = vst [vmem:[#allocation50_spill] sm:$0xff] %v2913_v4 }
 0x1c1   :  { %3671 = vst [vmem:[#allocation51_spill] sm:$0xff] %v2916_v23 }
 0x1c2   :  { %v435_v19 = vpop.f32.mrf.mxu2  ;;  %v476_v38 = vpop.f32.mrf.mxu3 }
 0x1c3   :  { %v2918_v49 = vadd.f32 %v435_v19, %v398_v48  ;;  %v2920_v37 = vadd.f32 %v476_v38, %v399_v10 }
 0x1c5   :  { %3672 = vst [vmem:[#allocation52_spill] sm:$0xff] %v2918_v49  ;;  %v520_v21 = vpop.f32.mrf.mxu0  ;;  %v561_v5 = vpop.f32.mrf.mxu1 }
 0x1c6   :  { %3673 = vst [vmem:[#allocation53_spill] sm:$0xff] %v2920_v37  ;;  %v2923_v47 = vadd.f32 %v520_v21, %v2878_v25  ;;  %v2926_v41 = vadd.f32 %v561_v5, %v2880_v24 }
 0x1c8   :  { %3674 = vst [vmem:[#allocation54_spill] sm:$0xff] %v2923_v47 }
 0x1c9   :  { %3675 = vst [vmem:[#allocation55_spill] sm:$0xff] %v2926_v41 }
 0x1ca   :  { %v438_v17 = vpop.f32.mrf.mxu2  ;;  %v479_v40 = vpop.f32.mrf.mxu3 }
 0x1cb   :  { %v2928_v4 = vadd.f32 %v438_v17, %v398_v48  ;;  %v2930_v20 = vadd.f32 %v479_v40, %v399_v10 }
 0x1cd   :  { %3676 = vst [vmem:[#allocation56_spill] sm:$0xff] %v2928_v4  ;;  %v523_v23 = vpop.f32.mrf.mxu0  ;;  %v564_v16 = vpop.f32.mrf.mxu1  ;;  %v465_v4 = vadd.f32 %v464_v26, %v399_v10 }
 0x1ce   :  { %3677 = vst [vmem:[#allocation57_spill] sm:$0xff] %v2930_v20  ;;  %v2933_v19 = vadd.f32 %v523_v23, %v2878_v25  ;;  %v2936_v38 = vadd.f32 %v564_v16, %v2880_v24  ;;  %v424_v20 = vadd.f32 %v423_v2, %v398_v48 }
 0x1d0   :  { %3678 = vst [vmem:[#allocation58_spill] sm:$0xff] %v2933_v19 }
 0x1d1   :  { %3679 = vst [vmem:[#allocation59_spill] sm:$0xff] %v2936_v38 }
 0x1d2   :  { %v441_v37 = vpop.f32.mrf.mxu2  ;;  %v482_v21 = vpop.f32.mrf.mxu3 }
 0x1d3   :  { %v2938_v47 = vadd.f32 %v441_v37, %v398_v48  ;;  %v2940_v5 = vadd.f32 %v482_v21, %v399_v10  ;;  %v547_v37 = vadd.f32 %v2871_v30, %v2880_v24 }
 0x1d5   :  { %3680 = vst [vmem:[#allocation60_spill] sm:$0xff] %v2938_v47 }
 0x1d6   :  { %3681 = vst [vmem:[#allocation61_spill] sm:$0xff] %v2940_v5 }
 0x1da   :  { %v444_v41 = vpop.f32.mrf.mxu2  ;;  %v485_v49 = vpop.f32.mrf.mxu3 }
 0x1db   :  { %v2942_v17 = vadd.f32 %v444_v41, %v398_v48  ;;  %v2944_v40 = vadd.f32 %v485_v49, %v399_v10 }
 0x1dd   :  { %3682 = vst [vmem:[#allocation62_spill] sm:$0xff] %v2942_v17 }
 0x1de   :  { %3683 = vst [vmem:[#allocation63_spill] sm:$0xff] %v2944_v40 }
 0x1e2   :  { %v687_v15 = vpop.f32.mrf.mxu2  ;;  %v707_v23 = vpop.f32.mrf.mxu3 }
 0x1e3   :  { %v750_v19 = vadd.f32 %v687_v15, %v424_v20  ;;  %v751_v14 = vadd.f32 %v707_v23, %v465_v4  ;;  %v506_v15 = vadd.f32 %v2869_v12, %v2878_v25 }
 0x1e5   :  { %v1971_v16 = vmul.f32 -1.442695, %v750_v19  ;;  %v1972_v38 = vmul.f32 -1.442695, %v751_v14 }
 0x1e7   :  { %2011 = vpow2.f32 %v1971_v16 }
 0x1e8   :  { %2013 = vpow2.f32 %v1972_v38 }
 0x1ea   :  { %v747_v21 = vpop.f32.mrf.mxu3  ;;  %v727_v10 = vpop.f32.mrf.mxu2 }
 0x1eb   :  { %v753_v5 = vadd.f32 %v747_v21, %v547_v37  ;;  %v752_v48 = vadd.f32 %v727_v10, %v506_v15 }
 0x1ed   :  { %v2012_v47 = vpop.eup %2011  ;;  %v1973_v41 = vmul.f32 -1.442695, %v753_v5 }
 0x1ee   :  { %v2014_v17 = vpop.eup %2013  ;;  %v757_v49 = vadd.f32 1.0, %v2012_v47 }
 0x1ef   :  { %v776_v40 = vadd.f32 1.0, %v2014_v17  ;;  %2015 = vpow2.f32 %v1973_v41 }
 0x1f0   :  { %2017 = vrcp.f32 %v757_v49  ;;  %v769_v5 = vand.u32 2147483648, %v757_v49  ;;  %v767_v23 = vand.u32 2147483647, %v757_v49  ;;  %vm763_vm11 = vweird.f32 %v757_v49 }
 0x1f1   :  { %2019 = vrcp.f32 %v776_v40  ;;  %v788_v47 = vand.u32 2147483648, %v776_v40  ;;  %v786_v37 = vand.u32 2147483647, %v776_v40  ;;  %vm782_vm12 = vweird.f32 %v776_v40 }
 0x1f2   :  { %v770_v41 = vor.u32 1.1754944e-38, %v769_v5  ;;  %vm768_vm14 = vcmp.eq.f32.partialorder %v767_v23, 8.507059e+37 }
 0x1f3   :  { %v789_v15 = vor.u32 1.1754944e-38, %v788_v47  ;;  %vm787_vm0 = vcmp.eq.f32.partialorder %v786_v37, 8.507059e+37 }
 0x1f5   :  { %v2016_v14 = vpop.eup %2015 }
 0x1f6   :  { %v2018_v26 = vpop.eup %2017  ;;  %v796_v2 = vadd.f32 1.0, %v2016_v14 }
 0x1f7   :  { %v2020_v4 = vpop.eup %2019  ;;  %v759_v30 = vmul.f32 %v2018_v26, %v757_v49  ;;  %vm764_vm9 = vweird.f32 %v2018_v26 }
 0x1f8   :  { %v778_v20 = vmul.f32 %v2020_v4, %v776_v40  ;;  %2021 = vrcp.f32 %v796_v2  ;;  %vm783_vm10 = vweird.f32 %v2020_v4  ;;  %vm765_vm13 = vmor %vm763_vm11, %vm764_vm9  ;;  %v808_v5 = vand.u32 2147483648, %v796_v2 }
 0x1f9   :  { %v760_v19 = vsub.f32 1.0, %v759_v30  ;;  %2023 = vtanh.f32 %v752_v48  ;;  %vm784_vm15 = vmor %vm782_vm12, %vm783_vm10  ;;  %vm802_vm2 = vweird.f32 %v796_v2 }
 0x1fa   :  { %v779_v38 = vsub.f32 1.0, %v778_v20  ;;  %v809_v23 = vor.u32 1.1754944e-38, %v808_v5 }
 0x1fb   :  { %v761_v17 = vmul.f32 %v2018_v26, %v760_v19 }
 0x1fc   :  { %v780_v16 = vmul.f32 %v2020_v4, %v779_v38 }
 0x1fd   :  { %v762_v12 = vadd.f32 %v2018_v26, %v761_v17 }
 0x1fe   :  { %v2022_v21 = vpop.eup %2021  ;;  %v781_v10 = vadd.f32 %v2020_v4, %v780_v16 }
 0x1ff   :  { %v766_v14 = vsel %vm765_vm13, %v2018_v26, %v762_v12  ;;  %v798_v30 = vmul.f32 %v2022_v21, %v796_v2  ;;  %v2024_v48 = vpop.eup %2023  ;;  %vm803_vm1 = vweird.f32 %v2022_v21  ;;  %v806_v26 = vand.u32 2147483647, %v796_v2  ;;  %v3705_v2 = vld [vmem:[#allocation23_spill] sm:$0xff]  ;;  %v3706_v12 = vld [vmem:[#allocation24_spill] sm:$0xff] }
 0x200   :  { %v771_v20 = vsel %vm768_vm14, %v770_v41, %v766_v14  ;;  %v785_v19 = vsel %vm784_vm15, %v2020_v4, %v781_v10  ;;  %vm804_vm3 = vmor %vm802_vm2, %vm803_vm1  ;;  %v3708_v41 = vld [vmem:[#allocation35_spill] sm:$0xff]  ;;  %v3017_v10 = vpop.f32.mrf.mxu0 }
 0x201   :  { %v790_v25 = vsel %vm787_vm0, %v789_v15, %v785_v19  ;;  %v813_v38 = vmul.f32 %v2024_v48, %v771_v20  ;;  %v799_v24 = vsub.f32 1.0, %v798_v30  ;;  %vm807_vm4 = vcmp.eq.f32.partialorder %v806_v26, 8.507059e+37  ;;  %v3019_v15 = vpop.f32.mrf.mxu1  ;;  %v3711_v48 = vld [vmem:[#allocation40_spill] sm:$0xff]  ;;  %v3712_v19 = vld [vmem:[#allocation41_spill] sm:$0xff]  ;;  %v3713_v26 = vld [vmem:[#allocation39_spill] sm:$0xff] }
 0x202   :  { %v812_v29 = vmul.f32 0.0, %v790_v25  ;;  %v3703_v25 = vld [vmem:[#allocation32_spill] sm:$0xff] }
 0x203   :  { %v800_v17 = vmul.f32 %v2022_v21, %v799_v24  ;;  %v3702_v24 = vld [vmem:[#allocation22_spill] sm:$0xff] }
 0x204   :  { %v2950_v49 = vadd.f32 %v813_v38, %v812_v29  ;;  %v3704_v29 = vld [vmem:[#allocation33_spill] sm:$0xff] }
 0x205   :  { %v801_v40 = vadd.f32 %v2022_v21, %v800_v17 }
 0x206   :  { %2025 = vtanh.f32 %v2950_v49 }
 0x207   :  { %v805_v47 = vsel %vm804_vm3, %v2022_v21, %v801_v40  ;;  %v3707_v21 = vld [vmem:[#allocation34_spill] sm:$0xff] }
 0x208   :  { %v810_v16 = vsel %vm807_vm4, %v809_v23, %v805_v47 }
 0x20c   :  { %v2026_v4 = vpop.eup %2025 }
 0x20d   :  { %v816_v37 = vmul.f32 %v2026_v4, %v810_v16 }
 0x20f   :  { %837 = vmatmul.f32.vlgmr.msra.gmra.mxu0 %v816_v37  ;;  %857 = vmatmul.f32.vlgmr.msra.gmra.mxu1 %v816_v37 }
 0x210   :  { %877 = vmatmul.f32.vlgmr.msrb.gmra.mxu2 %v816_v37  ;;  %897 = vmatmul.f32.vlgmr.msrb.gmra.mxu3 %v816_v37 }
 0x211   :  { %1123 = vmatpush.msra.mxu0 %v2538_v51  ;;  %1143 = vmatpush.msra.mxu1 %v2540_v53  ;;  %v3684_v51 = vld [vmem:[#allocation11_spill] sm:$0xff]  ;;  %v3685_v53 = vld [vmem:[#allocation12_spill] sm:$0xff] }
 0x212   :  { %1163 = vmatpush.msrb.mxu2 %v2665_v27  ;;  %1183 = vmatpush.msrb.mxu3 %v2667_v28  ;;  %3709 = vst [vmem:[#allocation11_spill] sm:$0xff] %v3017_v10  ;;  %v3282_v10 = vld [vmem:[#allocation6 + $0x38] sm:$0xff] }
 0x213   :  { %1124 = vmatpush.msra.mxu0 %v2546_v54  ;;  %1144 = vmatpush.msra.mxu1 %v2548_v55  ;;  %v3686_v54 = vld [vmem:[#allocation13_spill] sm:$0xff]  ;;  %v3687_v55 = vld [vmem:[#allocation14_spill] sm:$0xff]  ;;  %3710 = vst [vmem:[#allocation12_spill] sm:$0xff] %v3019_v15 }
 0x214   :  { %1164 = vmatpush.msrb.mxu2 %v2674_v31  ;;  %1184 = vmatpush.msrb.mxu3 %v2676_v32  ;;  %3742 = vst [vmem:[#allocation40_spill] sm:$0xff] %v3282_v10  ;;  %v3287_v15 = vld [vmem:[#allocation6 + $0x10] sm:$0xff] }
 0x215   :  { %1125 = vmatpush.msra.mxu0 %v2554_v56  ;;  %1145 = vmatpush.msra.mxu1 %v2556_v57  ;;  %v3688_v56 = vld [vmem:[#allocation25_spill] sm:$0xff]  ;;  %v3689_v57 = vld [vmem:[#allocation15_spill] sm:$0xff]  ;;  %3743 = vst [vmem:[#allocation41_spill] sm:$0xff] %v3287_v15 }
 0x216   :  { %1165 = vmatpush.msrb.mxu2 %v2684_v33  ;;  %1185 = vmatpush.msrb.mxu3 %v2686_v34 }
 0x217   :  { %1126 = vmatpush.msra.mxu0 %v2562_v58  ;;  %1146 = vmatpush.msra.mxu1 %v2564_v59  ;;  %v3690_v58 = vld [vmem:[#allocation16_spill] sm:$0xff]  ;;  %v3691_v59 = vld [vmem:[#allocation26_spill] sm:$0xff] }
 0x218   :  { %1166 = vmatpush.msrb.mxu2 %v2688_v35  ;;  %1186 = vmatpush.msrb.mxu3 %v2690_v36 }
 0x219   :  { %1127 = vmatpush.msra.mxu0 %v2570_v60  ;;  %1147 = vmatpush.msra.mxu1 %v2572_v61  ;;  %v3692_v60 = vld [vmem:[#allocation27_spill] sm:$0xff]  ;;  %v3693_v61 = vld [vmem:[#allocation17_spill] sm:$0xff] }
 0x21a   :  { %1167 = vmatpush.msrb.mxu2 %v2694_v43  ;;  %1187 = vmatpush.msrb.mxu3 %v2696_v39 }
 0x21b   :  { %1128 = vmatpush.msra.mxu0 %v2578_v62  ;;  %1148 = vmatpush.msra.mxu1 %v2580_v63  ;;  %v3694_v62 = vld [vmem:[#allocation18_spill] sm:$0xff]  ;;  %v3695_v63 = vld [vmem:[#allocation28_spill] sm:$0xff] }
 0x21c   :  { %1168 = vmatpush.msrb.mxu2 %v2707_v42  ;;  %1188 = vmatpush.msrb.mxu3 %v2709_v44 }
 0x21d   :  { %1129 = vmatpush.msra.mxu0 %v2584_v0  ;;  %1149 = vmatpush.msra.mxu1 %v2586_v1  ;;  %v3696_v0 = vld [vmem:[#allocation29_spill] sm:$0xff]  ;;  %v3697_v1 = vld [vmem:[#allocation19_spill] sm:$0xff] }
 0x21e   :  { %1169 = vmatpush.msrb.mxu2 %v2713_v45  ;;  %1189 = vmatpush.msrb.mxu3 %v2715_v46 }
 0x21f   :  { %1130 = vmatpush.msra.mxu0 %v2597_v3  ;;  %1150 = vmatpush.msra.mxu1 %v3684_v51  ;;  %v3698_v3 = vld [vmem:[#allocation20_spill] sm:$0xff] }
 0x220   :  { %1170 = vmatpush.msrb.mxu2 %v2719_v50  ;;  %1190 = vmatpush.msrb.mxu3 %v2721_v52 }
 0x221   :  { %1131 = vmatpush.msra.mxu0 %v3685_v53  ;;  %1151 = vmatpush.msra.mxu1 %v2607_v6  ;;  %v3699_v6 = vld [vmem:[#allocation30_spill] sm:$0xff] }
 0x222   :  { %1171 = vmatpush.msrb.mxu2 %v2732_v7  ;;  %1191 = vmatpush.msrb.mxu3 %v2734_v8 }
 0x223   :  { %1132 = vmatpush.msra.mxu0 %v2614_v9  ;;  %1152 = vmatpush.msra.mxu1 %v3686_v54  ;;  %v3700_v9 = vld [vmem:[#allocation31_spill] sm:$0xff] }
 0x224   :  { %1172 = vmatpush.msrb.mxu2 %v2738_v11  ;;  %1192 = vmatpush.msrb.mxu3 %v2740_v18 }
 0x225   :  { %1133 = vmatpush.msra.mxu0 %v3687_v55  ;;  %1153 = vmatpush.msra.mxu1 %v2624_v13  ;;  %v3701_v13 = vld [vmem:[#allocation21_spill] sm:$0xff] }
 0x226   :  { %1173 = vmatpush.msrb.mxu2 %v2744_v22  ;;  %1193 = vmatpush.msrb.mxu3 %v3688_v56 }
 0x227   :  { %1134 = vmatpush.msra.mxu0 %v3689_v57  ;;  %1154 = vmatpush.msra.mxu1 %v3690_v58  ;;  %v3714_v58 = vld [vmem:[#allocation38_spill] sm:$0xff] }
 0x228   :  { %1174 = vmatpush.msrb.mxu2 %v3691_v59  ;;  %1194 = vmatpush.msrb.mxu3 %v3692_v60 }
 0x229   :  { %1135 = vmatpush.msra.mxu0 %v3693_v61  ;;  %1155 = vmatpush.msra.mxu1 %v3694_v62 }
 0x22a   :  { %1175 = vmatpush.msrb.mxu2 %v3695_v63  ;;  %1195 = vmatpush.msrb.mxu3 %v3696_v0 }
 0x22b   :  { %1136 = vmatpush.msra.mxu0 %v3697_v1  ;;  %1156 = vmatpush.msra.mxu1 %v3698_v3 }
 0x22c   :  { %1176 = vmatpush.msrb.mxu2 %v3699_v6  ;;  %1196 = vmatpush.msrb.mxu3 %v3700_v9 }
 0x22d   :  { %1137 = vmatpush.msra.mxu0 %v3701_v13  ;;  %1157 = vmatpush.msra.mxu1 %v3702_v24 }
 0x22e   :  { %1177 = vmatpush.msrb.mxu2 %v3703_v25  ;;  %1197 = vmatpush.msrb.mxu3 %v3704_v29 }
 0x22f   :  { %1138 = vmatpush.msra.mxu0 %v3705_v2  ;;  %1158 = vmatpush.msra.mxu1 %v3706_v12 }
 0x230   :  { %1178 = vmatpush.msrb.mxu2 %v3707_v21  ;;  %1198 = vmatpush.msrb.mxu3 %v3708_v41 }
 0x28c   :  { %v838_v14 = vpop.f32.mrf.mxu0  ;;  %v858_v30 = vpop.f32.mrf.mxu1 }
 0x28d   :  { %v901_v20 = vadd.f32 %v838_v14, %v3711_v48  ;;  %v902_v38 = vadd.f32 %v858_v30, %v3712_v19 }
 0x28f   :  { %v1974_v17 = vmul.f32 -1.442695, %v901_v20  ;;  %v1975_v40 = vmul.f32 -1.442695, %v902_v38 }
 0x291   :  { %2027 = vpow2.f32 %v1974_v17 }
 0x292   :  { %2029 = vpow2.f32 %v1975_v40 }
 0x293   :  { %v898_v5 = vpop.f32.mrf.mxu3  ;;  %v878_v53 = vpop.f32.mrf.mxu2 }
 0x294   :  { %v904_v47 = vadd.f32 %v898_v5, %v3713_v26  ;;  %v903_v61 = vadd.f32 %v878_v53, %v3714_v58 }
 0x296   :  { %v1976_v23 = vmul.f32 -1.442695, %v904_v47 }
 0x297   :  { %v2028_v4 = vpop.eup %2027 }
 0x298   :  { %v2030_v16 = vpop.eup %2029  ;;  %v908_v37 = vadd.f32 1.0, %v2028_v4  ;;  %2031 = vpow2.f32 %v1976_v23 }
 0x299   :  { %v927_v51 = vadd.f32 1.0, %v2030_v16 }
 0x29a   :  { %2033 = vrcp.f32 %v908_v37  ;;  %v920_v2 = vand.u32 2147483648, %v908_v37  ;;  %v918_v30 = vand.u32 2147483647, %v908_v37  ;;  %vm914_vm7 = vweird.f32 %v908_v37 }
 0x29b   :  { %2035 = vrcp.f32 %v927_v51  ;;  %v939_v12 = vand.u32 2147483648, %v927_v51  ;;  %v937_v20 = vand.u32 2147483647, %v927_v51  ;;  %vm933_vm8 = vweird.f32 %v927_v51 }
 0x29c   :  { %v921_v17 = vor.u32 1.1754944e-38, %v920_v2  ;;  %vm919_vm11 = vcmp.eq.f32.partialorder %v918_v30, 8.507059e+37  ;;  %v3040_v30 = vld [vmem:[#allocation6 + $0x1c8] sm:$0xff] }
 0x29d   :  { %v940_v26 = vor.u32 1.1754944e-38, %v939_v12  ;;  %vm938_vm12 = vcmp.eq.f32.partialorder %v937_v20, 8.507059e+37  ;;  %v3048_v20 = vld [vmem:[#allocation6 + $0x1a8] sm:$0xff] }
 0x29e   :  { %v2032_v54 = vpop.eup %2031 }
 0x29f   :  { %v947_v55 = vadd.f32 1.0, %v2032_v54 }
 0x2a0   :  { %v2034_v57 = vpop.eup %2033 }
 0x2a1   :  { %v2036_v62 = vpop.eup %2035  ;;  %v910_v1 = vmul.f32 %v2034_v57, %v908_v37  ;;  %2037 = vrcp.f32 %v947_v55  ;;  %vm915_vm5 = vweird.f32 %v2034_v57  ;;  %vm953_vm14 = vweird.f32 %v947_v55 }
 0x2a2   :  { %v929_v3 = vmul.f32 %v2036_v62, %v927_v51  ;;  %2039 = vtanh.f32 %v903_v61  ;;  %vm934_vm6 = vweird.f32 %v2036_v62  ;;  %vm916_vm9 = vmor %vm914_vm7, %vm915_vm5 }
 0x2a3   :  { %v911_v13 = vsub.f32 1.0, %v910_v1  ;;  %vm935_vm10 = vmor %vm933_vm8, %vm934_vm6 }
 0x2a4   :  { %v930_v24 = vsub.f32 1.0, %v929_v3  ;;  %v959_v3 = vand.u32 2147483648, %v947_v55 }
 0x2a5   :  { %v912_v14 = vmul.f32 %v2034_v57, %v911_v13 }
 0x2a6   :  { %v931_v48 = vmul.f32 %v2036_v62, %v930_v24  ;;  %v960_v24 = vor.u32 1.1754944e-38, %v959_v3 }
 0x2a7   :  { %v2038_v19 = vpop.eup %2037  ;;  %v913_v38 = vadd.f32 %v2034_v57, %v912_v14  ;;  %v3032_v14 = vld [vmem:[#allocation6 + $0x1e8] sm:$0xff] }
 0x2a8   :  { %v932_v40 = vadd.f32 %v2036_v62, %v931_v48  ;;  %v949_v5 = vmul.f32 %v2038_v19, %v947_v55  ;;  %v2040_v23 = vpop.eup %2039  ;;  %vm954_vm13 = vweird.f32 %v2038_v19  ;;  %v3045_v48 = vld [vmem:[#allocation6 + $0x1a0] sm:$0xff] }
 0x2a9   :  { %v917_v47 = vsel %vm916_vm9, %v2034_v57, %v913_v38  ;;  %v957_v57 = vand.u32 2147483647, %v947_v55  ;;  %vm955_vm15 = vmor %vm953_vm14, %vm954_vm13  ;;  %v3037_v55 = vld [vmem:[#allocation6 + $0x1c0] sm:$0xff] }
 0x2aa   :  { %v922_v4 = vsel %vm919_vm11, %v921_v17, %v917_v47  ;;  %v936_v16 = vsel %vm935_vm10, %v2036_v62, %v932_v40  ;;  %v950_v53 = vsub.f32 1.0, %v949_v5  ;;  %v3728_v17 = vld [vmem:[#allocation45_spill] sm:$0xff] }
 0x2ab   :  { %v941_v54 = vsel %vm938_vm12, %v940_v26, %v936_v16  ;;  %v964_v58 = vmul.f32 %v2040_v23, %v922_v4  ;;  %vm958_vm0 = vcmp.eq.f32.partialorder %v957_v57, 8.507059e+37  ;;  %v3729_v26 = vld [vmem:[#allocation43_spill] sm:$0xff] }
 0x2ac   :  { %v963_v61 = vmul.f32 %v941_v54, %v2950_v49  ;;  %v951_v1 = vmul.f32 %v2038_v19, %v950_v53  ;;  %v3029_v49 = vld [vmem:[#allocation6 + $0x1e0] sm:$0xff] }
 0x2ae   :  { %v3026_v37 = vadd.f32 %v964_v58, %v963_v61  ;;  %v952_v51 = vadd.f32 %v2038_v19, %v951_v1  ;;  %v3730_v1 = vld [vmem:[#allocation42_spill] sm:$0xff] }
 0x2b0   :  { %2041 = vtanh.f32 %v3026_v37  ;;  %v956_v13 = vsel %vm955_vm15, %v2038_v19, %v952_v51  ;;  %v3727_v19 = vld [vmem:[#allocation44_spill] sm:$0xff] }
 0x2b1   :  { %v961_v2 = vsel %vm958_vm0, %v960_v24, %v956_v13 }
 0x2b6   :  { %v2042_v62 = vpop.eup %2041 }
 0x2b7   :  { %v967_v12 = vmul.f32 %v2042_v62, %v961_v2 }
 0x2b9   :  { %988 = vmatmul.f32.vlgmr.msrb.gmra.mxu0 %v967_v12  ;;  %1008 = vmatmul.f32.vlgmr.msrb.gmra.mxu1 %v967_v12 }
 0x2ba   :  { %1028 = vmatmul.f32.vlgmr.msra.gmra.mxu2 %v967_v12  ;;  %1048 = vmatmul.f32.vlgmr.msra.gmra.mxu3 %v967_v12 }
 0x2bb   :  { %1274 = vmatpush.msrb.mxu0 %v3029_v49  ;;  %1294 = vmatpush.msrb.mxu1 %v3032_v14 }
 0x2bc   :  { %1314 = vmatpush.msra.mxu2 %v2665_v27  ;;  %1334 = vmatpush.msra.mxu3 %v2667_v28  ;;  %v3053_v27 = vld [vmem:[#allocation6 + $0x180] sm:$0xff]  ;;  %v3056_v28 = vld [vmem:[#allocation6 + $0x188] sm:$0xff] }
 0x2bd   :  { %1275 = vmatpush.msrb.mxu0 %v3037_v55  ;;  %1295 = vmatpush.msrb.mxu1 %v3040_v30 }
 0x2be   :  { %1315 = vmatpush.msra.mxu2 %v2674_v31  ;;  %1335 = vmatpush.msra.mxu3 %v2676_v32  ;;  %v3061_v31 = vld [vmem:[#allocation6 + $0x160] sm:$0xff]  ;;  %v3064_v32 = vld [vmem:[#allocation6 + $0x168] sm:$0xff] }
 0x2bf   :  { %1276 = vmatpush.msrb.mxu0 %v3045_v48  ;;  %1296 = vmatpush.msrb.mxu1 %v3048_v20 }
 0x2c0   :  { %1316 = vmatpush.msra.mxu2 %v2684_v33  ;;  %1336 = vmatpush.msra.mxu3 %v2686_v34  ;;  %v3069_v33 = vld [vmem:[#allocation6 + $0x140] sm:$0xff]  ;;  %v3072_v34 = vld [vmem:[#allocation6 + $0x148] sm:$0xff] }
 0x2c1   :  { %1277 = vmatpush.msrb.mxu0 %v3053_v27  ;;  %1297 = vmatpush.msrb.mxu1 %v3056_v28 }
 0x2c2   :  { %1317 = vmatpush.msra.mxu2 %v2688_v35  ;;  %1337 = vmatpush.msra.mxu3 %v2690_v36  ;;  %v3077_v35 = vld [vmem:[#allocation6 + $0x120] sm:$0xff]  ;;  %v3080_v36 = vld [vmem:[#allocation6 + $0x128] sm:$0xff] }
 0x2c3   :  { %1278 = vmatpush.msrb.mxu0 %v3061_v31  ;;  %1298 = vmatpush.msrb.mxu1 %v3064_v32 }
 0x2c4   :  { %1318 = vmatpush.msra.mxu2 %v2694_v43  ;;  %1338 = vmatpush.msra.mxu3 %v2696_v39  ;;  %v3085_v43 = vld [vmem:[#allocation6 + $0x100] sm:$0xff]  ;;  %v3088_v39 = vld [vmem:[#allocation6 + $0x108] sm:$0xff] }
 0x2c5   :  { %1279 = vmatpush.msrb.mxu0 %v3069_v33  ;;  %1299 = vmatpush.msrb.mxu1 %v3072_v34 }
 0x2c6   :  { %1319 = vmatpush.msra.mxu2 %v2707_v42  ;;  %1339 = vmatpush.msra.mxu3 %v2709_v44  ;;  %v3093_v42 = vld [vmem:[#allocation6 + $0xe0] sm:$0xff]  ;;  %v3096_v44 = vld [vmem:[#allocation6 + $0xe8] sm:$0xff] }
 0x2c7   :  { %1280 = vmatpush.msrb.mxu0 %v3077_v35  ;;  %1300 = vmatpush.msrb.mxu1 %v3080_v36 }
 0x2c8   :  { %1320 = vmatpush.msra.mxu2 %v2713_v45  ;;  %1340 = vmatpush.msra.mxu3 %v2715_v46  ;;  %v3101_v45 = vld [vmem:[#allocation6 + $0xc0] sm:$0xff]  ;;  %v3104_v46 = vld [vmem:[#allocation6 + $0xc8] sm:$0xff] }
 0x2c9   :  { %1281 = vmatpush.msrb.mxu0 %v3085_v43  ;;  %1301 = vmatpush.msrb.mxu1 %v3088_v39 }
 0x2ca   :  { %1321 = vmatpush.msra.mxu2 %v2719_v50  ;;  %1341 = vmatpush.msra.mxu3 %v2721_v52  ;;  %v3109_v50 = vld [vmem:[#allocation6 + $0xa0] sm:$0xff]  ;;  %v3112_v52 = vld [vmem:[#allocation6 + $0xa8] sm:$0xff] }
 0x2cb   :  { %1282 = vmatpush.msrb.mxu0 %v3093_v42  ;;  %1302 = vmatpush.msrb.mxu1 %v3096_v44  ;;  %3715 = vst [vmem:[#allocation13_spill] sm:$0xff] %v3109_v50 }
 0x2cc   :  { %1322 = vmatpush.msra.mxu2 %v2732_v7  ;;  %1342 = vmatpush.msra.mxu3 %v2734_v8  ;;  %3716 = vst [vmem:[#allocation14_spill] sm:$0xff] %v3112_v52  ;;  %v3117_v7 = vld [vmem:[#allocation6 + $0x80] sm:$0xff]  ;;  %v3120_v8 = vld [vmem:[#allocation6 + $0x88] sm:$0xff] }
 0x2cd   :  { %1283 = vmatpush.msrb.mxu0 %v3101_v45  ;;  %1303 = vmatpush.msrb.mxu1 %v3104_v46  ;;  %3717 = vst [vmem:[#allocation25_spill] sm:$0xff] %v3117_v7 }
 0x2ce   :  { %1323 = vmatpush.msra.mxu2 %v2738_v11  ;;  %1343 = vmatpush.msra.mxu3 %v2740_v18  ;;  %3718 = vst [vmem:[#allocation15_spill] sm:$0xff] %v3120_v8  ;;  %v3125_v11 = vld [vmem:[#allocation6 + $0x60] sm:$0xff]  ;;  %v3128_v18 = vld [vmem:[#allocation6 + $0x68] sm:$0xff] }
 0x2cf   :  { %1284 = vmatpush.msrb.mxu0 %v3109_v50  ;;  %1304 = vmatpush.msrb.mxu1 %v3112_v52  ;;  %3719 = vst [vmem:[#allocation16_spill] sm:$0xff] %v3125_v11 }
 0x2d0   :  { %1324 = vmatpush.msra.mxu2 %v2744_v22  ;;  %1344 = vmatpush.msra.mxu3 %v3688_v56  ;;  %3720 = vst [vmem:[#allocation26_spill] sm:$0xff] %v3128_v18  ;;  %v3133_v22 = vld [vmem:[#allocation6 + $0x40] sm:$0xff]  ;;  %v3136_v56 = vld [vmem:[#allocation6 + $0x48] sm:$0xff] }
 0x2d1   :  { %1285 = vmatpush.msrb.mxu0 %v3117_v7  ;;  %1305 = vmatpush.msrb.mxu1 %v3120_v8  ;;  %3721 = vst [vmem:[#allocation27_spill] sm:$0xff] %v3133_v22 }
 0x2d2   :  { %1325 = vmatpush.msra.mxu2 %v3691_v59  ;;  %1345 = vmatpush.msra.mxu3 %v3692_v60  ;;  %3722 = vst [vmem:[#allocation17_spill] sm:$0xff] %v3136_v56  ;;  %v3141_v59 = vld [vmem:[#allocation6 + $0x20] sm:$0xff]  ;;  %v3144_v60 = vld [vmem:[#allocation6 + $0x28] sm:$0xff] }
 0x2d3   :  { %1286 = vmatpush.msrb.mxu0 %v3125_v11  ;;  %1306 = vmatpush.msrb.mxu1 %v3128_v18  ;;  %3723 = vst [vmem:[#allocation18_spill] sm:$0xff] %v3141_v59 }
 0x2d4   :  { %1326 = vmatpush.msra.mxu2 %v3695_v63  ;;  %1346 = vmatpush.msra.mxu3 %v3696_v0  ;;  %3724 = vst [vmem:[#allocation28_spill] sm:$0xff] %v3144_v60  ;;  %v3149_v63 = vld [vmem:[#allocation6] sm:$0xff]  ;;  %v3152_v0 = vld [vmem:[#allocation6 + $0x8] sm:$0xff] }
 0x2d5   :  { %1287 = vmatpush.msrb.mxu0 %v3133_v22  ;;  %1307 = vmatpush.msrb.mxu1 %v3136_v56  ;;  %3725 = vst [vmem:[#allocation29_spill] sm:$0xff] %v3149_v63 }
 0x2d6   :  { %1327 = vmatpush.msra.mxu2 %v3699_v6  ;;  %1347 = vmatpush.msra.mxu3 %v3700_v9  ;;  %3726 = vst [vmem:[#allocation19_spill] sm:$0xff] %v3152_v0 }
 0x2d7   :  { %1288 = vmatpush.msrb.mxu0 %v3141_v59  ;;  %1308 = vmatpush.msrb.mxu1 %v3144_v60 }
 0x2d8   :  { %1328 = vmatpush.msra.mxu2 %v3703_v25  ;;  %1348 = vmatpush.msra.mxu3 %v3704_v29 }
 0x2d9   :  { %1289 = vmatpush.msrb.mxu0 %v3149_v63  ;;  %1309 = vmatpush.msrb.mxu1 %v3152_v0 }
 0x2da   :  { %1329 = vmatpush.msra.mxu2 %v3707_v21  ;;  %1349 = vmatpush.msra.mxu3 %v3708_v41 }
 0x336   :  { %v989_v6 = vpop.f32.mrf.mxu0  ;;  %v1009_v9 = vpop.f32.mrf.mxu1 }
 0x337   :  { %v1052_v38 = vadd.f32 %v989_v6, %v3727_v19  ;;  %v1053_v25 = vadd.f32 %v1009_v9, %v3728_v17 }
 0x339   :  { %v1977_v40 = vmul.f32 -1.442695, %v1052_v38  ;;  %v1978_v29 = vmul.f32 -1.442695, %v1053_v25 }
 0x33b   :  { %2043 = vpow2.f32 %v1977_v40 }
 0x33c   :  { %2045 = vpow2.f32 %v1978_v29 }
 0x33d   :  { %v1049_v5 = vpop.f32.mrf.mxu3  ;;  %v1029_v41 = vpop.f32.mrf.mxu2 }
 0x33e   :  { %v1055_v47 = vadd.f32 %v1049_v5, %v3729_v26  ;;  %v1054_v51 = vadd.f32 %v1029_v41, %v3730_v1 }
 0x340   :  { %v1979_v23 = vmul.f32 -1.442695, %v1055_v47 }
 0x341   :  { %v2044_v4 = vpop.eup %2043 }
 0x342   :  { %v2046_v16 = vpop.eup %2045  ;;  %v1059_v53 = vadd.f32 1.0, %v2044_v4  ;;  %2047 = vpow2.f32 %v1979_v23 }
 0x343   :  { %v1078_v21 = vadd.f32 1.0, %v2046_v16 }
 0x344   :  { %2049 = vrcp.f32 %v1059_v53  ;;  %v1071_v2 = vand.u32 2147483648, %v1059_v53  ;;  %v1069_v9 = vand.u32 2147483647, %v1059_v53  ;;  %vm1065_vm3 = vweird.f32 %v1059_v53 }
 0x345   :  { %2051 = vrcp.f32 %v1078_v21  ;;  %v1090_v12 = vand.u32 2147483648, %v1078_v21  ;;  %v1088_v38 = vand.u32 2147483647, %v1078_v21  ;;  %vm1084_vm4 = vweird.f32 %v1078_v21 }
 0x346   :  { %v1072_v40 = vor.u32 1.1754944e-38, %v1071_v2  ;;  %vm1070_vm7 = vcmp.eq.f32.partialorder %v1069_v9, 8.507059e+37  ;;  %v3178_v9 = vld [vmem:[#allocation6 + $0x1d8] sm:$0xff] }
 0x347   :  { %v1091_v26 = vor.u32 1.1754944e-38, %v1090_v12  ;;  %vm1089_vm8 = vcmp.eq.f32.partialorder %v1088_v38, 8.507059e+37  ;;  %v3186_v38 = vld [vmem:[#allocation6 + $0x1b8] sm:$0xff] }
 0x348   :  { %v2048_v54 = vpop.eup %2047 }
 0x349   :  { %v1098_v58 = vadd.f32 1.0, %v2048_v54 }
 0x34a   :  { %v2050_v61 = vpop.eup %2049 }
 0x34b   :  { %v2052_v3 = vpop.eup %2051  ;;  %v1061_v57 = vmul.f32 %v2050_v61, %v1059_v53  ;;  %2053 = vrcp.f32 %v1098_v58  ;;  %vm1066_vm1 = vweird.f32 %v2050_v61  ;;  %vm1104_vm10 = vweird.f32 %v1098_v58 }
 0x34c   :  { %v1080_v13 = vmul.f32 %v2052_v3, %v1078_v21  ;;  %2055 = vtanh.f32 %v1054_v51  ;;  %vm1085_vm2 = vweird.f32 %v2052_v3  ;;  %vm1067_vm5 = vmor %vm1065_vm3, %vm1066_vm1 }
 0x34d   :  { %v1062_v24 = vsub.f32 1.0, %v1061_v57  ;;  %vm1086_vm6 = vmor %vm1084_vm4, %vm1085_vm2 }
 0x34e   :  { %v1081_v62 = vsub.f32 1.0, %v1080_v13  ;;  %v1110_v13 = vand.u32 2147483648, %v1098_v58 }
 0x34f   :  { %v1063_v6 = vmul.f32 %v2050_v61, %v1062_v24 }
 0x350   :  { %v1082_v19 = vmul.f32 %v2052_v3, %v1081_v62  ;;  %v1111_v62 = vor.u32 1.1754944e-38, %v1110_v13  ;;  %v3255_v13 = vld [vmem:[#allocation6 + $0x90] sm:$0xff] }
 0x351   :  { %v2054_v17 = vpop.eup %2053  ;;  %v1064_v25 = vadd.f32 %v2050_v61, %v1063_v6  ;;  %v3175_v6 = vld [vmem:[#allocation6 + $0x1d0] sm:$0xff]  ;;  %3735 = vst [vmem:[#allocation22_spill] sm:$0xff] %v3255_v13 }
 0x352   :  { %v1083_v29 = vadd.f32 %v2052_v3, %v1082_v19  ;;  %v1100_v5 = vmul.f32 %v2054_v17, %v1098_v58  ;;  %v2056_v23 = vpop.eup %2055  ;;  %vm1105_vm9 = vweird.f32 %v2054_v17  ;;  %v3183_v19 = vld [vmem:[#allocation6 + $0x1b0] sm:$0xff] }
 0x353   :  { %v1068_v47 = vsel %vm1067_vm5, %v2050_v61, %v1064_v25  ;;  %v1108_v61 = vand.u32 2147483647, %v1098_v58  ;;  %vm1106_vm11 = vmor %vm1104_vm10, %vm1105_vm9  ;;  %v3170_v58 = vld [vmem:[#allocation6 + $0x1f8] sm:$0xff] }
 0x354   :  { %v1073_v4 = vsel %vm1070_vm7, %v1072_v40, %v1068_v47  ;;  %v1087_v16 = vsel %vm1086_vm6, %v2052_v3, %v1083_v29  ;;  %v1101_v41 = vsub.f32 1.0, %v1100_v5  ;;  %v3194_v25 = vld [vmem:[#allocation6 + $0x198] sm:$0xff]  ;;  %v3199_v40 = vld [vmem:[#allocation6 + $0x170] sm:$0xff] }
 0x355   :  { %v1092_v54 = vsel %vm1089_vm8, %v1091_v26, %v1087_v16  ;;  %v1115_v1 = vmul.f32 %v2056_v23, %v1073_v4  ;;  %vm1109_vm12 = vcmp.eq.f32.partialorder %v1108_v61, 8.507059e+37  ;;  %v3202_v29 = vld [vmem:[#allocation6 + $0x178] sm:$0xff]  ;;  %v3207_v5 = vld [vmem:[#allocation6 + $0x150] sm:$0xff] }
 0x356   :  { %v1114_v51 = vmul.f32 %v1092_v54, %v3026_v37  ;;  %v1102_v57 = vmul.f32 %v2054_v17, %v1101_v41  ;;  %v3167_v37 = vld [vmem:[#allocation6 + $0x1f0] sm:$0xff]  ;;  %v3210_v26 = vld [vmem:[#allocation6 + $0x158] sm:$0xff] }
 0x357   :  { %v3215_v47 = vld [vmem:[#allocation6 + $0x130] sm:$0xff]  ;;  %v3218_v23 = vld [vmem:[#allocation6 + $0x138] sm:$0xff] }
 0x358   :  { %v3162_v53 = vadd.f32 %v1115_v1, %v1114_v51  ;;  %v1103_v21 = vadd.f32 %v2054_v17, %v1102_v57  ;;  %v3223_v4 = vld [vmem:[#allocation6 + $0x110] sm:$0xff]  ;;  %v3226_v16 = vld [vmem:[#allocation6 + $0x118] sm:$0xff] }
 0x359   :  { %v3231_v41 = vld [vmem:[#allocation6 + $0xf0] sm:$0xff]  ;;  %v3234_v54 = vld [vmem:[#allocation6 + $0xf8] sm:$0xff] }
 0x35a   :  { %2057 = vtanh.f32 %v3162_v53  ;;  %v1107_v24 = vsel %vm1106_vm11, %v2054_v17, %v1103_v21  ;;  %v3191_v17 = vld [vmem:[#allocation6 + $0x190] sm:$0xff]  ;;  %v3242_v51 = vld [vmem:[#allocation6 + $0xd8] sm:$0xff] }
 0x35b   :  { %v1112_v2 = vsel %vm1109_vm12, %v1111_v62, %v1107_v24  ;;  %v3239_v1 = vld [vmem:[#allocation6 + $0xd0] sm:$0xff]  ;;  %3732 = vst [vmem:[#allocation30_spill] sm:$0xff] %v3242_v51  ;;  %v3250_v21 = vld [vmem:[#allocation6 + $0xb8] sm:$0xff] }
 0x35c   :  { %3731 = vst [vmem:[#allocation20_spill] sm:$0xff] %v3239_v1  ;;  %v3247_v57 = vld [vmem:[#allocation6 + $0xb0] sm:$0xff]  ;;  %v3258_v61 = vld [vmem:[#allocation6 + $0x98] sm:$0xff] }
 0x35d   :  { %3733 = vst [vmem:[#allocation31_spill] sm:$0xff] %v3247_v57  ;;  %v3263_v24 = vld [vmem:[#allocation6 + $0x70] sm:$0xff]  ;;  %v3266_v62 = vld [vmem:[#allocation6 + $0x78] sm:$0xff] }
 0x35e   :  { %3734 = vst [vmem:[#allocation21_spill] sm:$0xff] %v3250_v21 }
 0x35f   :  { %3736 = vst [vmem:[#allocation32_spill] sm:$0xff] %v3258_v61 }
 0x360   :  { %v2058_v3 = vpop.eup %2057  ;;  %3737 = vst [vmem:[#allocation33_spill] sm:$0xff] %v3263_v24 }
 0x361   :  { %v1118_v12 = vmul.f32 %v2058_v3, %v1112_v2  ;;  %3738 = vst [vmem:[#allocation23_spill] sm:$0xff] %v3266_v62  ;;  %v3271_v3 = vld [vmem:[#allocation6 + $0x50] sm:$0xff]  ;;  %v3274_v2 = vld [vmem:[#allocation6 + $0x58] sm:$0xff] }
 0x362   :  { %3739 = vst [vmem:[#allocation24_spill] sm:$0xff] %v3271_v3 }
 0x363   :  { %1139 = vmatmul.f32.vlgmr.msra.gmra.mxu0 %v1118_v12  ;;  %1159 = vmatmul.f32.vlgmr.msra.gmra.mxu1 %v1118_v12  ;;  %3740 = vst [vmem:[#allocation34_spill] sm:$0xff] %v3274_v2 }
 0x364   :  { %1179 = vmatmul.f32.vlgmr.msrb.gmra.mxu2 %v1118_v12  ;;  %1199 = vmatmul.f32.vlgmr.msrb.gmra.mxu3 %v1118_v12  ;;  %v3279_v12 = vld [vmem:[#allocation6 + $0x30] sm:$0xff] }
 0x365   :  { %1425 = vmatpush.msra.mxu0 %v3029_v49  ;;  %1445 = vmatpush.msra.mxu1 %v3032_v14  ;;  %3741 = vst [vmem:[#allocation35_spill] sm:$0xff] %v3279_v12 }
 0x366   :  { %1465 = vmatpush.msrb.mxu2 %v3167_v37  ;;  %1485 = vmatpush.msrb.mxu3 %v3170_v58 }
 0x367   :  { %1426 = vmatpush.msra.mxu0 %v3037_v55  ;;  %1446 = vmatpush.msra.mxu1 %v3040_v30 }
 0x368   :  { %1466 = vmatpush.msrb.mxu2 %v3175_v6  ;;  %1486 = vmatpush.msrb.mxu3 %v3178_v9 }
 0x369   :  { %1427 = vmatpush.msra.mxu0 %v3045_v48  ;;  %1447 = vmatpush.msra.mxu1 %v3048_v20 }
 0x36a   :  { %1467 = vmatpush.msrb.mxu2 %v3183_v19  ;;  %1487 = vmatpush.msrb.mxu3 %v3186_v38 }
 0x36b   :  { %1428 = vmatpush.msra.mxu0 %v3053_v27  ;;  %1448 = vmatpush.msra.mxu1 %v3056_v28 }
 0x36c   :  { %1468 = vmatpush.msrb.mxu2 %v3191_v17  ;;  %1488 = vmatpush.msrb.mxu3 %v3194_v25 }
 0x36d   :  { %1429 = vmatpush.msra.mxu0 %v3061_v31  ;;  %1449 = vmatpush.msra.mxu1 %v3064_v32 }
 0x36e   :  { %1469 = vmatpush.msrb.mxu2 %v3199_v40  ;;  %1489 = vmatpush.msrb.mxu3 %v3202_v29 }
 0x36f   :  { %1430 = vmatpush.msra.mxu0 %v3069_v33  ;;  %1450 = vmatpush.msra.mxu1 %v3072_v34 }
 0x370   :  { %1470 = vmatpush.msrb.mxu2 %v3207_v5  ;;  %1490 = vmatpush.msrb.mxu3 %v3210_v26 }
 0x371   :  { %1431 = vmatpush.msra.mxu0 %v3077_v35  ;;  %1451 = vmatpush.msra.mxu1 %v3080_v36 }
 0x372   :  { %1471 = vmatpush.msrb.mxu2 %v3215_v47  ;;  %1491 = vmatpush.msrb.mxu3 %v3218_v23 }
 0x373   :  { %1432 = vmatpush.msra.mxu0 %v3085_v43  ;;  %1452 = vmatpush.msra.mxu1 %v3088_v39 }
 0x374   :  { %1472 = vmatpush.msrb.mxu2 %v3223_v4  ;;  %1492 = vmatpush.msrb.mxu3 %v3226_v16 }
 0x375   :  { %1433 = vmatpush.msra.mxu0 %v3093_v42  ;;  %1453 = vmatpush.msra.mxu1 %v3096_v44 }
 0x376   :  { %1473 = vmatpush.msrb.mxu2 %v3231_v41  ;;  %1493 = vmatpush.msrb.mxu3 %v3234_v54 }
 0x377   :  { %1434 = vmatpush.msra.mxu0 %v3101_v45  ;;  %1454 = vmatpush.msra.mxu1 %v3104_v46 }
 0x378   :  { %1474 = vmatpush.msrb.mxu2 %v3239_v1  ;;  %1494 = vmatpush.msrb.mxu3 %v3242_v51 }
 0x379   :  { %1435 = vmatpush.msra.mxu0 %v3109_v50  ;;  %1455 = vmatpush.msra.mxu1 %v3112_v52 }
 0x37a   :  { %1475 = vmatpush.msrb.mxu2 %v3247_v57  ;;  %1495 = vmatpush.msrb.mxu3 %v3250_v21 }
 0x37b   :  { %1436 = vmatpush.msra.mxu0 %v3117_v7  ;;  %1456 = vmatpush.msra.mxu1 %v3120_v8 }
 0x37c   :  { %1476 = vmatpush.msrb.mxu2 %v3255_v13  ;;  %1496 = vmatpush.msrb.mxu3 %v3258_v61 }
 0x37d   :  { %1437 = vmatpush.msra.mxu0 %v3125_v11  ;;  %1457 = vmatpush.msra.mxu1 %v3128_v18 }
 0x37e   :  { %1477 = vmatpush.msrb.mxu2 %v3263_v24  ;;  %1497 = vmatpush.msrb.mxu3 %v3266_v62 }
 0x37f   :  { %1438 = vmatpush.msra.mxu0 %v3133_v22  ;;  %1458 = vmatpush.msra.mxu1 %v3136_v56  ;;  %v3746_v56 = vld [vmem:[#allocation49_spill] sm:$0xff] }
 0x380   :  { %1478 = vmatpush.msrb.mxu2 %v3271_v3  ;;  %1498 = vmatpush.msrb.mxu3 %v3274_v2  ;;  %v3290_v2 = vld [vmem:[#allocation6 + $0x18] sm:$0xff]  ;;  %v3745_v3 = vld [vmem:[#allocation48_spill] sm:$0xff] }
 0x381   :  { %1439 = vmatpush.msra.mxu0 %v3141_v59  ;;  %1459 = vmatpush.msra.mxu1 %v3144_v60  ;;  %3744 = vst [vmem:[#allocation39_spill] sm:$0xff] %v3290_v2 }
 0x382   :  { %1479 = vmatpush.msrb.mxu2 %v3279_v12  ;;  %1499 = vmatpush.msrb.mxu3 %v3282_v10 }
 0x383   :  { %1440 = vmatpush.msra.mxu0 %v3149_v63  ;;  %1460 = vmatpush.msra.mxu1 %v3152_v0  ;;  %v3747_v0 = vld [vmem:[#allocation47_spill] sm:$0xff] }
 0x384   :  { %1480 = vmatpush.msrb.mxu2 %v3287_v15  ;;  %1500 = vmatpush.msrb.mxu3 %v3290_v2 }
 0x3e0   :  { %v1140_v60 = vpop.f32.mrf.mxu0  ;;  %v1160_v59 = vpop.f32.mrf.mxu1 }
 0x3e1   :  { %v1203_v12 = vadd.f32 %v1140_v60, %v3745_v3  ;;  %v1204_v22 = vadd.f32 %v1160_v59, %v3746_v56  ;;  %v3748_v56 = vld [vmem:[#allocation46_spill] sm:$0xff] }
 0x3e3   :  { %v1980_v62 = vmul.f32 -1.442695, %v1203_v12  ;;  %v1981_v10 = vmul.f32 -1.442695, %v1204_v22 }
 0x3e5   :  { %2059 = vpow2.f32 %v1980_v62 }
 0x3e6   :  { %2061 = vpow2.f32 %v1981_v10 }
 0x3e7   :  { %v1200_v63 = vpop.f32.mrf.mxu3  ;;  %v1180_v2 = vpop.f32.mrf.mxu2 }
 0x3e8   :  { %v1206_v24 = vadd.f32 %v1200_v63, %v3747_v0  ;;  %v1205_v59 = vadd.f32 %v1180_v2, %v3748_v56 }
 0x3ea   :  { %v1982_v18 = vmul.f32 -1.442695, %v1206_v24 }
 0x3eb   :  { %v2060_v11 = vpop.eup %2059 }
 0x3ec   :  { %v2062_v15 = vpop.eup %2061  ;;  %v1210_v61 = vadd.f32 1.0, %v2060_v11  ;;  %2063 = vpow2.f32 %v1982_v18 }
 0x3ed   :  { %v1229_v13 = vadd.f32 1.0, %v2062_v15 }
 0x3ee   :  { %2065 = vrcp.f32 %v1210_v61  ;;  %v1222_v0 = vand.u32 2147483648, %v1210_v61  ;;  %v1220_v15 = vand.u32 2147483647, %v1210_v61  ;;  %vm1216_vm15 = vweird.f32 %v1210_v61 }
 0x3ef   :  { %2067 = vrcp.f32 %v1229_v13  ;;  %v1241_v24 = vand.u32 2147483648, %v1229_v13  ;;  %v1239_v7 = vand.u32 2147483647, %v1229_v13  ;;  %vm1235_vm0 = vweird.f32 %v1229_v13 }
 0x3f0   :  { %v1223_v2 = vor.u32 1.1754944e-38, %v1222_v0  ;;  %vm1221_vm3 = vcmp.eq.f32.partialorder %v1220_v15, 8.507059e+37 }
 0x3f1   :  { %vm1240_vm4 = vcmp.eq.f32.partialorder %v1239_v7, 8.507059e+37 }
 0x3f2   :  { %v2064_v8 = vpop.eup %2063 }
 0x3f3   :  { %v1249_v60 = vadd.f32 1.0, %v2064_v8 }
 0x3f4   :  { %v2066_v3 = vpop.eup %2065 }
 0x3f5   :  { %v2068_v22 = vpop.eup %2067  ;;  %v1212_v62 = vmul.f32 %v2066_v3, %v1210_v61  ;;  %2069 = vrcp.f32 %v1249_v60  ;;  %vm1217_vm13 = vweird.f32 %v2066_v3  ;;  %v1261_v0 = vand.u32 2147483648, %v1249_v60 }
 0x3f6   :  { %v1231_v10 = vmul.f32 %v2068_v22, %v1229_v13  ;;  %2071 = vtanh.f32 %v1205_v59  ;;  %vm1236_vm14 = vweird.f32 %v2068_v22  ;;  %vm1218_vm1 = vmor %vm1216_vm15, %vm1217_vm13  ;;  %vm1255_vm6 = vweird.f32 %v1249_v60 }
 0x3f7   :  { %v1213_v12 = vsub.f32 1.0, %v1212_v62  ;;  %vm1237_vm2 = vmor %vm1235_vm0, %vm1236_vm14  ;;  %v1242_v62 = vor.u32 1.1754944e-38, %v1241_v24  ;;  %v1262_v15 = vor.u32 1.1754944e-38, %v1261_v0  ;;  %v3767_v0 = vld [vmem:[#allocation18_spill] sm:$0xff] }
 0x3f8   :  { %v1232_v63 = vsub.f32 1.0, %v1231_v10 }
 0x3f9   :  { %v1214_v11 = vmul.f32 %v2066_v3, %v1213_v12 }
 0x3fa   :  { %v1233_v18 = vmul.f32 %v2068_v22, %v1232_v63 }
 0x3fb   :  { %v2070_v21 = vpop.eup %2069  ;;  %v1215_v8 = vadd.f32 %v2066_v3, %v1214_v11 }
 0x3fc   :  { %v1234_v56 = vadd.f32 %v2068_v22, %v1233_v18  ;;  %v1251_v57 = vmul.f32 %v2070_v21, %v1249_v60  ;;  %v2072_v59 = vpop.eup %2071  ;;  %vm1256_vm5 = vweird.f32 %v2070_v21  ;;  %v3756_v18 = vld [vmem:[#allocation15_spill] sm:$0xff] }
 0x3fd   :  { %v1219_v10 = vsel %vm1218_vm1, %v2066_v3, %v1215_v8  ;;  %v1259_v3 = vand.u32 2147483647, %v1249_v60  ;;  %vm1257_vm7 = vmor %vm1255_vm6, %vm1256_vm5  ;;  %v3755_v60 = vld [vmem:[#allocation25_spill] sm:$0xff]  ;;  %v3757_v8 = vld [vmem:[#allocation22_spill] sm:$0xff] }
 0x3fe   :  { %v1224_v52 = vsel %vm1221_vm3, %v1223_v2, %v1219_v10  ;;  %v1238_v12 = vsel %vm1237_vm2, %v2068_v22, %v1234_v56  ;;  %v1252_v50 = vsub.f32 1.0, %v1251_v57  ;;  %v3758_v2 = vld [vmem:[#allocation32_spill] sm:$0xff]  ;;  %v3761_v10 = vld [vmem:[#allocation33_spill] sm:$0xff] }
 0x3ff   :  { %v1243_v63 = vsel %vm1240_vm4, %v1242_v62, %v1238_v12  ;;  %v1266_v51 = vmul.f32 %v2072_v59, %v1224_v52  ;;  %vm1260_vm8 = vcmp.eq.f32.partialorder %v1259_v3, 8.507059e+37  ;;  %v3750_v52 = vld [vmem:[#allocation30_spill] sm:$0xff]  ;;  %v3759_v56 = vld [vmem:[#allocation16_spill] sm:$0xff]  ;;  %v3762_v59 = vld [vmem:[#allocation23_spill] sm:$0xff] }
 0x400   :  { %v1265_v1 = vmul.f32 %v1243_v63, %v3162_v53  ;;  %v1253_v11 = vmul.f32 %v2070_v21, %v1252_v50  ;;  %v3749_v50 = vld [vmem:[#allocation20_spill] sm:$0xff]  ;;  %v3751_v53 = vld [vmem:[#allocation13_spill] sm:$0xff]  ;;  %v3760_v62 = vld [vmem:[#allocation26_spill] sm:$0xff] }
 0x401   :  { %v3763_v12 = vld [vmem:[#allocation27_spill] sm:$0xff]  ;;  %v3764_v63 = vld [vmem:[#allocation17_spill] sm:$0xff]  ;;  %v3768_v3 = vld [vmem:[#allocation28_spill] sm:$0xff] }
 0x402   :  { %v3298_v61 = vadd.f32 %v1266_v51, %v1265_v1  ;;  %v1254_v13 = vadd.f32 %v2070_v21, %v1253_v11  ;;  %v3752_v1 = vld [vmem:[#allocation14_spill] sm:$0xff]  ;;  %v3753_v51 = vld [vmem:[#allocation31_spill] sm:$0xff]  ;;  %v3765_v11 = vld [vmem:[#allocation24_spill] sm:$0xff] }
 0x404   :  { %2073 = vtanh.f32 %v3298_v61  ;;  %v1258_v24 = vsel %vm1257_vm7, %v2070_v21, %v1254_v13  ;;  %v3754_v21 = vld [vmem:[#allocation21_spill] sm:$0xff]  ;;  %v3766_v13 = vld [vmem:[#allocation34_spill] sm:$0xff] }
 0x405   :  { %v1263_v57 = vsel %vm1260_vm8, %v1262_v15, %v1258_v24  ;;  %v3769_v24 = vld [vmem:[#allocation35_spill] sm:$0xff]  ;;  %v3770_v15 = vld [vmem:[#allocation40_spill] sm:$0xff] }
 0x40a   :  { %v2074_v7 = vpop.eup %2073 }
 0x40b   :  { %v1269_v22 = vmul.f32 %v2074_v7, %v1263_v57  ;;  %v3771_v7 = vld [vmem:[#allocation29_spill] sm:$0xff]  ;;  %v3772_v57 = vld [vmem:[#allocation19_spill] sm:$0xff] }
 0x40d   :  { %1290 = vmatmul.f32.vlgmr.msrb.gmra.mxu0 %v1269_v22  ;;  %1310 = vmatmul.f32.vlgmr.msrb.gmra.mxu1 %v1269_v22 }
 0x40e   :  { %1330 = vmatmul.f32.vlgmr.msra.gmra.mxu2 %v1269_v22  ;;  %1350 = vmatmul.f32.vlgmr.msra.gmra.mxu3 %v1269_v22  ;;  %v3773_v22 = vld [vmem:[#allocation41_spill] sm:$0xff] }
 0x40f   :  { %1576 = vmatpush.msrb.mxu0 %v3029_v49  ;;  %1596 = vmatpush.msrb.mxu1 %v3032_v14 }
 0x410   :  { %1616 = vmatpush.msra.mxu2 %v3167_v37  ;;  %1636 = vmatpush.msra.mxu3 %v3170_v58 }
 0x411   :  { %1577 = vmatpush.msrb.mxu0 %v3037_v55  ;;  %1597 = vmatpush.msrb.mxu1 %v3040_v30 }
 0x412   :  { %1617 = vmatpush.msra.mxu2 %v3175_v6  ;;  %1637 = vmatpush.msra.mxu3 %v3178_v9 }
 0x413   :  { %1578 = vmatpush.msrb.mxu0 %v3045_v48  ;;  %1598 = vmatpush.msrb.mxu1 %v3048_v20 }
 0x414   :  { %1618 = vmatpush.msra.mxu2 %v3183_v19  ;;  %1638 = vmatpush.msra.mxu3 %v3186_v38 }
 0x415   :  { %1579 = vmatpush.msrb.mxu0 %v3053_v27  ;;  %1599 = vmatpush.msrb.mxu1 %v3056_v28 }
 0x416   :  { %1619 = vmatpush.msra.mxu2 %v3191_v17  ;;  %1639 = vmatpush.msra.mxu3 %v3194_v25 }
 0x417   :  { %1580 = vmatpush.msrb.mxu0 %v3061_v31  ;;  %1600 = vmatpush.msrb.mxu1 %v3064_v32 }
 0x418   :  { %1620 = vmatpush.msra.mxu2 %v3199_v40  ;;  %1640 = vmatpush.msra.mxu3 %v3202_v29 }
 0x419   :  { %1581 = vmatpush.msrb.mxu0 %v3069_v33  ;;  %1601 = vmatpush.msrb.mxu1 %v3072_v34 }
 0x41a   :  { %1621 = vmatpush.msra.mxu2 %v3207_v5  ;;  %1641 = vmatpush.msra.mxu3 %v3210_v26 }
 0x41b   :  { %1582 = vmatpush.msrb.mxu0 %v3077_v35  ;;  %1602 = vmatpush.msrb.mxu1 %v3080_v36 }
 0x41c   :  { %1622 = vmatpush.msra.mxu2 %v3215_v47  ;;  %1642 = vmatpush.msra.mxu3 %v3218_v23 }
 0x41d   :  { %1583 = vmatpush.msrb.mxu0 %v3085_v43  ;;  %1603 = vmatpush.msrb.mxu1 %v3088_v39 }
 0x41e   :  { %1623 = vmatpush.msra.mxu2 %v3223_v4  ;;  %1643 = vmatpush.msra.mxu3 %v3226_v16 }
 0x41f   :  { %1584 = vmatpush.msrb.mxu0 %v3093_v42  ;;  %1604 = vmatpush.msrb.mxu1 %v3096_v44 }
 0x420   :  { %1624 = vmatpush.msra.mxu2 %v3231_v41  ;;  %1644 = vmatpush.msra.mxu3 %v3234_v54 }
 0x421   :  { %1585 = vmatpush.msrb.mxu0 %v3101_v45  ;;  %1605 = vmatpush.msrb.mxu1 %v3104_v46 }
 0x422   :  { %1625 = vmatpush.msra.mxu2 %v3749_v50  ;;  %1645 = vmatpush.msra.mxu3 %v3750_v52 }
 0x423   :  { %1586 = vmatpush.msrb.mxu0 %v3751_v53  ;;  %1606 = vmatpush.msrb.mxu1 %v3752_v1 }
 0x424   :  { %1626 = vmatpush.msra.mxu2 %v3753_v51  ;;  %1646 = vmatpush.msra.mxu3 %v3754_v21 }
 0x425   :  { %1587 = vmatpush.msrb.mxu0 %v3755_v60  ;;  %1607 = vmatpush.msrb.mxu1 %v3756_v18 }
 0x426   :  { %1627 = vmatpush.msra.mxu2 %v3757_v8  ;;  %1647 = vmatpush.msra.mxu3 %v3758_v2 }
 0x427   :  { %1588 = vmatpush.msrb.mxu0 %v3759_v56  ;;  %1608 = vmatpush.msrb.mxu1 %v3760_v62 }
 0x428   :  { %1628 = vmatpush.msra.mxu2 %v3761_v10  ;;  %1648 = vmatpush.msra.mxu3 %v3762_v59  ;;  %v3775_v59 = vld [vmem:[#allocation52_spill] sm:$0xff]  ;;  %v3776_v10 = vld [vmem:[#allocation53_spill] sm:$0xff] }
 0x429   :  { %1589 = vmatpush.msrb.mxu0 %v3763_v12  ;;  %1609 = vmatpush.msrb.mxu1 %v3764_v63  ;;  %v3774_v12 = vld [vmem:[#allocation39_spill] sm:$0xff] }
 0x42a   :  { %1629 = vmatpush.msra.mxu2 %v3765_v11  ;;  %1649 = vmatpush.msra.mxu3 %v3766_v13 }
 0x42b   :  { %1590 = vmatpush.msrb.mxu0 %v3767_v0  ;;  %1610 = vmatpush.msrb.mxu1 %v3768_v3 }
 0x42c   :  { %1630 = vmatpush.msra.mxu2 %v3769_v24  ;;  %1650 = vmatpush.msra.mxu3 %v3770_v15  ;;  %v3777_v15 = vld [vmem:[#allocation51_spill] sm:$0xff] }
 0x42d   :  { %1591 = vmatpush.msrb.mxu0 %v3771_v7  ;;  %1611 = vmatpush.msrb.mxu1 %v3772_v57 }
 0x42e   :  { %1631 = vmatpush.msra.mxu2 %v3773_v22  ;;  %1651 = vmatpush.msra.mxu3 %v3774_v12 }
 0x48a   :  { %v1291_v63 = vpop.f32.mrf.mxu0  ;;  %v1311_v11 = vpop.f32.mrf.mxu1 }
 0x48b   :  { %v1354_v13 = vadd.f32 %v1291_v63, %v3775_v59  ;;  %v1355_v0 = vadd.f32 %v1311_v11, %v3776_v10  ;;  %v3778_v10 = vld [vmem:[#allocation50_spill] sm:$0xff] }
 0x48d   :  { %v1983_v62 = vmul.f32 -1.442695, %v1354_v13  ;;  %v1984_v3 = vmul.f32 -1.442695, %v1355_v0 }
 0x48f   :  { %2075 = vpow2.f32 %v1983_v62 }
 0x490   :  { %2077 = vpow2.f32 %v1984_v3 }
 0x491   :  { %v1351_v24 = vpop.f32.mrf.mxu3  ;;  %v1331_v12 = vpop.f32.mrf.mxu2 }
 0x492   :  { %v1357_v56 = vadd.f32 %v1351_v24, %v3777_v15  ;;  %v1356_v11 = vadd.f32 %v1331_v12, %v3778_v10 }
 0x494   :  { %v1985_v7 = vmul.f32 -1.442695, %v1357_v56 }
 0x495   :  { %v2076_v2 = vpop.eup %2075 }
 0x496   :  { %v2078_v57 = vpop.eup %2077  ;;  %v1361_v8 = vadd.f32 1.0, %v2076_v2  ;;  %2079 = vpow2.f32 %v1985_v7 }
 0x497   :  { %v1380_v22 = vadd.f32 1.0, %v2078_v57 }
 0x498   :  { %2081 = vrcp.f32 %v1361_v8  ;;  %v1373_v56 = vand.u32 2147483648, %v1361_v8  ;;  %v1371_v7 = vand.u32 2147483647, %v1361_v8  ;;  %vm1367_vm11 = vweird.f32 %v1361_v8 }
 0x499   :  { %2083 = vrcp.f32 %v1380_v22  ;;  %v1392_v15 = vand.u32 2147483648, %v1380_v22  ;;  %v1390_v60 = vand.u32 2147483647, %v1380_v22  ;;  %vm1386_vm12 = vweird.f32 %v1380_v22 }
 0x49a   :  { %v1374_v12 = vor.u32 1.1754944e-38, %v1373_v56  ;;  %vm1372_vm15 = vcmp.eq.f32.partialorder %v1371_v7, 8.507059e+37 }
 0x49b   :  { %vm1391_vm0 = vcmp.eq.f32.partialorder %v1390_v60, 8.507059e+37 }
 0x49c   :  { %v2080_v18 = vpop.eup %2079 }
 0x49d   :  { %v1400_v59 = vadd.f32 1.0, %v2080_v18 }
 0x49e   :  { %v2082_v63 = vpop.eup %2081 }
 0x49f   :  { %v2084_v13 = vpop.eup %2083  ;;  %v1363_v62 = vmul.f32 %v2082_v63, %v1361_v8  ;;  %2085 = vrcp.f32 %v1400_v59  ;;  %vm1368_vm9 = vweird.f32 %v2082_v63  ;;  %v1412_v56 = vand.u32 2147483648, %v1400_v59 }
 0x4a0   :  { %v1382_v0 = vmul.f32 %v2084_v13, %v1380_v22  ;;  %2087 = vtanh.f32 %v1356_v11  ;;  %vm1387_vm10 = vweird.f32 %v2084_v13  ;;  %vm1369_vm13 = vmor %vm1367_vm11, %vm1368_vm9  ;;  %vm1406_vm2 = vweird.f32 %v1400_v59 }
 0x4a1   :  { %v1364_v3 = vsub.f32 1.0, %v1363_v62  ;;  %vm1388_vm14 = vmor %vm1386_vm12, %vm1387_vm10  ;;  %v1393_v62 = vor.u32 1.1754944e-38, %v1392_v15  ;;  %v1413_v7 = vor.u32 1.1754944e-38, %v1412_v56 }
 0x4a2   :  { %v1383_v24 = vsub.f32 1.0, %v1382_v0 }
 0x4a3   :  { %v1365_v2 = vmul.f32 %v2082_v63, %v1364_v3 }
 0x4a4   :  { %v1384_v57 = vmul.f32 %v2084_v13, %v1383_v24 }
 0x4a5   :  { %v2086_v21 = vpop.eup %2085  ;;  %v1366_v18 = vadd.f32 %v2082_v63, %v1365_v2 }
 0x4a6   :  { %v1385_v10 = vadd.f32 %v2084_v13, %v1384_v57  ;;  %v1402_v51 = vmul.f32 %v2086_v21, %v1400_v59  ;;  %v2088_v11 = vpop.eup %2087  ;;  %vm1407_vm1 = vweird.f32 %v2086_v21 }
 0x4a7   :  { %v1370_v0 = vsel %vm1369_vm13, %v2082_v63, %v1366_v18  ;;  %v1410_v63 = vand.u32 2147483647, %v1400_v59  ;;  %vm1408_vm3 = vmor %vm1406_vm2, %vm1407_vm1  ;;  %v3808_v18 = vld [vmem:[#allocation54_spill] sm:$0xff] }
 0x4a8   :  { %v1375_v1 = vsel %vm1372_vm15, %v1374_v12, %v1370_v0  ;;  %v1389_v3 = vsel %vm1388_vm14, %v2084_v13, %v1385_v10  ;;  %v1403_v53 = vsub.f32 1.0, %v1402_v51 }
 0x4a9   :  { %v1394_v24 = vsel %vm1391_vm0, %v1393_v62, %v1389_v3  ;;  %v1417_v52 = vmul.f32 %v2088_v11, %v1375_v1  ;;  %vm1411_vm4 = vcmp.eq.f32.partialorder %v1410_v63, 8.507059e+37 }
 0x4aa   :  { %v1416_v50 = vmul.f32 %v1394_v24, %v3298_v61  ;;  %v1404_v2 = vmul.f32 %v2086_v21, %v1403_v53 }
 0x4ac   :  { %v3370_v8 = vadd.f32 %v1417_v52, %v1416_v50  ;;  %v1405_v22 = vadd.f32 %v2086_v21, %v1404_v2 }
 0x4ae   :  { %2089 = vtanh.f32 %v3370_v8  ;;  %v1409_v15 = vsel %vm1408_vm3, %v2086_v21, %v1405_v22 }
 0x4af   :  { %v1414_v51 = vsel %vm1411_vm4, %v1413_v7, %v1409_v15 }
 0x4b4   :  { %v2090_v60 = vpop.eup %2089 }
 0x4b5   :  { %v1420_v13 = vmul.f32 %v2090_v60, %v1414_v51 }
 0x4b7   :  { %1441 = vmatmul.f32.vlgmr.msra.gmra.mxu0 %v1420_v13  ;;  %1461 = vmatmul.f32.vlgmr.msra.gmra.mxu1 %v1420_v13 }
 0x4b8   :  { %1481 = vmatmul.f32.vlgmr.msrb.gmra.mxu2 %v1420_v13  ;;  %1501 = vmatmul.f32.vlgmr.msrb.gmra.mxu3 %v1420_v13 }
 0x4b9   :  { %1727 = vmatpush.msra.mxu0 %v3029_v49  ;;  %1747 = vmatpush.msra.mxu1 %v3032_v14  ;;  %v3779_v49 = vld [vmem:[#allocation20_spill] sm:$0xff]  ;;  %v3780_v14 = vld [vmem:[#allocation30_spill] sm:$0xff] }
 0x4ba   :  { %1767 = vmatpush.msrb.mxu2 %v3167_v37  ;;  %1787 = vmatpush.msrb.mxu3 %v3170_v58  ;;  %v3799_v37 = vld [vmem:[#allocation35_spill] sm:$0xff]  ;;  %v3800_v58 = vld [vmem:[#allocation40_spill] sm:$0xff] }
 0x4bb   :  { %1728 = vmatpush.msra.mxu0 %v3037_v55  ;;  %1748 = vmatpush.msra.mxu1 %v3040_v30  ;;  %v3781_v55 = vld [vmem:[#allocation13_spill] sm:$0xff]  ;;  %v3782_v30 = vld [vmem:[#allocation14_spill] sm:$0xff] }
 0x4bc   :  { %1768 = vmatpush.msrb.mxu2 %v3175_v6  ;;  %1788 = vmatpush.msrb.mxu3 %v3178_v9  ;;  %v3801_v6 = vld [vmem:[#allocation29_spill] sm:$0xff]  ;;  %v3802_v9 = vld [vmem:[#allocation19_spill] sm:$0xff] }
 0x4bd   :  { %1729 = vmatpush.msra.mxu0 %v3045_v48  ;;  %1749 = vmatpush.msra.mxu1 %v3048_v20  ;;  %v3783_v48 = vld [vmem:[#allocation31_spill] sm:$0xff]  ;;  %v3784_v20 = vld [vmem:[#allocation21_spill] sm:$0xff] }
 0x4be   :  { %1769 = vmatpush.msrb.mxu2 %v3183_v19  ;;  %1789 = vmatpush.msrb.mxu3 %v3186_v38  ;;  %v3803_v19 = vld [vmem:[#allocation41_spill] sm:$0xff]  ;;  %v3804_v38 = vld [vmem:[#allocation39_spill] sm:$0xff] }
 0x4bf   :  { %1730 = vmatpush.msra.mxu0 %v3053_v27  ;;  %1750 = vmatpush.msra.mxu1 %v3056_v28  ;;  %v3785_v27 = vld [vmem:[#allocation25_spill] sm:$0xff]  ;;  %v3786_v28 = vld [vmem:[#allocation15_spill] sm:$0xff] }
 0x4c0   :  { %1770 = vmatpush.msrb.mxu2 %v3191_v17  ;;  %1790 = vmatpush.msrb.mxu3 %v3194_v25 }
 0x4c1   :  { %1731 = vmatpush.msra.mxu0 %v3061_v31  ;;  %1751 = vmatpush.msra.mxu1 %v3064_v32  ;;  %v3787_v31 = vld [vmem:[#allocation22_spill] sm:$0xff]  ;;  %v3788_v32 = vld [vmem:[#allocation32_spill] sm:$0xff] }
 0x4c2   :  { %1771 = vmatpush.msrb.mxu2 %v3199_v40  ;;  %1791 = vmatpush.msrb.mxu3 %v3202_v29  ;;  %v3805_v40 = vld [vmem:[#allocation56_spill] sm:$0xff] }
 0x4c3   :  { %1732 = vmatpush.msra.mxu0 %v3069_v33  ;;  %1752 = vmatpush.msra.mxu1 %v3072_v34  ;;  %v3789_v33 = vld [vmem:[#allocation16_spill] sm:$0xff]  ;;  %v3790_v34 = vld [vmem:[#allocation26_spill] sm:$0xff] }
 0x4c4   :  { %1772 = vmatpush.msrb.mxu2 %v3207_v5  ;;  %1792 = vmatpush.msrb.mxu3 %v3210_v26  ;;  %v3806_v5 = vld [vmem:[#allocation57_spill] sm:$0xff] }
 0x4c5   :  { %1733 = vmatpush.msra.mxu0 %v3077_v35  ;;  %1753 = vmatpush.msra.mxu1 %v3080_v36  ;;  %v3791_v35 = vld [vmem:[#allocation33_spill] sm:$0xff]  ;;  %v3792_v36 = vld [vmem:[#allocation23_spill] sm:$0xff] }
 0x4c6   :  { %1773 = vmatpush.msrb.mxu2 %v3215_v47  ;;  %1793 = vmatpush.msrb.mxu3 %v3218_v23 }
 0x4c7   :  { %1734 = vmatpush.msra.mxu0 %v3085_v43  ;;  %1754 = vmatpush.msra.mxu1 %v3088_v39  ;;  %v3793_v43 = vld [vmem:[#allocation27_spill] sm:$0xff]  ;;  %v3794_v39 = vld [vmem:[#allocation17_spill] sm:$0xff] }
 0x4c8   :  { %1774 = vmatpush.msrb.mxu2 %v3223_v4  ;;  %1794 = vmatpush.msrb.mxu3 %v3226_v16  ;;  %v3807_v16 = vld [vmem:[#allocation55_spill] sm:$0xff] }
 0x4c9   :  { %1735 = vmatpush.msra.mxu0 %v3093_v42  ;;  %1755 = vmatpush.msra.mxu1 %v3096_v44  ;;  %v3795_v42 = vld [vmem:[#allocation24_spill] sm:$0xff]  ;;  %v3796_v44 = vld [vmem:[#allocation34_spill] sm:$0xff] }
 0x4ca   :  { %1775 = vmatpush.msrb.mxu2 %v3231_v41  ;;  %1795 = vmatpush.msrb.mxu3 %v3234_v54 }
 0x4cb   :  { %1736 = vmatpush.msra.mxu0 %v3101_v45  ;;  %1756 = vmatpush.msra.mxu1 %v3104_v46  ;;  %v3797_v45 = vld [vmem:[#allocation18_spill] sm:$0xff]  ;;  %v3798_v46 = vld [vmem:[#allocation28_spill] sm:$0xff] }
 0x4cc   :  { %1776 = vmatpush.msrb.mxu2 %v3779_v49  ;;  %1796 = vmatpush.msrb.mxu3 %v3780_v14 }
 0x4cd   :  { %1737 = vmatpush.msra.mxu0 %v3781_v55  ;;  %1757 = vmatpush.msra.mxu1 %v3782_v30 }
 0x4ce   :  { %1777 = vmatpush.msrb.mxu2 %v3783_v48  ;;  %1797 = vmatpush.msrb.mxu3 %v3784_v20 }
 0x4cf   :  { %1738 = vmatpush.msra.mxu0 %v3785_v27  ;;  %1758 = vmatpush.msra.mxu1 %v3786_v28 }
 0x4d0   :  { %1778 = vmatpush.msrb.mxu2 %v3787_v31  ;;  %1798 = vmatpush.msrb.mxu3 %v3788_v32 }
 0x4d1   :  { %1739 = vmatpush.msra.mxu0 %v3789_v33  ;;  %1759 = vmatpush.msra.mxu1 %v3790_v34 }
 0x4d2   :  { %1779 = vmatpush.msrb.mxu2 %v3791_v35  ;;  %1799 = vmatpush.msrb.mxu3 %v3792_v36 }
 0x4d3   :  { %1740 = vmatpush.msra.mxu0 %v3793_v43  ;;  %1760 = vmatpush.msra.mxu1 %v3794_v39 }
 0x4d4   :  { %1780 = vmatpush.msrb.mxu2 %v3795_v42  ;;  %1800 = vmatpush.msrb.mxu3 %v3796_v44 }
 0x4d5   :  { %1741 = vmatpush.msra.mxu0 %v3797_v45  ;;  %1761 = vmatpush.msra.mxu1 %v3798_v46 }
 0x4d6   :  { %1781 = vmatpush.msrb.mxu2 %v3799_v37  ;;  %1801 = vmatpush.msrb.mxu3 %v3800_v58  ;;  %v3809_v58 = vld [vmem:[#allocation60_spill] sm:$0xff] }
 0x4d7   :  { %1742 = vmatpush.msra.mxu0 %v3801_v6  ;;  %1762 = vmatpush.msra.mxu1 %v3802_v9  ;;  %v3810_v9 = vld [vmem:[#allocation61_spill] sm:$0xff] }
 0x4d8   :  { %1782 = vmatpush.msrb.mxu2 %v3803_v19  ;;  %1802 = vmatpush.msrb.mxu3 %v3804_v38 }
 0x534   :  { %v1442_v17 = vpop.f32.mrf.mxu0  ;;  %v1462_v25 = vpop.f32.mrf.mxu1 }
 0x535   :  { %v1505_v29 = vadd.f32 %v1442_v17, %v3805_v40  ;;  %v1506_v26 = vadd.f32 %v1462_v25, %v3806_v5  ;;  %v3811_v40 = vld [vmem:[#allocation59_spill] sm:$0xff] }
 0x537   :  { %v1986_v47 = vmul.f32 -1.442695, %v1505_v29  ;;  %v1987_v23 = vmul.f32 -1.442695, %v1506_v26 }
 0x539   :  { %2091 = vpow2.f32 %v1986_v47 }
 0x53a   :  { %2093 = vpow2.f32 %v1987_v23 }
 0x53b   :  { %v1502_v4 = vpop.f32.mrf.mxu3  ;;  %v1482_v1 = vpop.f32.mrf.mxu2 }
 0x53c   :  { %v1508_v41 = vadd.f32 %v1502_v4, %v3807_v16  ;;  %v1507_v12 = vadd.f32 %v1482_v1, %v3808_v18 }
 0x53e   :  { %v1988_v54 = vmul.f32 -1.442695, %v1508_v41 }
 0x53f   :  { %v2092_v61 = vpop.eup %2091 }
 0x540   :  { %v2094_v50 = vpop.eup %2093  ;;  %v1512_v52 = vadd.f32 1.0, %v2092_v61  ;;  %2095 = vpow2.f32 %v1988_v54 }
 0x541   :  { %v1531_v53 = vadd.f32 1.0, %v2094_v50  ;;  %v3812_v50 = vld [vmem:[#allocation58_spill] sm:$0xff] }
 0x542   :  { %2097 = vrcp.f32 %v1512_v52  ;;  %v1524_v24 = vand.u32 2147483648, %v1512_v52  ;;  %v1522_v56 = vand.u32 2147483647, %v1512_v52  ;;  %vm1518_vm7 = vweird.f32 %v1512_v52 }
 0x543   :  { %2099 = vrcp.f32 %v1531_v53  ;;  %v1543_v2 = vand.u32 2147483648, %v1531_v53  ;;  %v1541_v15 = vand.u32 2147483647, %v1531_v53  ;;  %vm1537_vm8 = vweird.f32 %v1531_v53 }
 0x544   :  { %v1525_v51 = vor.u32 1.1754944e-38, %v1524_v24  ;;  %vm1523_vm11 = vcmp.eq.f32.partialorder %v1522_v56, 8.507059e+37 }
 0x545   :  { %v1544_v14 = vor.u32 1.1754944e-38, %v1543_v2  ;;  %vm1542_vm12 = vcmp.eq.f32.partialorder %v1541_v15, 8.507059e+37 }
 0x546   :  { %v2096_v21 = vpop.eup %2095 }
 0x547   :  { %v1551_v59 = vadd.f32 1.0, %v2096_v21 }
 0x548   :  { %v2098_v57 = vpop.eup %2097 }
 0x549   :  { %v2100_v10 = vpop.eup %2099  ;;  %v1514_v62 = vmul.f32 %v2098_v57, %v1512_v52  ;;  %2101 = vrcp.f32 %v1551_v59  ;;  %vm1519_vm5 = vweird.f32 %v2098_v57  ;;  %v1563_v36 = vand.u32 2147483648, %v1551_v59 }
 0x54a   :  { %v1533_v0 = vmul.f32 %v2100_v10, %v1531_v53  ;;  %2103 = vtanh.f32 %v1507_v12  ;;  %vm1538_vm6 = vweird.f32 %v2100_v10  ;;  %vm1520_vm9 = vmor %vm1518_vm7, %vm1519_vm5  ;;  %vm1557_vm14 = vweird.f32 %v1551_v59 }
 0x54b   :  { %v1515_v11 = vsub.f32 1.0, %v1514_v62  ;;  %vm1539_vm10 = vmor %vm1537_vm8, %vm1538_vm6  ;;  %v1561_v43 = vand.u32 2147483647, %v1551_v59  ;;  %v1564_v42 = vor.u32 1.1754944e-38, %v1563_v36 }
 0x54c   :  { %v1534_v3 = vsub.f32 1.0, %v1533_v0 }
 0x54d   :  { %v1516_v22 = vmul.f32 %v2098_v57, %v1515_v11  ;;  %vm1562_vm0 = vcmp.eq.f32.partialorder %v1561_v43, 8.507059e+37  ;;  %v1888_v43 = vld [vmem:[#allocation8 + $0x70] sm:$0xff] }
 0x54e   :  { %v1535_v63 = vmul.f32 %v2100_v10, %v1534_v3 }
 0x54f   :  { %v2102_v7 = vpop.eup %2101  ;;  %v1517_v60 = vadd.f32 %v2098_v57, %v1516_v22 }
 0x550   :  { %v1536_v13 = vadd.f32 %v2100_v10, %v1535_v63  ;;  %v1553_v49 = vmul.f32 %v2102_v7, %v1551_v59  ;;  %v2104_v30 = vpop.eup %2103  ;;  %vm1558_vm13 = vweird.f32 %v2102_v7 }
 0x551   :  { %v1521_v55 = vsel %vm1520_vm9, %v2098_v57, %v1517_v60  ;;  %vm1559_vm15 = vmor %vm1557_vm14, %vm1558_vm13 }
 0x552   :  { %v1526_v48 = vsel %vm1523_vm11, %v1525_v51, %v1521_v55  ;;  %v1540_v20 = vsel %vm1539_vm10, %v2100_v10, %v1536_v13  ;;  %v1554_v27 = vsub.f32 1.0, %v1553_v49 }
 0x553   :  { %v1545_v28 = vsel %vm1542_vm12, %v1544_v14, %v1540_v20  ;;  %v1568_v31 = vmul.f32 %v2104_v30, %v1526_v48 }
 0x554   :  { %v1567_v32 = vmul.f32 %v1545_v28, %v3370_v8  ;;  %v1555_v33 = vmul.f32 %v2102_v7, %v1554_v27 }
 0x556   :  { %v3442_v34 = vadd.f32 %v1568_v31, %v1567_v32  ;;  %v1556_v35 = vadd.f32 %v2102_v7, %v1555_v33 }
 0x558   :  { %2105 = vtanh.f32 %v3442_v34  ;;  %v1560_v39 = vsel %vm1559_vm15, %v2102_v7, %v1556_v35 }
 0x559   :  { %v1565_v45 = vsel %vm1562_vm0, %v1564_v42, %v1560_v39  ;;  %v1887_v39 = vld [vmem:[#allocation8 + $0x68] sm:$0xff]  ;;  %v1886_v42 = vld [vmem:[#allocation8 + $0x60] sm:$0xff] }
 0x55e   :  { %v2106_v44 = vpop.eup %2105 }
 0x55f   :  { %v1571_v46 = vmul.f32 %v2106_v44, %v1565_v45  ;;  %v1885_v44 = vld [vmem:[#allocation8 + $0x58] sm:$0xff]  ;;  %v1884_v45 = vld [vmem:[#allocation8 + $0x50] sm:$0xff] }
 0x561   :  { %1592 = vmatmul.f32.vlgmr.msrb.gmra.mxu0 %v1571_v46  ;;  %1612 = vmatmul.f32.vlgmr.msrb.gmra.mxu1 %v1571_v46 }
 0x562   :  { %1632 = vmatmul.f32.vlgmr.msra.gmra.mxu2 %v1571_v46  ;;  %1652 = vmatmul.f32.vlgmr.msra.gmra.mxu3 %v1571_v46  ;;  %v1883_v46 = vld [vmem:[#allocation8 + $0x48] sm:$0xff] }
 0x5de   :  { %v1593_v8 = vpop.f32.mrf.mxu0  ;;  %v1613_v37 = vpop.f32.mrf.mxu1 }
 0x5df   :  { %v1656_v6 = vadd.f32 %v1593_v8, %v3809_v58  ;;  %v1657_v19 = vadd.f32 %v1613_v37, %v3810_v9  ;;  %v1882_v8 = vld [vmem:[#allocation8 + $0x40] sm:$0xff]  ;;  %v1881_v37 = vld [vmem:[#allocation8 + $0x38] sm:$0xff]  ;;  %v1880_v58 = vld [vmem:[#allocation8 + $0x30] sm:$0xff] }
 0x5e1   :  { %v1989_v38 = vmul.f32 -1.442695, %v1656_v6  ;;  %v1990_v17 = vmul.f32 -1.442695, %v1657_v19  ;;  %v3813_v19 = vld [vmem:[#allocation62_spill] sm:$0xff] }
 0x5e3   :  { %2107 = vpow2.f32 %v1989_v38 }
 0x5e4   :  { %2109 = vpow2.f32 %v1990_v17  ;;  %v3814_v17 = vld [vmem:[#allocation63_spill] sm:$0xff] }
 0x5e5   :  { %v1653_v25 = vpop.f32.mrf.mxu3  ;;  %v1633_v16 = vpop.f32.mrf.mxu2 }
 0x5e6   :  { %v1659_v29 = vadd.f32 %v1653_v25, %v3811_v40  ;;  %v1658_v52 = vadd.f32 %v1633_v16, %v3812_v50  ;;  %v1879_v40 = vld [vmem:[#allocation8 + $0x28] sm:$0xff] }
 0x5e7   :  { %v3816_v16 = vld [vmem:[#allocation12_spill] sm:$0xff] }
 0x5e8   :  { %v1991_v5 = vmul.f32 -1.442695, %v1659_v29 }
 0x5e9   :  { %v2108_v26 = vpop.eup %2107 }
 0x5ea   :  { %v2110_v47 = vpop.eup %2109  ;;  %v1663_v23 = vadd.f32 1.0, %v2108_v26  ;;  %2111 = vpow2.f32 %v1991_v5  ;;  %v1878_v26 = vld [vmem:[#allocation8 + $0x20] sm:$0xff] }
 0x5eb   :  { %v1682_v4 = vadd.f32 1.0, %v2110_v47  ;;  %v1877_v47 = vld [vmem:[#allocation8 + $0x18] sm:$0xff] }
 0x5ec   :  { %2113 = vrcp.f32 %v1663_v23  ;;  %v1675_v18 = vand.u32 2147483648, %v1663_v23  ;;  %v1673_v62 = vand.u32 2147483647, %v1663_v23  ;;  %vm1669_vm3 = vweird.f32 %v1663_v23 }
 0x5ed   :  { %2115 = vrcp.f32 %v1682_v4  ;;  %v1694_v12 = vand.u32 2147483648, %v1682_v4  ;;  %v1692_v11 = vand.u32 2147483647, %v1682_v4  ;;  %vm1688_vm4 = vweird.f32 %v1682_v4 }
 0x5ee   :  { %v1676_v2 = vor.u32 1.1754944e-38, %v1675_v18  ;;  %vm1674_vm7 = vcmp.eq.f32.partialorder %v1673_v62, 8.507059e+37  ;;  %v1930_v18 = vld [vmem:[%s3534_s13 + $0x78] sm:$0xff] }
 0x5ef   :  { %v1695_v63 = vor.u32 1.1754944e-38, %v1694_v12  ;;  %vm1693_vm8 = vcmp.eq.f32.partialorder %v1692_v11, 8.507059e+37  ;;  %v1929_v12 = vld [vmem:[%s3534_s13 + $0x70] sm:$0xff]  ;;  %1935 = vmatpush.msrb.mxu1 %v1930_v18 }
 0x5f0   :  { %v2112_v41 = vpop.eup %2111 }
 0x5f1   :  { %v1702_v54 = vadd.f32 1.0, %v2112_v41  ;;  %1936 = vmatpush.msrb.mxu1 %v1929_v12 }
 0x5f2   :  { %v2114_v61 = vpop.eup %2113 }
 0x5f3   :  { %v2116_v53 = vpop.eup %2115  ;;  %v1665_v1 = vmul.f32 %v2114_v61, %v1663_v23  ;;  %2117 = vrcp.f32 %v1702_v54  ;;  %vm1670_vm1 = vweird.f32 %v2114_v61  ;;  %v1714_v27 = vand.u32 2147483648, %v1702_v54  ;;  %v1876_v23 = vld [vmem:[#allocation8 + $0x10] sm:$0xff] }
 0x5f4   :  { %v1684_v21 = vmul.f32 %v2116_v53, %v1682_v4  ;;  %2119 = vtanh.f32 %v1658_v52  ;;  %vm1689_vm2 = vweird.f32 %v2116_v53  ;;  %vm1671_vm5 = vmor %vm1669_vm3, %vm1670_vm1  ;;  %vm1708_vm10 = vweird.f32 %v1702_v54  ;;  %v3815_v4 = vld [vmem:[#allocation37_spill] sm:$0xff]  ;;  %v1874_v52 = vld [vmem:[#allocation8] sm:$0xff] }
 0x5f5   :  { %v1666_v59 = vsub.f32 1.0, %v1665_v1  ;;  %vm1690_vm6 = vmor %vm1688_vm4, %vm1689_vm2  ;;  %v1712_v28 = vand.u32 2147483647, %v1702_v54  ;;  %v1715_v32 = vor.u32 1.1754944e-38, %v1714_v27  ;;  %v568_v41 = vadd.f32 %v3816_v16, %v3815_v4 }
 0x5f6   :  { %v1685_v57 = vsub.f32 1.0, %v1684_v21 }
 0x5f7   :  { %v1667_v10 = vmul.f32 %v2114_v61, %v1666_v59  ;;  %vm1713_vm12 = vcmp.eq.f32.partialorder %v1712_v28, 8.507059e+37 }
 0x5f8   :  { %v1686_v0 = vmul.f32 %v2116_v53, %v1685_v57 }
 0x5f9   :  { %v2118_v3 = vpop.eup %2117  ;;  %v1668_v24 = vadd.f32 %v2114_v61, %v1667_v10  ;;  %v1928_v10 = vld [vmem:[%s3534_s13 + $0x68] sm:$0xff] }
 0x5fa   :  { %v1687_v22 = vadd.f32 %v2116_v53, %v1686_v0  ;;  %v1704_v56 = vmul.f32 %v2118_v3, %v1702_v54  ;;  %v2120_v7 = vpop.eup %2119  ;;  %vm1709_vm9 = vweird.f32 %v2118_v3  ;;  %v1927_v0 = vld [vmem:[%s3534_s13 + $0x60] sm:$0xff]  ;;  %1937 = vmatpush.msrb.mxu1 %v1928_v10 }
 0x5fb   :  { %v1672_v15 = vsel %vm1671_vm5, %v2114_v61, %v1668_v24  ;;  %vm1710_vm11 = vmor %vm1708_vm10, %vm1709_vm9  ;;  %v1875_v61 = vld [vmem:[#allocation8 + $0x8] sm:$0xff]  ;;  %v3818_v24 = vld [vmem:[#allocation11_spill] sm:$0xff]  ;;  %vm1955_vm9 = vcmask 7168  }
 0x5fc   :  { %v1677_v60 = vsel %vm1674_vm7, %v1676_v2, %v1672_v15  ;;  %v1691_v51 = vsel %vm1690_vm6, %v2116_v53, %v1687_v22  ;;  %v1705_v13 = vsub.f32 1.0, %v1704_v56  ;;  %v1926_v56 = vld [vmem:[%s3534_s13 + $0x58] sm:$0xff]  ;;  %1938 = vmatpush.msrb.mxu1 %v1927_v0 }
 0x5fd   :  { %v1696_v49 = vsel %vm1693_vm8, %v1695_v63, %v1691_v51  ;;  %v1719_v14 = vmul.f32 %v2120_v7, %v1677_v60  ;;  %v1925_v51 = vld [vmem:[%s3534_s13 + $0x50] sm:$0xff] }
 0x5fe   :  { %v1718_v55 = vmul.f32 %v1696_v49, %v3442_v34  ;;  %v1706_v30 = vmul.f32 %v2118_v3, %v1705_v13  ;;  %v1889_v34 = vld [vmem:[#allocation8 + $0x78] sm:$0xff]  ;;  %1939 = vmatpush.msrb.mxu1 %v1926_v56 }
 0x5ff   :  { %1894 = vmatpush.msrb.mxu0 %v1889_v34  ;;  %v1922_v34 = vld [vmem:[%s3534_s13 + $0x38] sm:$0xff] }
 0x600   :  { %v3450_v48 = vadd.f32 %v1719_v14, %v1718_v55  ;;  %v1707_v20 = vadd.f32 %v2118_v3, %v1706_v30  ;;  %v1924_v14 = vld [vmem:[%s3534_s13 + $0x48] sm:$0xff]  ;;  %1940 = vmatpush.msrb.mxu1 %v1925_v51 }
 0x601   :  { %1895 = vmatpush.msrb.mxu0 %v1888_v43 }
 0x602   :  { %2121 = vtanh.f32 %v3450_v48  ;;  %v1711_v31 = vsel %vm1710_vm11, %v2118_v3, %v1707_v20  ;;  %v3817_v3 = vld [vmem:[#allocation36_spill] sm:$0xff]  ;;  %1941 = vmatpush.msrb.mxu1 %v1924_v14 }
 0x603   :  { %v1716_v35 = vsel %vm1713_vm12, %v1715_v32, %v1711_v31  ;;  %1896 = vmatpush.msrb.mxu0 %v1887_v39  ;;  %v527_v2 = vadd.f32 %v3818_v24, %v3817_v3  ;;  %v1923_v31 = vld [vmem:[%s3534_s13 + $0x40] sm:$0xff] }
 0x604   :  { %1942 = vmatpush.msrb.mxu1 %v1923_v31 }
 0x605   :  { %1897 = vmatpush.msrb.mxu0 %v1886_v42 }
 0x606   :  { %1943 = vmatpush.msrb.mxu1 %v1922_v34 }
 0x607   :  { %1898 = vmatpush.msrb.mxu0 %v1885_v44 }
 0x608   :  { %v2122_v33 = vpop.eup %2121 }
 0x609   :  { %v1722_v36 = vmul.f32 %v2122_v33, %v1716_v35  ;;  %1899 = vmatpush.msrb.mxu0 %v1884_v45 }
 0x60b   :  { %1743 = vmatmul.f32.vlgmr.msra.gmra.mxu0 %v1722_v36  ;;  %1763 = vmatmul.f32.vlgmr.msra.gmra.mxu1 %v1722_v36 }
 0x60c   :  { %1783 = vmatmul.f32.vlgmr.msrb.gmra.mxu2 %v1722_v36  ;;  %1803 = vmatmul.f32.vlgmr.msrb.gmra.mxu3 %v1722_v36 }
 0x60d   :  { %1900 = vmatpush.msrb.mxu0 %v1883_v46  ;;  %v1921_v46 = vld [vmem:[%s3534_s13 + $0x30] sm:$0xff] }
 0x60e   :  { %1944 = vmatpush.msrb.mxu1 %v1921_v46 }
 0x60f   :  { %1901 = vmatpush.msrb.mxu0 %v1882_v8 }
 0x611   :  { %1902 = vmatpush.msrb.mxu0 %v1881_v37 }
 0x613   :  { %1903 = vmatpush.msrb.mxu0 %v1880_v58 }
 0x615   :  { %1904 = vmatpush.msrb.mxu0 %v1879_v40  ;;  %v1919_v40 = vld [vmem:[%s3534_s13 + $0x20] sm:$0xff] }
 0x617   :  { %1905 = vmatpush.msrb.mxu0 %v1878_v26  ;;  %v1918_v26 = vld [vmem:[%s3534_s13 + $0x18] sm:$0xff] }
 0x619   :  { %1906 = vmatpush.msrb.mxu0 %v1877_v47 }
 0x61b   :  { %1907 = vmatpush.msrb.mxu0 %v1876_v23 }
 0x61d   :  { %1908 = vmatpush.msrb.mxu0 %v1875_v61  ;;  %v1917_v61 = vld [vmem:[%s3534_s13 + $0x10] sm:$0xff] }
 0x61f   :  { %1909 = vmatpush.msrb.mxu0 %v1874_v52  ;;  %v1915_v52 = vld [vmem:[%s3534_s13] sm:$0xff] }
 0x688   :  { %v1744_v6 = vpop.f32.mrf.mxu0  ;;  %v1764_v9 = vpop.f32.mrf.mxu1 }
 0x689   :  { %v1807_v38 = vadd.f32 %v1744_v6, %v3813_v19  ;;  %v1808_v25 = vadd.f32 %v1764_v9, %v3814_v17 }
 0x68b   :  { %v1992_v29 = vmul.f32 -1.442695, %v1807_v38  ;;  %v1993_v5 = vmul.f32 -1.442695, %v1808_v25  ;;  %v1920_v38 = vld [vmem:[%s3534_s13 + $0x28] sm:$0xff] }
 0x68c   :  { %1945 = vmatpush.msrb.mxu1 %v1920_v38 }
 0x68d   :  { %2123 = vpow2.f32 %v1992_v29 }
 0x68e   :  { %2125 = vpow2.f32 %v1993_v5  ;;  %1946 = vmatpush.msrb.mxu1 %v1919_v40 }
 0x68f   :  { %v1804_v54 = vpop.f32.mrf.mxu3  ;;  %v1784_v62 = vpop.f32.mrf.mxu2 }
 0x690   :  { %v1810_v50 = vadd.f32 %v1804_v54, %v568_v41  ;;  %v1809_v15 = vadd.f32 %v1784_v62, %v527_v2  ;;  %1947 = vmatpush.msrb.mxu1 %v1918_v26 }
 0x692   :  { %v1994_v53 = vmul.f32 -1.442695, %v1810_v50  ;;  %1948 = vmatpush.msrb.mxu1 %v1917_v61  ;;  %v1916_v50 = vld [vmem:[%s3534_s13 + $0x8] sm:$0xff] }
 0x693   :  { %v2124_v1 = vpop.eup %2123 }
 0x694   :  { %v2126_v21 = vpop.eup %2125  ;;  %v1814_v59 = vadd.f32 1.0, %v2124_v1  ;;  %2127 = vpow2.f32 %v1994_v53  ;;  %1949 = vmatpush.msrb.mxu1 %v1916_v50  ;;  %v2007_v53 = vld [vmem:[%s3533_s12] ss:$0 sm:$0xff] }
 0x695   :  { %v1833_v57 = vadd.f32 1.0, %v2126_v21 }
 0x696   :  { %2129 = vrcp.f32 %v1814_v59  ;;  %v1826_v30 = vand.u32 2147483648, %v1814_v59  ;;  %v1824_v28 = vand.u32 2147483647, %v1814_v59  ;;  %vm1820_vm15 = vweird.f32 %v1814_v59  ;;  %1950 = vmatpush.msrb.mxu1 %v1915_v52 }
 0x697   :  { %2131 = vrcp.f32 %v1833_v57  ;;  %v1845_v20 = vand.u32 2147483648, %v1833_v57  ;;  %v1843_v33 = vand.u32 2147483647, %v1833_v57  ;;  %vm1839_vm0 = vweird.f32 %v1833_v57 }
 0x698   :  { %v1827_v43 = vor.u32 1.1754944e-38, %v1826_v30  ;;  %vm1825_vm3 = vcmp.eq.f32.partialorder %v1824_v28, 8.507059e+37 }
 0x699   :  { %v1846_v44 = vor.u32 1.1754944e-38, %v1845_v20  ;;  %vm1844_vm4 = vcmp.eq.f32.partialorder %v1843_v33, 8.507059e+37 }
 0x69a   :  { %v2128_v11 = vpop.eup %2127 }
 0x69b   :  { %v3471_v22 = vadd.f32 1.0, %v2128_v11 }
 0x69c   :  { %v2130_v63 = vpop.eup %2129 }
 0x69d   :  { %v2132_v7 = vpop.eup %2131  ;;  %v1816_v60 = vmul.f32 %v2130_v63, %v1814_v59  ;;  %2133 = vrcp.f32 %v3471_v22  ;;  %vm1821_vm13 = vweird.f32 %v2130_v63  ;;  %v1865_v47 = vand.u32 2147483648, %v3471_v22 }
 0x69e   :  { %v1835_v13 = vmul.f32 %v2132_v7, %v1833_v57  ;;  %2135 = vtanh.f32 %v1809_v15  ;;  %vm1840_vm14 = vweird.f32 %v2132_v7  ;;  %vm1822_vm1 = vmor %vm1820_vm15, %vm1821_vm13  ;;  %vm1859_vm6 = vweird.f32 %v3471_v22  ;;  %v2008_v57 = vld [vmem:[#allocation3] ss:$0 sm:$0xff] }
 0x69f   :  { %v1817_v49 = vsub.f32 1.0, %v1816_v60  ;;  %vm1841_vm2 = vmor %vm1839_vm0, %vm1840_vm14  ;;  %v1866_v4 = vor.u32 1.1754944e-38, %v1865_v47 }
 0x6a0   :  { %v1836_v55 = vsub.f32 1.0, %v1835_v13 }
 0x6a1   :  { %v1818_v27 = vmul.f32 %v2130_v63, %v1817_v49 }
 0x6a2   :  { %v1837_v32 = vmul.f32 %v2132_v7, %v1836_v55 }
 0x6a3   :  { %v2134_v35 = vpop.eup %2133  ;;  %v1819_v36 = vadd.f32 %v2130_v63, %v1818_v27 }
 0x6a4   :  { %v1838_v39 = vadd.f32 %v2132_v7, %v1837_v32  ;;  %v1855_v42 = vmul.f32 %v2134_v35, %v3471_v22  ;;  %v2136_v8 = vpop.eup %2135  ;;  %vm1860_vm5 = vweird.f32 %v2134_v35 }
 0x6a5   :  { %v1823_v45 = vsel %vm1822_vm1, %v2130_v63, %v1819_v36  ;;  %vm1861_vm7 = vmor %vm1859_vm6, %vm1860_vm5 }
 0x6a6   :  { %v1828_v37 = vsel %vm1825_vm3, %v1827_v43, %v1823_v45  ;;  %v1842_v58 = vsel %vm1841_vm2, %v2132_v7, %v1838_v39  ;;  %v1856_v6 = vsub.f32 1.0, %v1855_v42 }
 0x6a7   :  { %v1847_v9 = vsel %vm1844_vm4, %v1846_v44, %v1842_v58  ;;  %v1870_v19 = vmul.f32 %v2136_v8, %v1828_v37 }
 0x6a8   :  { %v1869_v17 = vmul.f32 %v1847_v9, %v3450_v48  ;;  %v1857_v25 = vmul.f32 %v2134_v35, %v1856_v6  ;;  %v1863_v48 = vand.u32 2147483647, %v3471_v22 }
 0x6aa   :  { %v1871_v29 = vadd.f32 %v1870_v19, %v1869_v17  ;;  %v1858_v5 = vadd.f32 %v2134_v35, %v1857_v25  ;;  %vm1864_vm8 = vcmp.eq.f32.partialorder %v1863_v48, 8.507059e+37 }
 0x6ac   :  { %2137 = vtanh.f32 %v1871_v29  ;;  %v1862_v23 = vsel %vm1861_vm7, %v2134_v35, %v1858_v5 }
 0x6ad   :  { %v1867_v41 = vsel %vm1864_vm8, %v1866_v4, %v1862_v23 }
 0x6b2   :  { %v2138_v16 = vpop.eup %2137 }
 0x6b3   :  { %v1873_v54 = vmul.f32 %v2138_v16, %v1867_v41 }
 0x6b5   :  { %1910 = vmatmul.f32.vlgmr.msrb.gmra.mxu0 %v1873_v54 }
 0x732   :  { %v1911_v1 = vpop.f32.mrf.mxu0 }
 0x733   :  { %v1912_v21 = vadd.f32 %v2007_v53, %v1911_v1 }
 0x735   :  { %v1914_v59 = vmax.f32 %v1912_v21, 0.0 }
 0x737   :  { %1951 = vmatmul.f32.vlgmr.msrb.gmra.mxu1 %v1914_v59 }
 0x7b4   :  { %v1952_v18 = vpop.f32.mrf.mxu1 }
 0x7b5   :  { %v1953_v12 = vadd.f32 %v2008_v57, %v1952_v18 }
 0x7b7   :  { %1956 = vst.msk [vmem:[%s3536_s15] sm:$0xff] %vm1955_vm9, %v1953_v12 }
 0x7b8   :  { %1961 = vsyncpa [#allocation5], 1 }
 0x7b9   :  { %1962 = vsyncpa [#allocation7], 1 }

</bundles_post_ra>
